<compile_context>
chip_gen: v5e
topology: v5e:2x2
jax: 0.10.0
libtpu: 0.0.40
codegen_flags: <defaults>
</compile_context>

<pallas_src>
import functools

import jax
import jax.numpy as jnp
from jax.experimental import pallas as pl
from jax.experimental.pallas import tpu as pltpu

BETA_T = 2.5       # temporal sharpness (module passes beta=2.5)
BETA_L = 2.5       # TODO(synk): LogicalOperator(avm=True) source not given; reconstructed.
DENOM_EPS = 1e-30  # guards a pathological all-zero weight row only


def _round_up(n, m):
    return ((n + m - 1) // m) * m


def _soft_max_min(r, w, beta, axis, keepdims=False):
    """Weighted soft-max AND soft-min of `r` (weights `w`) sharing a single exp.

    Midpoint stabilization: e = exp(beta*(r - (max+min)/2)); softmin weights are w/e
    (the common scale cancels in num/den).  Approx reciprocal only for 1/e (EUP slot);
    the small denominator normalizations use exact division for better f64 parity.
    """
    f32 = jnp.float32
    hi = jnp.max(r, axis=axis, keepdims=True)
    lo = jnp.min(r, axis=axis, keepdims=True)
    e = jnp.exp(beta * (r - 0.5 * (hi + lo)))            # one EUP exp for both directions
    ie = pl.reciprocal(e, approx=True)                   # EUP vrcp -> softmin weights
    we, wie = w * e, w * ie
    num_mx = jnp.sum((we * r).astype(f32), axis=axis, keepdims=keepdims)
    den_mx = jnp.sum(we.astype(f32), axis=axis, keepdims=keepdims)
    num_mn = jnp.sum((wie * r).astype(f32), axis=axis, keepdims=keepdims)
    den_mn = jnp.sum(wie.astype(f32), axis=axis, keepdims=keepdims)
    smax = num_mx / (den_mx + DENOM_EPS)
    smin = num_mn / (den_mn + DENOM_EPS)
    return smax, smin


def naval_kernel(x_ref, pt_ref, pc_ref, r_ref, *, nf, t_len, group_sizes, compute_dtype):
    """One batch tile.

    x_ref : (D, T, TB)   signal tile, batch on the 128-lane axis
    pt_ref: (NF, T + 3)  per-predicate slab [win(0..T-1) | a | b | tvt]  (dim-grouped rows)
    pc_ref: (NC, NF + 3) per-clause slab    [p1(0..NF-1) | tvl1 | p2 | tvl2]
    r_ref : (1, TB)      robustness output (lane-dense, unmasked store)
    """
    cd = compute_dtype
    pt = pt_ref[...]
    pc = pc_ref[...]

    # ---- stage 1: predicates + temporal operators, grouped by spatial dim ------------
    # Broadcast a_d * x[d] - b_d straight into the compute: no (NF,T,TB) replication copy.
    r1_parts = []
    row = 0
    for d, g in enumerate(group_sizes):
        if g == 0:
            continue
        sl = slice(row, row + g)
        row += g
        win_d = pt[sl, 0:t_len].astype(cd)[:, :, None]               # (g,T,1) lane-aligned
        a_d = pt[sl, t_len + 0:t_len + 1].astype(cd)[:, :, None]     # (g,1,1)
        b_d = pt[sl, t_len + 1:t_len + 2].astype(cd)[:, :, None]     # (g,1,1)
        tvt_d = pt[sl, t_len + 2:t_len + 3]                          # (g,1)   f32
        xd = x_ref[d].astype(cd)[None, :, :]                         # (1,T,TB)
        rp = a_d * xd - b_d                                          # (g,T,TB)
        ev, al = _soft_max_min(rp, win_d, BETA_T, axis=1)            # (g,TB) f32 each
        r1_parts.append(tvt_d * ev + (1.0 - tvt_d) * al)
    r1 = r1_parts[0] if len(r1_parts) == 1 else jnp.concatenate(r1_parts, axis=0)  # (NF,TB)

    # ---- stage 2: NC weighted clauses over NF predicate robustnesses ------------------
    p1 = pc[:, 0:nf][:, :, None]                                     # (NC,NF,1) lane-aligned
    tvl1 = pc[:, nf + 0:nf + 1]                                      # (NC,1)
    p2 = pc[:, nf + 1:nf + 2]                                        # (NC,1)
    tvl2 = pc[0:1, nf + 2:nf + 3]                                    # (1,1)
    ev2, al2 = _soft_max_min(r1[None, :, :], p1, BETA_L, axis=1)     # (NC,TB) each
    r2 = tvl1 * ev2 + (1.0 - tvl1) * al2                             # (NC,TB)

    # ---- stage 3: one weighted clause over NC ------------------------------------------
    ev3, al3 = _soft_max_min(r2, p2, BETA_L, axis=0, keepdims=True)  # (1,TB) each
    r = tvl2 * ev3 + (1.0 - tvl2) * al3                              # (1,TB)
    r_ref[...] = r.astype(r_ref.dtype)


def _choose_batch_tile(batch, batch_tile, tb_cap, num_cores):
    """Pick (TB, grid): few big lane-dense tiles, grid a multiple of num_cores if possible."""
    cap = max(128, min((int(batch_tile) // 128) * 128, tb_cap))
    steps = max(num_cores, pl.cdiv(batch, cap))
    if num_cores > 1:
        steps = _round_up(steps, num_cores)
    tb = _round_up(pl.cdiv(batch, steps), 128)
    grid = pl.cdiv(batch, tb)
    if grid == 1:
        tb = batch                       # single full-batch block: no partial-block padding
    return tb, grid


def naval_forward(x, params, *, weight_bi, weight_l2, batch_tile=4096, num_cores=1,
                  vmem_budget_mib=12, stage1_dtype=jnp.float32, x_layout="btd"):
    """Forward pass.  x: (B,T,D) (or (D,T,B) with x_layout="dtb").  Returns (r[B], reg[]).

    num_cores: set 2 on v7x so the parallel batch grid keeps both TensorCores busy.
    vmem_budget_mib: 12 fits v5e's 16 MiB scoped default; raise on v6e/v7x for bigger tiles.
    stage1_dtype: jnp.bfloat16 enables the optional v6e/v7x fast path (f32 reductions kept).
    """
    f32 = jnp.float32
    if x_layout == "btd":
        B, T, D = x.shape
        xdtb = jnp.transpose(x.astype(f32), (2, 1, 0))               # one non-replicating pass
    elif x_layout == "dtb":
        D, T, B = x.shape
        xdtb = x.astype(f32)
    else:
        raise ValueError(f"unknown x_layout {x_layout!r}")
    nf = params["a"].shape[0]
    nc = params["p1"].shape[0]
    length = T

    # ---- parameter hygiene: mirrors the torch.no_grad() block in forward() ----
    a = params["a"].astype(f32)
    b = params["b"].astype(f32)
    p1 = jnp.clip(params["p1"], 0.0, 1.0).astype(f32)                # (NC, NF)
    p2 = jnp.clip(params["p2"], 0.0, 1.0).astype(f32)                # (1, NC)
    # TODO(synk): torch re-randomizes all-zero rows of p1/p2 at forward time (in-place RNG
    # side effect); never triggers for this init, not reproduced.
    tvt = jnp.clip(params["tvar_temporal"], 0.0, 1.0).astype(f32)    # (NF,)
    tvl1 = jnp.clip(params["tvar_logical1"], 0.0, 1.0).astype(f32)   # (NC,)
    tvl2 = jnp.clip(params["tvar_logical2"], 0.0, 1.0).astype(f32)   # (1,)
    t1 = jnp.clip(params["t1"], 0.0, length - 1).astype(f32)
    t2 = jnp.clip(params["t2"], 0.0, length - 1).astype(f32)
    t1 = jnp.where(t1 >= t2 - 1.0, t2 - 1.0, t1)

    # ---- regroup predicates by spatial dim (k % 2, as in the torch module) ----
    pred_dims = [k % 2 for k in range(nf)]
    order = sorted(range(nf), key=lambda k: pred_dims[k])            # stable
    group_sizes = tuple(sum(1 for pd in pred_dims if pd == d) for d in range(D))
    perm = jnp.asarray(order, dtype=jnp.int32)
    a, b, tvt, t1, t2 = a[perm], b[perm], tvt[perm], t1[perm], t2[perm]
    p1 = p1[:, perm]                                                  # soft-ops are perm-invariant

    # ---- batch-independent precompute, hoisted out of the kernel ----
    tidx = jnp.arange(T, dtype=f32)[None, :]
    win = (jax.nn.sigmoid(BETA_T * (tidx - t1[:, None])) *
           jax.nn.sigmoid(BETA_T * (t2[:, None] - tidx)))             # (NF, T)

    bim = lambda p: jnp.sum(p * (1.0 - p))
    reg = (weight_bi * (bim(tvt) + bim(tvl1) + bim(tvl2) + bim(p1) + bim(p2))
           + weight_l2 * (jnp.sum(p1 * p1) + jnp.sum(p2 * p2)))       # scalar, plain XLA

    # ---- parameter slabs: hot slices (win, p1) lane-aligned at column 0 ----
    slab_t = jnp.concatenate([win, a[:, None], b[:, None], tvt[:, None]], axis=1)      # (NF,T+3)
    slab_l = jnp.concatenate([p1, tvl1[:, None], p2[0, :, None],
                              jnp.broadcast_to(tvl2.reshape(1, 1), (nc, 1))], axis=1)  # (NC,NF+3)

    # ---- batch tile from a per-lane VMEM budget (input tile + stage-1 intermediates) ----
    item = jnp.dtype(stage1_dtype).itemsize
    per_lane = 2 * D * T * 4 + 6 * nf * T * item + 16 * (nf + 8) * 4
    tb_cap = max(128, ((int(vmem_budget_mib) * (2 ** 20) // per_lane) // 128) * 128)
    TB, grid = _choose_batch_tile(B, batch_tile, tb_cap, num_cores)

    cp_kwargs = dict(dimension_semantics=("parallel",))
    if vmem_budget_mib > 16:
        cp_kwargs["vmem_limit_bytes"] = int((vmem_budget_mib + 8) * (2 ** 20))

    kernel = functools.partial(naval_kernel, nf=nf, t_len=T, group_sizes=group_sizes,
                               compute_dtype=jnp.dtype(stage1_dtype))
    r = pl.pallas_call(
        kernel,
        out_shape=jax.ShapeDtypeStruct((1, B), f32),
        grid=(grid,),
        in_specs=[
            pl.BlockSpec((D, T, TB), lambda i: (0, 0, i)),      # signal tile (no wrapper pad)
            pl.BlockSpec((nf, T + 3), lambda i: (0, 0)),        # per-predicate slab
            pl.BlockSpec((nc, nf + 3), lambda i: (0, 0)),       # per-clause slab
        ],
        out_specs=pl.BlockSpec((1, TB), lambda i: (0, i)),
        compiler_params=pltpu.CompilerParams(**cp_kwargs),
    )(xdtb, slab_t, slab_l)

    return r[0], reg   # matches torch: r is (batch,), reg is a scalar


# ----------------------------- pure-JAX reference (correctness) -----------------------------
def _soft_w_ref(r, w, beta, axis):
    mx = jnp.max(r, axis=axis, keepdims=True)
    mn = jnp.min(r, axis=axis, keepdims=True)
    ep = jnp.exp(beta * (r - mx))
    em = jnp.exp(-beta * (r - mn))
    smax = jnp.sum(w * ep * r, axis=axis) / (jnp.sum(w * ep, axis=axis) + DENOM_EPS)
    smin = jnp.sum(w * em * r, axis=axis) / (jnp.sum(w * em, axis=axis) + DENOM_EPS)
    return smax, smin


def naval_reference(x, params, *, weight_bi, weight_l2):
    """Plain-XLA f32 reference of NavalModel.forward (original predicate order)."""
    f32 = jnp.float32
    B, T, D = x.shape
    nf = params["a"].shape[0]
    length = T
    a = params["a"].astype(f32); b = params["b"].astype(f32)
    p1 = jnp.clip(params["p1"], 0.0, 1.0).astype(f32)
    p2 = jnp.clip(params["p2"], 0.0, 1.0).astype(f32)
    tvt = jnp.clip(params["tvar_temporal"], 0.0, 1.0).astype(f32)
    tvl1 = jnp.clip(params["tvar_logical1"], 0.0, 1.0).astype(f32)
    tvl2 = jnp.clip(params["tvar_logical2"], 0.0, 1.0).astype(f32)
    t1 = jnp.clip(params["t1"], 0.0, length - 1).astype(f32)
    t2 = jnp.clip(params["t2"], 0.0, length - 1).astype(f32)
    t1 = jnp.where(t1 >= t2 - 1.0, t2 - 1.0, t1)
    tidx = jnp.arange(T, dtype=f32)[None, :]
    win = (jax.nn.sigmoid(BETA_T * (tidx - t1[:, None])) *
           jax.nn.sigmoid(BETA_T * (t2[:, None] - tidx)))                      # (NF,T)
    xf = x.astype(f32)
    xsel = jnp.stack([xf[:, :, k % 2] for k in range(nf)], axis=1)             # (B,NF,T)
    rp = a[None, :, None] * xsel - b[None, :, None]
    ev, al = _soft_w_ref(rp, win[None], BETA_T, axis=2)                        # (B,NF)
    r1 = tvt[None] * ev + (1.0 - tvt[None]) * al
    ev2, al2 = _soft_w_ref(r1[:, None, :], p1[None], BETA_L, axis=2)           # (B,NC)
    r2 = tvl1[None] * ev2 + (1.0 - tvl1[None]) * al2
    ev3, al3 = _soft_w_ref(r2, p2[0][None, :], BETA_L, axis=1)                 # (B,)
    r = tvl2[0] * ev3 + (1.0 - tvl2[0]) * al3
    bim = lambda p: jnp.sum(p * (1.0 - p))
    reg = (weight_bi * (bim(tvt) + bim(tvl1) + bim(tvl2) + bim(p1) + bim(p2))
           + weight_l2 * (jnp.sum(p1 * p1) + jnp.sum(p2 * p2)))
    return r, reg


def init_params(key, nf, nc, length):
    """Deterministic synthetic init, same shapes as NavalModel.__init__ (float32)."""
    ks = jax.random.split(key, 10)
    return {
        "t1": jax.random.randint(ks[0], (nf,), 0, length // 2).astype(jnp.float32),
        "t2": jax.random.randint(ks[1], (nf,), length // 2, length).astype(jnp.float32),
        "a": jax.random.uniform(ks[2], (nf,), jnp.float32),
        "b": jax.random.uniform(ks[3], (nf,), jnp.float32),
        "p1": jax.random.uniform(ks[4], (nc, nf), jnp.float32),
        "p2": jax.random.uniform(ks[5], (1, nc), jnp.float32),
        "tvar_temporal": jax.random.uniform(ks[6], (nf,), jnp.float32),
        "tvar_logical1": jax.random.uniform(ks[7], (nc,), jnp.float32),
        "tvar_logical2": jax.random.uniform(ks[8], (1,), jnp.float32),
        "eps": jnp.asarray(0.1, jnp.float32),  # present in the module, unused by forward output
    }


if __name__ == "__main__":
    key = jax.random.PRNGKey(0)
    kx, kp = jax.random.split(key)

    B, T, D = 256, 16, 2     # batch, trajectory length, spatial dims (naval x/y)
    nf, nc = 6, 3            # number of predicates / clauses
    weight_bi, weight_l2 = 0.05, 0.01

    x = jax.random.normal(kx, (B, T, D), jnp.float32)    # layout: (B, T, D)
    params = init_params(kp, nf, nc, T)

    # v5e/v6e config: one big lane-dense tile -> grid=(1,)
    fwd1 = jax.jit(functools.partial(naval_forward, weight_bi=weight_bi, weight_l2=weight_l2))
    # v7x config: keep >=2 parallel grid steps so both TensorCores get work
    fwd2 = jax.jit(functools.partial(naval_forward, weight_bi=weight_bi, weight_l2=weight_l2,
                                     num_cores=2))

    r1, reg1 = fwd1(x, params)
    r2, reg2 = fwd2(x, params)
    jax.block_until_ready((r1, reg1, r2, reg2))

    r_ref, reg_ref = naval_reference(x, params, weight_bi=weight_bi, weight_l2=weight_l2)

    assert r1.shape == (B,) and reg1.shape == ()
    assert bool(jnp.all(jnp.isfinite(r1))) and bool(jnp.isfinite(reg1))
    assert bool(jnp.allclose(r1, r_ref, rtol=1e-2, atol=1e-2))
    assert bool(jnp.allclose(r2, r_ref, rtol=1e-2, atol=1e-2))
    assert bool(jnp.allclose(reg1, reg_ref, rtol=1e-5, atol=1e-6))
    print("KERNEL_OK")
</pallas_src>

<mosaic_0001>
module attributes {stable_mosaic.version = 11 : i64} {
  func.func @naval_kernel(%arg0: i32, %arg1: memref<2x16x256xf32, #tpu.memory_space<vmem>>, %arg2: memref<6x19xf32, #tpu.memory_space<vmem>>, %arg3: memref<3x9xf32, #tpu.memory_space<vmem>>, %arg4: memref<1x256xf32, #tpu.memory_space<vmem>>) attributes {dimension_semantics = [#tpu.dimension_semantics<parallel>], iteration_bounds = array<i64: 1>, scalar_prefetch = 0 : i64, scratch_operands = 0 : i64, tpu.core_type = #tpu.core_type<tc>, window_params = [{transform_indices = @transform_0, window_bounds = array<i64: 2, 16, 256>}, {pipeline_mode = #tpu.pipeline_mode<synchronous>, transform_indices = @transform_1, window_bounds = array<i64: 6, 19>}, {pipeline_mode = #tpu.pipeline_mode<synchronous>, transform_indices = @transform_2, window_bounds = array<i64: 3, 9>}, {transform_indices = @transform_3, window_bounds = array<i64: 1, 256>}]} {
    %c0 = arith.constant 0 : index
    %c0_0 = arith.constant 0 : index
    %0 = vector.load %arg2[%c0, %c0_0] : memref<6x19xf32, #tpu.memory_space<vmem>>, vector<6x19xf32>
    %c0_1 = arith.constant 0 : index
    %c0_2 = arith.constant 0 : index
    %1 = vector.load %arg3[%c0_1, %c0_2] : memref<3x9xf32, #tpu.memory_space<vmem>>, vector<3x9xf32>
    %2 = vector.extract_strided_slice %0 {offsets = [0, 0], sizes = [3, 16], strides = [1, 1]} : vector<6x19xf32> to vector<3x16xf32>
    %3 = vector.shape_cast %2 : vector<3x16xf32> to vector<3x16x1xf32>
    %4 = vector.extract_strided_slice %0 {offsets = [0, 16], sizes = [3, 1], strides = [1, 1]} : vector<6x19xf32> to vector<3x1xf32>
    %5 = vector.shape_cast %4 : vector<3x1xf32> to vector<3x1x1xf32>
    %6 = vector.extract_strided_slice %0 {offsets = [0, 17], sizes = [3, 1], strides = [1, 1]} : vector<6x19xf32> to vector<3x1xf32>
    %7 = vector.shape_cast %6 : vector<3x1xf32> to vector<3x1x1xf32>
    %8 = vector.extract_strided_slice %0 {offsets = [0, 18], sizes = [3, 1], strides = [1, 1]} : vector<6x19xf32> to vector<3x1xf32>
    %c0_3 = arith.constant 0 : index
    %c0_4 = arith.constant 0 : index
    %c0_5 = arith.constant 0 : index
    %9 = vector.load %arg1[%c0_3, %c0_4, %c0_5] : memref<2x16x256xf32, #tpu.memory_space<vmem>>, vector<1x16x256xf32>
    %10 = vector.shape_cast %9 : vector<1x16x256xf32> to vector<16x256xf32>
    %11 = vector.shape_cast %10 : vector<16x256xf32> to vector<1x16x256xf32>
    %12 = vector.broadcast %5 : vector<3x1x1xf32> to vector<3x16x256xf32>
    %13 = vector.broadcast %11 : vector<1x16x256xf32> to vector<3x16x256xf32>
    %14 = arith.mulf %12, %13 : vector<3x16x256xf32>
    %15 = vector.broadcast %7 : vector<3x1x1xf32> to vector<3x16x256xf32>
    %16 = arith.subf %14, %15 : vector<3x16x256xf32>
    %cst = arith.constant dense<0xFF800000> : vector<3x256xf32>
    %17 = vector.multi_reduction <maximumf>, %16, %cst [1] : vector<3x16x256xf32> to vector<3x256xf32>
    %18 = vector.shape_cast %17 : vector<3x256xf32> to vector<3x1x256xf32>
    %cst_6 = arith.constant dense<0x7F800000> : vector<3x256xf32>
    %19 = vector.multi_reduction <minimumf>, %16, %cst_6 [1] : vector<3x16x256xf32> to vector<3x256xf32>
    %20 = vector.shape_cast %19 : vector<3x256xf32> to vector<3x1x256xf32>
    %21 = arith.addf %18, %20 : vector<3x1x256xf32>
    %cst_7 = arith.constant 5.000000e-01 : f32
    %22 = vector.broadcast %cst_7 : f32 to vector<3x1x256xf32>
    %23 = arith.mulf %22, %21 : vector<3x1x256xf32>
    %24 = vector.broadcast %23 : vector<3x1x256xf32> to vector<3x16x256xf32>
    %25 = arith.subf %16, %24 : vector<3x16x256xf32>
    %cst_8 = arith.constant 2.500000e+00 : f32
    %26 = vector.broadcast %cst_8 : f32 to vector<3x16x256xf32>
    %27 = arith.mulf %26, %25 : vector<3x16x256xf32>
    %28 = math.exp %27 : vector<3x16x256xf32>
    %29 = tpu.reciprocal %28 {approx = true} : vector<3x16x256xf32> -> vector<3x16x256xf32>
    %30 = vector.broadcast %3 : vector<3x16x1xf32> to vector<3x16x256xf32>
    %31 = arith.mulf %30, %28 : vector<3x16x256xf32>
    %32 = vector.broadcast %3 : vector<3x16x1xf32> to vector<3x16x256xf32>
    %33 = arith.mulf %32, %29 : vector<3x16x256xf32>
    %34 = arith.mulf %31, %16 : vector<3x16x256xf32>
    %cst_9 = arith.constant dense<0.000000e+00> : vector<3x256xf32>
    %35 = vector.multi_reduction <add>, %34, %cst_9 [1] : vector<3x16x256xf32> to vector<3x256xf32>
    %cst_10 = arith.constant dense<0.000000e+00> : vector<3x256xf32>
    %36 = vector.multi_reduction <add>, %31, %cst_10 [1] : vector<3x16x256xf32> to vector<3x256xf32>
    %37 = arith.mulf %33, %16 : vector<3x16x256xf32>
    %cst_11 = arith.constant dense<0.000000e+00> : vector<3x256xf32>
    %38 = vector.multi_reduction <add>, %37, %cst_11 [1] : vector<3x16x256xf32> to vector<3x256xf32>
    %cst_12 = arith.constant dense<0.000000e+00> : vector<3x256xf32>
    %39 = vector.multi_reduction <add>, %33, %cst_12 [1] : vector<3x16x256xf32> to vector<3x256xf32>
    %cst_13 = arith.constant 1.000000e-30 : f32
    %40 = vector.broadcast %cst_13 : f32 to vector<3x256xf32>
    %41 = arith.addf %36, %40 : vector<3x256xf32>
    %42 = arith.divf %35, %41 : vector<3x256xf32>
    %cst_14 = arith.constant 1.000000e-30 : f32
    %43 = vector.broadcast %cst_14 : f32 to vector<3x256xf32>
    %44 = arith.addf %39, %43 : vector<3x256xf32>
    %45 = arith.divf %38, %44 : vector<3x256xf32>
    %46 = vector.broadcast %8 : vector<3x1xf32> to vector<3x256xf32>
    %47 = arith.mulf %46, %42 : vector<3x256xf32>
    %cst_15 = arith.constant 1.000000e+00 : f32
    %48 = vector.broadcast %cst_15 : f32 to vector<3x1xf32>
    %49 = arith.subf %48, %8 : vector<3x1xf32>
    %50 = vector.broadcast %49 : vector<3x1xf32> to vector<3x256xf32>
    %51 = arith.mulf %50, %45 : vector<3x256xf32>
    %52 = arith.addf %47, %51 : vector<3x256xf32>
    %53 = vector.extract_strided_slice %0 {offsets = [3, 0], sizes = [3, 16], strides = [1, 1]} : vector<6x19xf32> to vector<3x16xf32>
    %54 = vector.shape_cast %53 : vector<3x16xf32> to vector<3x16x1xf32>
    %55 = vector.extract_strided_slice %0 {offsets = [3, 16], sizes = [3, 1], strides = [1, 1]} : vector<6x19xf32> to vector<3x1xf32>
    %56 = vector.shape_cast %55 : vector<3x1xf32> to vector<3x1x1xf32>
    %57 = vector.extract_strided_slice %0 {offsets = [3, 17], sizes = [3, 1], strides = [1, 1]} : vector<6x19xf32> to vector<3x1xf32>
    %58 = vector.shape_cast %57 : vector<3x1xf32> to vector<3x1x1xf32>
    %59 = vector.extract_strided_slice %0 {offsets = [3, 18], sizes = [3, 1], strides = [1, 1]} : vector<6x19xf32> to vector<3x1xf32>
    %c1 = arith.constant 1 : index
    %c0_16 = arith.constant 0 : index
    %c0_17 = arith.constant 0 : index
    %60 = vector.load %arg1[%c1, %c0_16, %c0_17] : memref<2x16x256xf32, #tpu.memory_space<vmem>>, vector<1x16x256xf32>
    %61 = vector.shape_cast %60 : vector<1x16x256xf32> to vector<16x256xf32>
    %62 = vector.shape_cast %61 : vector<16x256xf32> to vector<1x16x256xf32>
    %63 = vector.broadcast %56 : vector<3x1x1xf32> to vector<3x16x256xf32>
    %64 = vector.broadcast %62 : vector<1x16x256xf32> to vector<3x16x256xf32>
    %65 = arith.mulf %63, %64 : vector<3x16x256xf32>
    %66 = vector.broadcast %58 : vector<3x1x1xf32> to vector<3x16x256xf32>
    %67 = arith.subf %65, %66 : vector<3x16x256xf32>
    %cst_18 = arith.constant dense<0xFF800000> : vector<3x256xf32>
    %68 = vector.multi_reduction <maximumf>, %67, %cst_18 [1] : vector<3x16x256xf32> to vector<3x256xf32>
    %69 = vector.shape_cast %68 : vector<3x256xf32> to vector<3x1x256xf32>
    %cst_19 = arith.constant dense<0x7F800000> : vector<3x256xf32>
    %70 = vector.multi_reduction <minimumf>, %67, %cst_19 [1] : vector<3x16x256xf32> to vector<3x256xf32>
    %71 = vector.shape_cast %70 : vector<3x256xf32> to vector<3x1x256xf32>
    %72 = arith.addf %69, %71 : vector<3x1x256xf32>
    %cst_20 = arith.constant 5.000000e-01 : f32
    %73 = vector.broadcast %cst_20 : f32 to vector<3x1x256xf32>
    %74 = arith.mulf %73, %72 : vector<3x1x256xf32>
    %75 = vector.broadcast %74 : vector<3x1x256xf32> to vector<3x16x256xf32>
    %76 = arith.subf %67, %75 : vector<3x16x256xf32>
    %cst_21 = arith.constant 2.500000e+00 : f32
    %77 = vector.broadcast %cst_21 : f32 to vector<3x16x256xf32>
    %78 = arith.mulf %77, %76 : vector<3x16x256xf32>
    %79 = math.exp %78 : vector<3x16x256xf32>
    %80 = tpu.reciprocal %79 {approx = true} : vector<3x16x256xf32> -> vector<3x16x256xf32>
    %81 = vector.broadcast %54 : vector<3x16x1xf32> to vector<3x16x256xf32>
    %82 = arith.mulf %81, %79 : vector<3x16x256xf32>
    %83 = vector.broadcast %54 : vector<3x16x1xf32> to vector<3x16x256xf32>
    %84 = arith.mulf %83, %80 : vector<3x16x256xf32>
    %85 = arith.mulf %82, %67 : vector<3x16x256xf32>
    %cst_22 = arith.constant dense<0.000000e+00> : vector<3x256xf32>
    %86 = vector.multi_reduction <add>, %85, %cst_22 [1] : vector<3x16x256xf32> to vector<3x256xf32>
    %cst_23 = arith.constant dense<0.000000e+00> : vector<3x256xf32>
    %87 = vector.multi_reduction <add>, %82, %cst_23 [1] : vector<3x16x256xf32> to vector<3x256xf32>
    %88 = arith.mulf %84, %67 : vector<3x16x256xf32>
    %cst_24 = arith.constant dense<0.000000e+00> : vector<3x256xf32>
    %89 = vector.multi_reduction <add>, %88, %cst_24 [1] : vector<3x16x256xf32> to vector<3x256xf32>
    %cst_25 = arith.constant dense<0.000000e+00> : vector<3x256xf32>
    %90 = vector.multi_reduction <add>, %84, %cst_25 [1] : vector<3x16x256xf32> to vector<3x256xf32>
    %cst_26 = arith.constant 1.000000e-30 : f32
    %91 = vector.broadcast %cst_26 : f32 to vector<3x256xf32>
    %92 = arith.addf %87, %91 : vector<3x256xf32>
    %93 = arith.divf %86, %92 : vector<3x256xf32>
    %cst_27 = arith.constant 1.000000e-30 : f32
    %94 = vector.broadcast %cst_27 : f32 to vector<3x256xf32>
    %95 = arith.addf %90, %94 : vector<3x256xf32>
    %96 = arith.divf %89, %95 : vector<3x256xf32>
    %97 = vector.broadcast %59 : vector<3x1xf32> to vector<3x256xf32>
    %98 = arith.mulf %97, %93 : vector<3x256xf32>
    %cst_28 = arith.constant 1.000000e+00 : f32
    %99 = vector.broadcast %cst_28 : f32 to vector<3x1xf32>
    %100 = arith.subf %99, %59 : vector<3x1xf32>
    %101 = vector.broadcast %100 : vector<3x1xf32> to vector<3x256xf32>
    %102 = arith.mulf %101, %96 : vector<3x256xf32>
    %103 = arith.addf %98, %102 : vector<3x256xf32>
    %104 = tpu.concatenate %52, %103 in 0 : vector<3x256xf32>, vector<3x256xf32> -> vector<6x256xf32>
    %105 = vector.extract_strided_slice %1 {offsets = [0, 0], sizes = [3, 6], strides = [1, 1]} : vector<3x9xf32> to vector<3x6xf32>
    %106 = vector.shape_cast %105 : vector<3x6xf32> to vector<3x6x1xf32>
    %107 = vector.extract_strided_slice %1 {offsets = [0, 6], sizes = [3, 1], strides = [1, 1]} : vector<3x9xf32> to vector<3x1xf32>
    %108 = vector.extract_strided_slice %1 {offsets = [0, 7], sizes = [3, 1], strides = [1, 1]} : vector<3x9xf32> to vector<3x1xf32>
    %109 = vector.extract_strided_slice %1 {offsets = [0, 8], sizes = [1, 1], strides = [1, 1]} : vector<3x9xf32> to vector<1x1xf32>
    %110 = vector.shape_cast %104 : vector<6x256xf32> to vector<1x6x256xf32>
    %cst_29 = arith.constant dense<0xFF800000> : vector<1x256xf32>
    %111 = vector.multi_reduction <maximumf>, %110, %cst_29 [1] : vector<1x6x256xf32> to vector<1x256xf32>
    %112 = vector.shape_cast %111 : vector<1x256xf32> to vector<1x1x256xf32>
    %cst_30 = arith.constant dense<0x7F800000> : vector<1x256xf32>
    %113 = vector.multi_reduction <minimumf>, %110, %cst_30 [1] : vector<1x6x256xf32> to vector<1x256xf32>
    %114 = vector.shape_cast %113 : vector<1x256xf32> to vector<1x1x256xf32>
    %115 = arith.addf %112, %114 : vector<1x1x256xf32>
    %cst_31 = arith.constant 5.000000e-01 : f32
    %116 = vector.broadcast %cst_31 : f32 to vector<1x1x256xf32>
    %117 = arith.mulf %116, %115 : vector<1x1x256xf32>
    %118 = vector.broadcast %117 : vector<1x1x256xf32> to vector<1x6x256xf32>
    %119 = arith.subf %110, %118 : vector<1x6x256xf32>
    %cst_32 = arith.constant 2.500000e+00 : f32
    %120 = vector.broadcast %cst_32 : f32 to vector<1x6x256xf32>
    %121 = arith.mulf %120, %119 : vector<1x6x256xf32>
    %122 = math.exp %121 : vector<1x6x256xf32>
    %123 = tpu.reciprocal %122 {approx = true} : vector<1x6x256xf32> -> vector<1x6x256xf32>
    %124 = vector.broadcast %106 : vector<3x6x1xf32> to vector<3x6x256xf32>
    %125 = vector.broadcast %122 : vector<1x6x256xf32> to vector<3x6x256xf32>
    %126 = arith.mulf %124, %125 : vector<3x6x256xf32>
    %127 = vector.broadcast %106 : vector<3x6x1xf32> to vector<3x6x256xf32>
    %128 = vector.broadcast %123 : vector<1x6x256xf32> to vector<3x6x256xf32>
    %129 = arith.mulf %127, %128 : vector<3x6x256xf32>
    %130 = vector.broadcast %110 : vector<1x6x256xf32> to vector<3x6x256xf32>
    %131 = arith.mulf %126, %130 : vector<3x6x256xf32>
    %cst_33 = arith.constant dense<0.000000e+00> : vector<3x256xf32>
    %132 = vector.multi_reduction <add>, %131, %cst_33 [1] : vector<3x6x256xf32> to vector<3x256xf32>
    %cst_34 = arith.constant dense<0.000000e+00> : vector<3x256xf32>
    %133 = vector.multi_reduction <add>, %126, %cst_34 [1] : vector<3x6x256xf32> to vector<3x256xf32>
    %134 = vector.broadcast %110 : vector<1x6x256xf32> to vector<3x6x256xf32>
    %135 = arith.mulf %129, %134 : vector<3x6x256xf32>
    %cst_35 = arith.constant dense<0.000000e+00> : vector<3x256xf32>
    %136 = vector.multi_reduction <add>, %135, %cst_35 [1] : vector<3x6x256xf32> to vector<3x256xf32>
    %cst_36 = arith.constant dense<0.000000e+00> : vector<3x256xf32>
    %137 = vector.multi_reduction <add>, %129, %cst_36 [1] : vector<3x6x256xf32> to vector<3x256xf32>
    %cst_37 = arith.constant 1.000000e-30 : f32
    %138 = vector.broadcast %cst_37 : f32 to vector<3x256xf32>
    %139 = arith.addf %133, %138 : vector<3x256xf32>
    %140 = arith.divf %132, %139 : vector<3x256xf32>
    %cst_38 = arith.constant 1.000000e-30 : f32
    %141 = vector.broadcast %cst_38 : f32 to vector<3x256xf32>
    %142 = arith.addf %137, %141 : vector<3x256xf32>
    %143 = arith.divf %136, %142 : vector<3x256xf32>
    %144 = vector.broadcast %107 : vector<3x1xf32> to vector<3x256xf32>
    %145 = arith.mulf %144, %140 : vector<3x256xf32>
    %cst_39 = arith.constant 1.000000e+00 : f32
    %146 = vector.broadcast %cst_39 : f32 to vector<3x1xf32>
    %147 = arith.subf %146, %107 : vector<3x1xf32>
    %148 = vector.broadcast %147 : vector<3x1xf32> to vector<3x256xf32>
    %149 = arith.mulf %148, %143 : vector<3x256xf32>
    %150 = arith.addf %145, %149 : vector<3x256xf32>
    %cst_40 = arith.constant dense<0xFF800000> : vector<256xf32>
    %151 = vector.multi_reduction <maximumf>, %150, %cst_40 [0] : vector<3x256xf32> to vector<256xf32>
    %152 = vector.shape_cast %151 : vector<256xf32> to vector<1x256xf32>
    %cst_41 = arith.constant dense<0x7F800000> : vector<256xf32>
    %153 = vector.multi_reduction <minimumf>, %150, %cst_41 [0] : vector<3x256xf32> to vector<256xf32>
    %154 = vector.shape_cast %153 : vector<256xf32> to vector<1x256xf32>
    %155 = arith.addf %152, %154 : vector<1x256xf32>
    %cst_42 = arith.constant 5.000000e-01 : f32
    %156 = vector.broadcast %cst_42 : f32 to vector<1x256xf32>
    %157 = arith.mulf %156, %155 : vector<1x256xf32>
    %158 = vector.broadcast %157 : vector<1x256xf32> to vector<3x256xf32>
    %159 = arith.subf %150, %158 : vector<3x256xf32>
    %cst_43 = arith.constant 2.500000e+00 : f32
    %160 = vector.broadcast %cst_43 : f32 to vector<3x256xf32>
    %161 = arith.mulf %160, %159 : vector<3x256xf32>
    %162 = math.exp %161 : vector<3x256xf32>
    %163 = tpu.reciprocal %162 {approx = true} : vector<3x256xf32> -> vector<3x256xf32>
    %164 = vector.broadcast %108 : vector<3x1xf32> to vector<3x256xf32>
    %165 = arith.mulf %164, %162 : vector<3x256xf32>
    %166 = vector.broadcast %108 : vector<3x1xf32> to vector<3x256xf32>
    %167 = arith.mulf %166, %163 : vector<3x256xf32>
    %168 = arith.mulf %165, %150 : vector<3x256xf32>
    %cst_44 = arith.constant dense<0.000000e+00> : vector<256xf32>
    %169 = vector.multi_reduction <add>, %168, %cst_44 [0] : vector<3x256xf32> to vector<256xf32>
    %170 = vector.shape_cast %169 : vector<256xf32> to vector<1x256xf32>
    %cst_45 = arith.constant dense<0.000000e+00> : vector<256xf32>
    %171 = vector.multi_reduction <add>, %165, %cst_45 [0] : vector<3x256xf32> to vector<256xf32>
    %172 = vector.shape_cast %171 : vector<256xf32> to vector<1x256xf32>
    %173 = arith.mulf %167, %150 : vector<3x256xf32>
    %cst_46 = arith.constant dense<0.000000e+00> : vector<256xf32>
    %174 = vector.multi_reduction <add>, %173, %cst_46 [0] : vector<3x256xf32> to vector<256xf32>
    %175 = vector.shape_cast %174 : vector<256xf32> to vector<1x256xf32>
    %cst_47 = arith.constant dense<0.000000e+00> : vector<256xf32>
    %176 = vector.multi_reduction <add>, %167, %cst_47 [0] : vector<3x256xf32> to vector<256xf32>
    %177 = vector.shape_cast %176 : vector<256xf32> to vector<1x256xf32>
    %cst_48 = arith.constant 1.000000e-30 : f32
    %178 = vector.broadcast %cst_48 : f32 to vector<1x256xf32>
    %179 = arith.addf %172, %178 : vector<1x256xf32>
    %180 = arith.divf %170, %179 : vector<1x256xf32>
    %cst_49 = arith.constant 1.000000e-30 : f32
    %181 = vector.broadcast %cst_49 : f32 to vector<1x256xf32>
    %182 = arith.addf %177, %181 : vector<1x256xf32>
    %183 = arith.divf %175, %182 : vector<1x256xf32>
    %184 = vector.broadcast %109 : vector<1x1xf32> to vector<1x256xf32>
    %185 = arith.mulf %184, %180 : vector<1x256xf32>
    %cst_50 = arith.constant 1.000000e+00 : f32
    %186 = vector.broadcast %cst_50 : f32 to vector<1x1xf32>
    %187 = arith.subf %186, %109 : vector<1x1xf32>
    %188 = vector.broadcast %187 : vector<1x1xf32> to vector<1x256xf32>
    %189 = arith.mulf %188, %183 : vector<1x256xf32>
    %190 = arith.addf %185, %189 : vector<1x256xf32>
    %c0_51 = arith.constant 0 : index
    %c0_52 = arith.constant 0 : index
    %191 = vector.load %arg4[%c0_51, %c0_52] : memref<1x256xf32, #tpu.memory_space<vmem>>, vector<1x256xf32>
    tpu.vector_store %arg4[%c0_51, %c0_52], %190 {strides = array<i32>} : memref<1x256xf32, #tpu.memory_space<vmem>>, vector<1x256xf32>,
    return
  }
  func.func @transform_0(%arg0: i32) -> (i32, i32, i32) {
    %c0_i32 = arith.constant 0 : i32
    %c0_i32_0 = arith.constant 0 : i32
    %c0_i32_1 = arith.constant 0 : i32
    return %c0_i32, %c0_i32_0, %arg0 : i32, i32, i32
  }
  func.func @transform_1(%arg0: i32) -> (i32, i32) {
    %c0_i32 = arith.constant 0 : i32
    %c0_i32_0 = arith.constant 0 : i32
    %c0_i32_1 = arith.constant 0 : i32
    return %c0_i32, %c0_i32_0 : i32, i32
  }
  func.func @transform_2(%arg0: i32) -> (i32, i32) {
    %c0_i32 = arith.constant 0 : i32
    %c0_i32_0 = arith.constant 0 : i32
    %c0_i32_1 = arith.constant 0 : i32
    return %c0_i32, %c0_i32_0 : i32, i32
  }
  func.func @transform_3(%arg0: i32) -> (i32, i32) {
    %c0_i32 = arith.constant 0 : i32
    %c0_i32_0 = arith.constant 0 : i32
    return %c0_i32, %arg0 : i32, i32
  }
}

</mosaic_0001>

<bundles_post_ra>
// kernel: naval_forward.1
= control target key start
LH: loop header
LB: loop body
LE: loop exit
PB: predicated region body
PF: predicated region fallthrough
CT: control target
= control target key end

     0   :  { %s4185_s0 = inlined_call_operand.vmem [shape: f32[2,16,256], index: 0, kind: input, shape index: {}]   ;;  %s4186_s1 = inlined_call_operand.vmem [shape: f32[6,19], index: 1, kind: input, shape index: {}]   ;;  %s4187_s2 = inlined_call_operand.vmem [shape: f32[3,9], index: 2, kind: input, shape index: {}]   ;;  %s4188_s3 = inlined_call_operand.hbm [shape: f32[1,256], index: 3, kind: output, shape index: {}]  }
   0x1   :  { %v2420_v0 = vld [vmem:[%s4186_s1] sm:$0x3f] }
   0x2   :  { %8 = vsyncpa [#allocation3], 0  ;;  %v2390_v1 = vmov 16   ;;  %v17_v2 = vperm.slane %v2420_v0, 0  ;;  %759 = vst [vmem:[#allocation1] sm:$0xff] %v2420_v0  ;;  %v58_v3 = vrot.slane %v2420_v0, 2  ;;  %v4189_v18 = vlaneseq }
   0x3   :  { %2146 = vset.pattern.permute.xlu0 %v2390_v1  ;;  %2148 = vset.pattern.permute.xlu2 %v2390_v1  ;;  %v57_v5 = vrot.slane %v2420_v0, 1  ;;  %v2391_v15 = vmov 17   ;;  %v30_v23 = vperm.slane %v2420_v0, 1  ;;  %v733_v24 = vperm.slane %v2420_v0, 4  ;;  %v2438_v34 = vld [vmem:[%s4185_s0] sm:$0xff]  ;;  %v2448_v36 = vld [vmem:[%s4185_s0 + $0x28] sm:$0xff] }
   0x4   :  { %2149 = vset.pattern.permute.xlu1 %v2390_v1  ;;  %67 = vperm.xlu0 %2146, %v17_v2   ;;  %v65_v4 = vperm.slane %v58_v3, 0  ;;  %v19_v20 = vshrl.u32 %v4189_v18, 7  ;;  %v720_v25 = vperm.slane %v2420_v0, 3  ;;  %v43_v26 = vperm.slane %v2420_v0, 2  ;;  %v2443_v35 = vld [vmem:[%s4185_s0 + $0x20] sm:$0xff]  ;;  %v2453_v37 = vld [vmem:[%s4185_s0 + $0x30] sm:$0xff] }
   0x5   :  { %v64_v6 = vperm.slane %v57_v5, 0  ;;  %v746_v27 = vperm.slane %v2420_v0, 5  ;;  %v2392_v29 = vmov 18   ;;  %v698_v30 = vsub.f32 1.0, %v2420_v0  ;;  %v2458_v38 = vld [vmem:[%s4185_s0 + $0x38] sm:$0xff]  ;;  %v2463_v39 = vld [vmem:[%s4185_s0 + $0x8] sm:$0xff] }
   0x6   :  { %75 = vperm.xlu2 %2148, %v65_v4   ;;  %v26_v22 = vadd.s32 8, %v19_v20  ;;  %v2468_v40 = vld [vmem:[%s4185_s0 + $0x10] sm:$0xff]  ;;  %v2473_v41 = vld [vmem:[%s4185_s0 + $0x18] sm:$0xff]  ;;  %s2126_s10 = sshll.u32 %s4188_s3, 4  ;;  %s2127_s10 = int_to_ptr.hbm [resolvable:$true] %s2126_s10 }
   0x9   :  { %v761_v7 = vld [vmem:[#allocation1 + $0x3] ss:$9 sm:$0xff]  ;;  %v765_v8 = vld [vmem:[#allocation1 + $0x5] ss:$9 sm:$0xff] }
   0xa   :  { %v763_v9 = vld [vmem:[#allocation1 + $0x4] ss:$9 sm:$0xff]  ;;  %v778_v10 = vperm.slane %v761_v7, 0  ;;  %v780_v11 = vperm.slane %v765_v8, 0 }
   0xb   :  { %766 = vst [vmem:[#allocation1] sm:$0xff] %v2420_v0  ;;  %v779_v12 = vperm.slane %v763_v9, 0 }
   0xc   :  { %782 = vperm.xlu1 %2149, %v778_v10   ;;  %71 = vperm.xlu0 %2146, %v64_v6  }
   0xe   :  { %790 = vperm.xlu2 %2148, %v780_v11  }
  0x12   :  { %v768_v13 = vld [vmem:[#allocation1 + $0x3] ss:$9 sm:$0xff]  ;;  %v772_v16 = vld [vmem:[#allocation1 + $0x5] ss:$9 sm:$0xff] }
  0x13   :  { %v805_v14 = vperm.slane %v768_v13, 0  ;;  %v807_v17 = vperm.slane %v772_v16, 0  ;;  %v770_v19 = vld [vmem:[#allocation1 + $0x4] ss:$9 sm:$0xff] }
  0x14   :  { %786 = vperm.xlu1 %2149, %v779_v12   ;;  %2147 = vset.pattern.permute.xlu0 %v2391_v15  ;;  %v806_v21 = vperm.slane %v770_v19, 0 }
  0x15   :  { %91 = vperm.xlu0 %2147, %v17_v2  }
  0x16   :  { %2151 = vset.pattern.permute.xlu2 %v2391_v15 }
  0x17   :  { %809 = vperm.xlu2 %2151, %v805_v14  }
  0x1c   :  { %2150 = vset.pattern.permute.xlu1 %v2391_v15 }
  0x1d   :  { %95 = vperm.xlu1 %2150, %v64_v6   ;;  %817 = vperm.xlu0 %2147, %v807_v17  }
  0x1f   :  { %99 = vperm.xlu2 %2151, %v65_v4  }
  0x25   :  { %813 = vperm.xlu1 %2150, %v806_v21   ;;  %2154 = vset.pattern.permute.xlu0 %v19_v20 }
  0x27   :  { %2153 = vset.pattern.permute.xlu2 %v26_v22 }
  0x2d   :  { %2152 = vset.pattern.permute.xlu1 %v19_v20  ;;  %35 = vperm.xlu0 %2154, %v30_v23  }
  0x2f   :  { %28 = vperm.xlu2 %2153, %v17_v2  }
  0x35   :  { %22 = vperm.xlu1 %2152, %v17_v2   ;;  %2157 = vset.pattern.permute.xlu0 %v26_v22 }
  0x37   :  { %2156 = vset.pattern.permute.xlu2 %v19_v20 }
  0x3d   :  { %2155 = vset.pattern.permute.xlu1 %v26_v22  ;;  %744 = vperm.xlu0 %2157, %v733_v24  }
  0x3f   :  { %725 = vperm.xlu2 %2156, %v720_v25  }
  0x45   :  { %41 = vperm.xlu1 %2155, %v30_v23   ;;  %2160 = vset.pattern.permute.xlu0 %v2392_v29 }
  0x46   :  { %679 = vperm.xlu0 %2160, %v2420_v0  }
  0x47   :  { %738 = vperm.xlu2 %2156, %v733_v24  }
  0x4d   :  { %731 = vperm.xlu1 %2155, %v720_v25  }
  0x4f   :  { %2159 = vset.pattern.permute.xlu2 %v26_v22 }
  0x55   :  { %2158 = vset.pattern.permute.xlu1 %v19_v20 }
  0x57   :  { %54 = vperm.xlu2 %2159, %v43_v26  }
  0x5d   :  { %48 = vperm.xlu1 %2158, %v43_v26  }
  0x5f   :  { %757 = vperm.xlu2 %2159, %v746_v27  }
  0x60   :  { %v76_v28 = vpop.permute.xlu2 %75 }
  0x61   :  { %v86_v48 = vmul.f32 %v76_v28, %v2438_v34  ;;  %v87_v49 = vmul.f32 %v76_v28, %v2463_v39  ;;  %v88_v50 = vmul.f32 %v76_v28, %v2468_v40  ;;  %v89_v51 = vmul.f32 %v76_v28, %v2473_v41 }
  0x65   :  { %751 = vperm.xlu1 %2158, %v746_v27  }
  0x67   :  { %2162 = vset.pattern.permute.xlu2 %v19_v20 }
  0x68   :  { %v791_v31 = vpop.permute.xlu2 %790 }
  0x69   :  { %v801_v24 = vmul.f32 %v2443_v35, %v791_v31  ;;  %v802_v25 = vmul.f32 %v2448_v36, %v791_v31  ;;  %v2532_v26 = vmul.f32 %v2453_v37, %v791_v31  ;;  %v2535_v27 = vmul.f32 %v2458_v38, %v791_v31 }
  0x6d   :  { %2161 = vset.pattern.permute.xlu1 %v2392_v29 }
  0x6e   :  { %701 = vperm.xlu1 %2161, %v698_v30  }
  0x71   :  { %v810_v33 = vpop.permute.xlu2 %809 }
  0x76   :  { %v68_v32 = vpop.permute.xlu0 %67  ;;  %2163 = vset.pattern.permute.xlu1 %v19_v20 }
  0x77   :  { %v78_v1 = vmul.f32 %v68_v32, %v2438_v34  ;;  %v79_v2 = vmul.f32 %v68_v32, %v2463_v39  ;;  %v80_v3 = vmul.f32 %v68_v32, %v2468_v40  ;;  %v81_v4 = vmul.f32 %v68_v32, %v2473_v41 }
  0x79   :  { %v100_v52 = vpop.permute.xlu2 %99 }
  0x7a   :  { %v2501_v61 = vsub.f32 %v86_v48, %v100_v52  ;;  %v2503_v62 = vsub.f32 %v87_v49, %v100_v52  ;;  %v2505_v63 = vsub.f32 %v88_v50, %v100_v52  ;;  %v2507_v0 = vsub.f32 %v89_v51, %v100_v52 }
  0x7c   :  { %4266 = vst [vmem:[#allocation7_spill] sm:$0xff] %v2501_v61  ;;  %v142_v11 = vmax.f32 %v2501_v61, %v2505_v63  ;;  %v149_v12 = vmax.f32 %v2503_v62, %v2507_v0  ;;  %v184_v13 = vmin.f32 %v2501_v61, %v2505_v63  ;;  %v191_v14 = vmin.f32 %v2503_v62, %v2507_v0 }
  0x7d   :  { %4267 = vst [vmem:[#allocation8_spill] sm:$0xff] %v2503_v62 }
  0x7e   :  { %v783_v42 = vpop.permute.xlu1 %782  ;;  %v2475_v43 = vpop.permute.xlu0 %71  ;;  %4268 = vst [vmem:[#allocation9_spill] sm:$0xff] %v2505_v63 }
  0x7f   :  { %v793_v44 = vmul.f32 %v2443_v35, %v783_v42  ;;  %v794_v45 = vmul.f32 %v2448_v36, %v783_v42  ;;  %v795_v46 = vmul.f32 %v2453_v37, %v783_v42  ;;  %v796_v47 = vmul.f32 %v2458_v38, %v783_v42  ;;  %4269 = vst [vmem:[#allocation10_spill] sm:$0xff] %v2507_v0 }
  0x80   :  { %v150_v42 = vrot.slane %v149_v12, 4  ;;  %v82_v49 = vmul.f32 %v2475_v43, %v2438_v34  ;;  %v83_v50 = vmul.f32 %v2475_v43, %v2463_v39  ;;  %v84_v51 = vmul.f32 %v2475_v43, %v2468_v40 }
  0x81   :  { %v2485_v53 = vsub.f32 %v793_v44, %v810_v33  ;;  %v2487_v54 = vsub.f32 %v794_v45, %v810_v33  ;;  %v2489_v55 = vsub.f32 %v795_v46, %v810_v33  ;;  %v2491_v56 = vsub.f32 %v796_v47, %v810_v33 }
  0x82   :  { %v143_v33 = vrot.slane %v142_v11, 4  ;;  %v185_v44 = vrot.slane %v184_v13, 4  ;;  %v192_v45 = vrot.slane %v191_v14, 4  ;;  %v85_v52 = vmul.f32 %v2475_v43, %v2473_v41 }
  0x83   :  { %4264 = vst [vmem:[#allocation5_spill] sm:$0xff] %v2489_v55  ;;  %v832_v57 = vmax.f32 %v2485_v53, %v2489_v55  ;;  %v839_v58 = vmax.f32 %v2487_v54, %v2491_v56  ;;  %v874_v59 = vmin.f32 %v2485_v53, %v2489_v55  ;;  %v881_v60 = vmin.f32 %v2487_v54, %v2491_v56 }
  0x84   :  { %4265 = vst [vmem:[#allocation6_spill] sm:$0xff] %v2491_v56  ;;  %v2559_v34 = vmin.f32 %v191_v14, %v192_v45 }
  0x85   :  { %v833_v5 = vrot.slane %v832_v57, 4  ;;  %v840_v6 = vrot.slane %v839_v58, 4  ;;  %v875_v7 = vrot.slane %v874_v59, 4  ;;  %v882_v8 = vrot.slane %v881_v60, 4 }
  0x86   :  { %v787_v9 = vpop.permute.xlu1 %786 }
  0x87   :  { %v92_v10 = vpop.permute.xlu0 %91  ;;  %v834_v20 = vmax.f32 %v832_v57, %v833_v5  ;;  %v841_v21 = vmax.f32 %v839_v58, %v840_v6  ;;  %v876_v22 = vmin.f32 %v874_v59, %v875_v7  ;;  %v883_v23 = vmin.f32 %v881_v60, %v882_v8 }
  0x88   :  { %v2521_v15 = vsub.f32 %v78_v1, %v92_v10  ;;  %v2523_v16 = vsub.f32 %v79_v2, %v92_v10  ;;  %v2525_v17 = vsub.f32 %v80_v3, %v92_v10  ;;  %v2527_v19 = vsub.f32 %v81_v4, %v92_v10 }
  0x89   :  { %v835_v46 = vrot.slane %v834_v20, 2  ;;  %v842_v47 = vrot.slane %v841_v21, 2  ;;  %v877_v31 = vrot.slane %v876_v22, 2  ;;  %v884_v48 = vrot.slane %v883_v23, 2 }
  0x8a   :  { %v114_v28 = vmax.f32 %v2521_v15, %v2525_v17  ;;  %v121_v29 = vmax.f32 %v2523_v16, %v2527_v19  ;;  %v156_v30 = vmin.f32 %v2521_v15, %v2525_v17  ;;  %v163_v32 = vmin.f32 %v2523_v16, %v2527_v19 }
  0x8b   :  { %v2553_v2 = vmax.f32 %v142_v11, %v143_v33  ;;  %v2555_v3 = vmax.f32 %v149_v12, %v150_v42  ;;  %v2557_v4 = vmin.f32 %v184_v13, %v185_v44  ;;  %v2561_v39 = vmax.f32 %v834_v20, %v835_v46 }
  0x8c   :  { %v115_v58 = vrot.slane %v114_v28, 4  ;;  %v122_v59 = vrot.slane %v121_v29, 4  ;;  %v157_v60 = vrot.slane %v156_v30, 4  ;;  %v164_v1 = vrot.slane %v163_v32, 4 }
  0x8d   :  { %v2563_v5 = vmax.f32 %v841_v21, %v842_v47  ;;  %v2565_v40 = vmin.f32 %v876_v22, %v877_v31  ;;  %v2567_v41 = vmin.f32 %v883_v23, %v884_v48  ;;  %v797_v21 = vmul.f32 %v2443_v35, %v787_v9 }
  0x8e   :  { %v116_v10 = vmax.f32 %v114_v28, %v115_v58  ;;  %v123_v11 = vmax.f32 %v121_v29, %v122_v59  ;;  %v158_v12 = vmin.f32 %v156_v30, %v157_v60  ;;  %v165_v13 = vmin.f32 %v163_v32, %v164_v1 }
  0x8f   :  { %v96_v57 = vpop.permute.xlu1 %95  ;;  %v798_v22 = vmul.f32 %v2448_v36, %v787_v9  ;;  %v799_v23 = vmul.f32 %v2453_v37, %v787_v9  ;;  %v800_v33 = vmul.f32 %v2458_v38, %v787_v9  ;;  %v818_v42 = vpop.permute.xlu0 %817  ;;  %v837_v44 = vrot.slane %v2561_v39, 1 }
  0x90   :  { %v2569_v43 = vsub.f32 %v82_v49, %v96_v57  ;;  %v2571_v6 = vsub.f32 %v83_v50, %v96_v57  ;;  %v2573_v7 = vsub.f32 %v84_v51, %v96_v57  ;;  %v2575_v8 = vsub.f32 %v85_v52, %v96_v57 }
  0x91   :  { %v844_v28 = vrot.slane %v2563_v5, 1  ;;  %v879_v36 = vrot.slane %v2565_v40, 1  ;;  %v886_v37 = vrot.slane %v2567_v41, 1  ;;  %v117_v32 = vrot.slane %v116_v10, 2 }
  0x92   :  { %v2587_v29 = vmax.f32 %v2569_v43, %v2573_v7  ;;  %v2591_v30 = vmax.f32 %v2571_v6, %v2575_v8  ;;  %v124_v38 = vrot.slane %v123_v11, 2  ;;  %v159_v9 = vrot.slane %v158_v12, 2 }
  0x93   :  { %v166_v45 = vrot.slane %v165_v13, 2  ;;  %v2597_v46 = vmin.f32 %v2569_v43, %v2573_v7  ;;  %v2601_v47 = vmin.f32 %v2571_v6, %v2575_v8  ;;  %v2603_v31 = vsub.f32 %v801_v24, %v818_v42 }
  0x94   :  { %v2605_v48 = vsub.f32 %v802_v25, %v818_v42  ;;  %v2618_v59 = vsub.f32 %v2532_v26, %v818_v42  ;;  %v2621_v24 = vsub.f32 %v2535_v27, %v818_v42  ;;  %v845_v63 = vmax.f32 %v2563_v5, %v844_v28 }
  0x95   :  { %4270 = vst [vmem:[#allocation11_spill] sm:$0xff] %v2603_v31  ;;  %v167_v26 = vmin.f32 %v165_v13, %v166_v45  ;;  %v171_v62 = vrot.slane %v2597_v46, 4  ;;  %v838_v45 = vmax.f32 %v2561_v39, %v837_v44 }
  0x96   :  { %4271 = vst [vmem:[#allocation12_spill] sm:$0xff] %v2605_v48 }
  0x97   :  { %v814_v35 = vpop.permute.xlu1 %813  ;;  %4274 = vst [vmem:[#allocation15_spill] sm:$0xff] %v2618_v59  ;;  %v168_v57 = vrot.slane %v167_v26, 1 }
  0x98   :  { %v2607_v49 = vsub.f32 %v797_v21, %v814_v35  ;;  %v2609_v50 = vsub.f32 %v798_v22, %v814_v35  ;;  %v2611_v51 = vsub.f32 %v799_v23, %v814_v35  ;;  %v2613_v52 = vsub.f32 %v800_v33, %v814_v35  ;;  %4275 = vst [vmem:[#allocation16_spill] sm:$0xff] %v2621_v24 }
  0x99   :  { %v118_v22 = vmax.f32 %v116_v10, %v117_v32  ;;  %v125_v23 = vmax.f32 %v123_v11, %v124_v38  ;;  %v160_v33 = vmin.f32 %v158_v12, %v159_v9  ;;  %v169_v10 = vmin.f32 %v167_v26, %v168_v57 }
  0x9a   :  { %4272 = vst [vmem:[#allocation13_spill] sm:$0xff] %v2611_v51  ;;  %v846_v25 = vmax.f32 %v2607_v49, %v2611_v51  ;;  %v853_v60 = vmax.f32 %v2609_v50, %v2613_v52  ;;  %v888_v1 = vmin.f32 %v2607_v49, %v2611_v51  ;;  %v895_v21 = vmin.f32 %v2609_v50, %v2613_v52 }
  0x9b   :  { %4273 = vst [vmem:[#allocation14_spill] sm:$0xff] %v2613_v52  ;;  %v119_v20 = vrot.slane %v118_v22, 1  ;;  %v126_v14 = vrot.slane %v125_v23, 1  ;;  %v161_v58 = vrot.slane %v160_v33, 1  ;;  %v178_v11 = vrot.slane %v2601_v47, 4 }
  0x9c   :  { %v847_v35 = vrot.slane %v846_v25, 4  ;;  %v854_v18 = vrot.slane %v853_v60, 4  ;;  %v889_v27 = vrot.slane %v888_v1, 4  ;;  %v896_v42 = vrot.slane %v895_v21, 4 }
  0x9d   :  { %v120_v0 = vmax.f32 %v118_v22, %v119_v20  ;;  %v127_v51 = vmax.f32 %v125_v23, %v126_v14  ;;  %v162_v52 = vmin.f32 %v160_v33, %v161_v58  ;;  %v887_v14 = vmin.f32 %v2567_v41, %v886_v37 }
  0x9e   :  { %v848_v61 = vmax.f32 %v846_v25, %v847_v35  ;;  %v855_v56 = vmax.f32 %v853_v60, %v854_v18  ;;  %v890_v55 = vmin.f32 %v888_v1, %v889_v27  ;;  %v897_v32 = vmin.f32 %v895_v21, %v896_v42  ;;  %v2656_v27 = vld [vmem:[%s4187_s2] sm:$0x7] }
  0x9f   :  { %v198_v38 = vadd.f32 %v162_v52, %v120_v0  ;;  %v199_v9 = vadd.f32 %v169_v10, %v127_v51  ;;  %v860_v25 = vmax.f32 %v2603_v31, %v2618_v59  ;;  %v880_v18 = vmin.f32 %v2565_v40, %v879_v36  ;;  %4277 = vst [vmem:[#allocation18_spill] sm:$0xff] %v2656_v27 }
  0xa0   :  { %v849_v12 = vrot.slane %v848_v61, 2  ;;  %v891_v13 = vrot.slane %v890_v55, 2  ;;  %v867_v57 = vmax.f32 %v2605_v48, %v2621_v24  ;;  %v856_v58 = vrot.slane %v855_v56, 2 }
  0xa1   :  { %v204_v60 = vmul.f32 0.5, %v198_v38  ;;  %v205_v1 = vmul.f32 0.5, %v199_v9  ;;  %v898_v0 = vrot.slane %v897_v32, 2  ;;  %v916_v51 = vadd.f32 %v880_v18, %v838_v45 }
  0xa2   :  { %v850_v20 = vmax.f32 %v848_v61, %v849_v12  ;;  %v917_v52 = vadd.f32 %v887_v14, %v845_v63  ;;  %v892_v39 = vmin.f32 %v890_v55, %v891_v13  ;;  %v902_v61 = vmin.f32 %v2603_v31, %v2618_v59 }
  0xa3   :  { %v212_v5 = vsub.f32 %v2525_v17, %v204_v60  ;;  %v213_v44 = vsub.f32 %v2527_v19, %v205_v1  ;;  %v210_v28 = vsub.f32 %v2521_v15, %v204_v60  ;;  %v211_v40 = vsub.f32 %v2523_v16, %v205_v1 }
  0xa4   :  { %v2647_v41 = vmul.f32 0.5, %v916_v51  ;;  %v2649_v36 = vmul.f32 0.5, %v917_v52  ;;  %v851_v37 = vrot.slane %v850_v20, 1  ;;  %v857_v55 = vmax.f32 %v855_v56, %v856_v58 }
  0xa5   :  { %v224_v21 = vmul.f32 2.5, %v212_v5  ;;  %v225_v22 = vmul.f32 2.5, %v213_v44  ;;  %v222_v63 = vmul.f32 2.5, %v210_v28  ;;  %v223_v33 = vmul.f32 2.5, %v211_v40 }
  0xa6   :  { %4276 = vst [vmem:[#allocation17_spill] sm:$0xff] %v2649_v36  ;;  %v928_v23 = vsub.f32 %v2485_v53, %v2647_v41  ;;  %v893_v26 = vrot.slane %v892_v39, 1  ;;  %v899_v35 = vmin.f32 %v897_v32, %v898_v0  ;;  %v929_v12 = vsub.f32 %v2487_v54, %v2649_v36 }
  0xa7   :  { %v238_v42 = vmul.f32 1.442695, %v224_v21  ;;  %v240_v10 = vmul.f32 1.442695, %v225_v22  ;;  %v234_v13 = vmul.f32 1.442695, %v222_v63  ;;  %v909_v9 = vmin.f32 %v2605_v48, %v2621_v24 }
  0xa8   :  { %v4278_v38 = vrot.slane %v2587_v29, 4  ;;  %v852_v32 = vmax.f32 %v850_v20, %v851_v37  ;;  %v894_v45 = vmin.f32 %v892_v39, %v893_v26  ;;  %v4279_v18 = vrot.slane %v2591_v30, 4 }
  0xa9   :  { %2170 = vpow2.f32 %v238_v42  ;;  %v940_v58 = vmul.f32 2.5, %v928_v23  ;;  %v1438_v60 = vperm.slane %v2656_v27, 1  ;;  %v861_v1 = vrot.slane %v860_v25, 4  ;;  %v2685_v42 = vpop.permute.xlu2 %28 }
  0xaa   :  { %v2663_v56 = vmax.f32 %v2587_v29, %v4278_v38  ;;  %v2670_v14 = vmax.f32 %v2591_v30, %v4279_v18  ;;  %v868_v0 = vrot.slane %v867_v57, 4  ;;  %2172 = vpow2.f32 %v240_v10 }
  0xab   :  { %v236_v51 = vmul.f32 1.442695, %v223_v33  ;;  %v941_v29 = vmul.f32 2.5, %v929_v12  ;;  %2174 = vpow2.f32 %v234_v13  ;;  %v858_v52 = vrot.slane %v857_v55, 1  ;;  %1443 = vperm.xlu1 %2163, %v1438_v60  }
  0xac   :  { %v900_v5 = vrot.slane %v899_v35, 1  ;;  %v172_v30 = vmin.f32 %v2597_v46, %v171_v62  ;;  %v918_v44 = vadd.f32 %v894_v45, %v852_v32  ;;  %v179_v28 = vmin.f32 %v2601_v47, %v178_v11  ;;  %v2687_v62 = vpop.permute.xlu1 %22 }
  0xad   :  { %v903_v40 = vrot.slane %v902_v61, 4  ;;  %v910_v37 = vrot.slane %v909_v9, 4  ;;  %v952_v21 = vmul.f32 1.442695, %v940_v58  ;;  %v131_v22 = vrot.slane %v2663_v56, 2 }
  0xae   :  { %v138_v63 = vrot.slane %v2670_v14, 2  ;;  %v2681_v23 = vmax.f32 %v860_v25, %v861_v1  ;;  %2176 = vpow2.f32 %v236_v51  ;;  %v2683_v26 = vmax.f32 %v867_v57, %v868_v0 }
  0xaf   :  { %v2171_v33 = vpop.eup %2170  ;;  %v954_v10 = vmul.f32 1.442695, %v941_v29  ;;  %v859_v46 = vmax.f32 %v857_v55, %v858_v52  ;;  %v901_v47 = vmin.f32 %v899_v35, %v900_v5  ;;  %v173_v12 = vrot.slane %v172_v30, 2 }
  0xb0   :  { %v2173_v11 = vpop.eup %2172  ;;  %2178 = vrcp.f32 %v2171_v33  ;;  %v272_v13 = vmul.f32 %v2171_v33, %v2685_v42  ;;  %v2690_v38 = vmul.f32 0.5, %v918_v44  ;;  %v180_v32 = vrot.slane %v179_v28, 2 }
  0xb1   :  { %v2175_v25 = vpop.eup %2174  ;;  %v2692_v45 = vmin.f32 %v902_v61, %v903_v40  ;;  %v273_v57 = vmul.f32 %v2173_v11, %v2685_v42  ;;  %2180 = vpow2.f32 %v952_v21  ;;  %v2695_v18 = vmin.f32 %v909_v9, %v910_v37 }
  0xb2   :  { %v296_v58 = vmul.f32 %v272_v13, %v2525_v17  ;;  %2182 = vrcp.f32 %v2175_v25  ;;  %v270_v55 = vmul.f32 %v2175_v25, %v2687_v62  ;;  %v919_v1 = vadd.f32 %v901_v47, %v859_v46 }
  0xb3   :  { %2184 = vpow2.f32 %v954_v10  ;;  %v932_v9 = vsub.f32 %v2607_v49, %v2690_v38  ;;  %v297_v52 = vmul.f32 %v273_v57, %v2527_v19  ;;  %v132_v21 = vmax.f32 %v2663_v56, %v131_v22 }
  0xb4   :  { %v2177_v0 = vpop.eup %2176  ;;  %2186 = vrcp.f32 %v2173_v11  ;;  %v294_v61 = vmul.f32 %v270_v55, %v2521_v15  ;;  %v348_v51 = vadd.f32 %v272_v13, %v270_v55  ;;  %v139_v33 = vmax.f32 %v2670_v14, %v138_v63 }
  0xb5   :  { %2188 = vrcp.f32 %v2177_v0  ;;  %v271_v5 = vmul.f32 %v2177_v0, %v2687_v62  ;;  %v2710_v11 = vmul.f32 0.5, %v919_v1  ;;  %v174_v13 = vmin.f32 %v172_v30, %v173_v12 }
  0xb6   :  { %v2179_v44 = vpop.eup %2178  ;;  %v306_v40 = vadd.f32 %v296_v58, %v294_v61  ;;  %v349_v37 = vrot.slane %v348_v51, 4  ;;  %v944_v29 = vmul.f32 2.5, %v932_v9  ;;  %v181_v0 = vmin.f32 %v179_v28, %v180_v32 }
  0xb7   :  { %v2181_v10 = vpop.eup %2180  ;;  %v295_v46 = vmul.f32 %v271_v5, %v2523_v16  ;;  %v355_v47 = vadd.f32 %v273_v57, %v271_v5  ;;  %v284_v55 = vmul.f32 %v2179_v44, %v2685_v42  ;;  %v133_v39 = vrot.slane %v132_v21, 1 }
  0xb8   :  { %v2183_v25 = vpop.eup %2182  ;;  %v350_v60 = vadd.f32 %v349_v37, %v348_v51  ;;  %v307_v61 = vrot.slane %v306_v40, 4  ;;  %2190 = vrcp.f32 %v2181_v10  ;;  %v140_v57 = vrot.slane %v139_v33, 1 }
  0xb9   :  { %v2185_v35 = vpop.eup %2184  ;;  %v282_v58 = vmul.f32 %v2183_v25, %v2687_v62  ;;  %v313_v56 = vadd.f32 %v297_v52, %v295_v46  ;;  %v356_v22 = vrot.slane %v355_v47, 4  ;;  %v933_v30 = vsub.f32 %v2609_v50, %v2710_v11 }
  0xba   :  { %v2187_v14 = vpop.eup %2186  ;;  %v351_v63 = vrot.slane %v350_v60, 2  ;;  %v175_v12 = vrot.slane %v174_v13, 1  ;;  %v4280_v51 = vrot.slane %v2553_v2, 2  ;;  %v392_v32 = vmul.f32 %v284_v55, %v2525_v17 }
  0xbb   :  { %v2189_v1 = vpop.eup %2188  ;;  %v357_v5 = vadd.f32 %v356_v22, %v355_v47  ;;  %2192 = vrcp.f32 %v2185_v35  ;;  %v390_v9 = vmul.f32 %v282_v58, %v2521_v15  ;;  %v182_v52 = vrot.slane %v181_v0, 1  ;;  %v726_v22 = vpop.permute.xlu2 %725 }
  0xbc   :  { %v2719_v28 = vmax.f32 %v2553_v2, %v4280_v51  ;;  %v308_v37 = vadd.f32 %v307_v61, %v306_v40  ;;  %v314_v46 = vrot.slane %v313_v56, 4  ;;  %v960_v47 = vmul.f32 1.442695, %v944_v29 }
  0xbd   :  { %v285_v25 = vmul.f32 %v2187_v14, %v2685_v42  ;;  %v283_v20 = vmul.f32 %v2189_v1, %v2687_v62  ;;  %v352_v48 = vadd.f32 %v351_v63, %v350_v60  ;;  %v134_v31 = vmax.f32 %v132_v21, %v133_v39 }
  0xbe   :  { %v358_v2 = vrot.slane %v357_v5, 2  ;;  %v945_v51 = vmul.f32 2.5, %v933_v30  ;;  %v141_v27 = vmax.f32 %v139_v33, %v140_v57  ;;  %v176_v17 = vmin.f32 %v174_v13, %v175_v12  ;;  %v2191_v24 = vpop.eup %2190 }
  0xbf   :  { %v402_v59 = vadd.f32 %v392_v32, %v390_v9  ;;  %v444_v15 = vadd.f32 %v284_v55, %v282_v58  ;;  %v183_v36 = vmin.f32 %v181_v0, %v182_v52  ;;  %v147_v44 = vrot.slane %v2719_v28, 1 }
  0xc0   :  { %v2727_v40 = vmul.f32 %v2181_v10, %v726_v22  ;;  %v309_v29 = vrot.slane %v308_v37, 2  ;;  %v315_v61 = vadd.f32 %v314_v46, %v313_v56  ;;  %2194 = vpow2.f32 %v960_v47 }
  0xc1   :  { %v2193_v42 = vpop.eup %2192  ;;  %v393_v62 = vmul.f32 %v285_v25, %v2527_v19  ;;  %v2730_v60 = vmul.f32 %v2185_v35, %v726_v22  ;;  %v353_v39 = vrot.slane %v352_v48, 1  ;;  %v391_v21 = vmul.f32 %v283_v20, %v2523_v16 }
  0xc2   :  { %v2733_v33 = vmul.f32 %v2191_v24, %v726_v22  ;;  %v359_v13 = vadd.f32 %v358_v2, %v357_v5  ;;  %v962_v55 = vmul.f32 1.442695, %v945_v51  ;;  %v200_v0 = vadd.f32 %v176_v17, %v134_v31 }
  0xc3   :  { %v403_v58 = vrot.slane %v402_v59, 4  ;;  %v445_v14 = vrot.slane %v444_v15, 4  ;;  %v451_v10 = vadd.f32 %v285_v25, %v283_v20  ;;  %v201_v63 = vadd.f32 %v183_v36, %v141_v27 }
  0xc4   :  { %v2735_v57 = vmul.f32 %v2193_v42, %v726_v22  ;;  %v2737_v56 = vadd.f32 %v309_v29, %v308_v37  ;;  %v316_v1 = vrot.slane %v315_v61, 2  ;;  %v4282_v19 = vrot.slane %v2555_v3, 2 }
  0xc5   :  { %v2744_v16 = vmul.f32 %v2727_v40, %v2485_v53  ;;  %v2748_v31 = vmul.f32 %v2730_v60, %v2487_v54  ;;  %v354_v24 = vadd.f32 %v353_v39, %v352_v48  ;;  %v409_v20 = vadd.f32 %v393_v62, %v391_v21 }
  0xc6   :  { %4281 = vst [vmem:[#allocation19_spill] sm:$0xff] %v2737_v56  ;;  %v153_v35 = vmax.f32 %v2555_v3, %v4282_v19  ;;  %v2195_v36 = vpop.eup %2194  ;;  %v2752_v27 = vmul.f32 %v2733_v33, %v2485_v53  ;;  %v360_v5 = vrot.slane %v359_v13, 1  ;;  %2196 = vpow2.f32 %v962_v55 }
  0xc7   :  { %v206_v30 = vmul.f32 0.5, %v200_v0  ;;  %v404_v12 = vadd.f32 %v403_v58, %v402_v59  ;;  %v446_v3 = vadd.f32 %v445_v14, %v444_v15  ;;  %v452_v32 = vrot.slane %v451_v10, 4 }
  0xc8   :  { %4283 = vst [vmem:[#allocation20_spill] sm:$0xff] %v2752_v27  ;;  %v207_v9 = vmul.f32 0.5, %v201_v63  ;;  %v2756_v52 = vmul.f32 %v2735_v57, %v2487_v54  ;;  %v2759_v48 = vadd.f32 %v316_v1, %v315_v61  ;;  %v410_v47 = vrot.slane %v409_v20, 4 }
  0xc9   :  { %v214_v46 = vsub.f32 %v2569_v43, %v206_v30  ;;  %v2762_v53 = vadd.f32 1e-30, %v354_v24  ;;  %2198 = vrcp.f32 %v2195_v36  ;;  %v361_v59 = vadd.f32 %v360_v5, %v359_v13 }
  0xca   :  { %4284 = vst [vmem:[#allocation21_spill] sm:$0xff] %v2756_v52  ;;  %v215_v25 = vsub.f32 %v2571_v6, %v207_v9  ;;  %v154_v2 = vrot.slane %v153_v35, 1  ;;  %v4287_v51 = vrot.slane %v2557_v4, 2  ;;  %v405_v17 = vrot.slane %v404_v12, 2 }
  0xcb   :  { %4285 = vst [vmem:[#allocation22_spill] sm:$0xff] %v2759_v48  ;;  %v226_v22 = vmul.f32 2.5, %v214_v46  ;;  %v447_v15 = vrot.slane %v446_v3, 2  ;;  %v453_v29 = vadd.f32 %v452_v32, %v451_v10  ;;  %v148_v39 = vmax.f32 %v2719_v28, %v147_v44 }
  0xcc   :  { %4286 = vst [vmem:[#allocation23_spill] sm:$0xff] %v2762_v53  ;;  %v188_v54 = vmin.f32 %v2557_v4, %v4287_v51  ;;  %v227_v61 = vmul.f32 2.5, %v215_v25  ;;  %v2197_v42 = vpop.eup %2196  ;;  %v4288_v55 = vrot.slane %v2559_v34, 2  ;;  %v411_v13 = vadd.f32 %v410_v47, %v409_v20  ;;  %v2774_v4 = vpop.permute.xlu2 %738 }
  0xcd   :  { %v242_v62 = vmul.f32 1.442695, %v226_v22  ;;  %2200 = vrcp.f32 %v2762_v53  ;;  %v216_v14 = vsub.f32 %v2573_v7, %v206_v30  ;;  %v155_v63 = vmax.f32 %v153_v35, %v154_v2 }
  0xce   :  { %v189_v21 = vrot.slane %v188_v54, 1  ;;  %v195_v0 = vmin.f32 %v2559_v34, %v4288_v55  ;;  %v244_v58 = vmul.f32 1.442695, %v227_v61  ;;  %v217_v19 = vsub.f32 %v2575_v8, %v207_v9 }
  0xcf   :  { %v2777_v24 = vpop.eup %2198  ;;  %v448_v28 = vadd.f32 %v447_v15, %v446_v3  ;;  %v454_v44 = vrot.slane %v453_v29, 2  ;;  %v2780_v5 = vmul.f32 %v2195_v36, %v2774_v4  ;;  %v228_v34 = vmul.f32 2.5, %v216_v14 }
  0xd0   :  { %v190_v10 = vmin.f32 %v188_v54, %v189_v21  ;;  %v196_v1 = vrot.slane %v195_v0, 1  ;;  %2202 = vpow2.f32 %v242_v62  ;;  %v229_v46 = vmul.f32 2.5, %v217_v19  ;;  %v4297_v19 = vld [vmem:[#allocation13_spill] sm:$0xff] }
  0xd1   :  { %v2782_v30 = vadd.f32 %v405_v17, %v404_v12  ;;  %2204 = vpow2.f32 %v244_v58  ;;  %v246_v35 = vmul.f32 1.442695, %v228_v34  ;;  %v4290_v47 = vrot.slane %v2681_v23, 2  ;;  %v4295_v58 = vld [vmem:[#allocation9_spill] sm:$0xff] }
  0xd2   :  { %v197_v20 = vmin.f32 %v195_v0, %v196_v1  ;;  %v202_v32 = vadd.f32 %v190_v10, %v148_v39  ;;  %v248_v3 = vmul.f32 1.442695, %v229_v46  ;;  %v4291_v36 = vrot.slane %v2692_v45, 2  ;;  %v36_v0 = vpop.permute.xlu0 %35 }
  0xd3   :  { %4289 = vst [vmem:[#allocation24_spill] sm:$0xff] %v2782_v30  ;;  %v864_v9 = vmax.f32 %v2681_v23, %v4290_v47  ;;  %v2792_v51 = vpop.eup %2200  ;;  %v412_v54 = vrot.slane %v411_v13, 2  ;;  %v455_v15 = vadd.f32 %v454_v44, %v453_v29  ;;  %v2794_v12 = vadd.f32 1e-30, %v361_v59 }
  0xd4   :  { %v203_v25 = vadd.f32 %v197_v20, %v155_v63  ;;  %v2787_v22 = vmul.f32 0.5, %v202_v32  ;;  %v906_v2 = vmin.f32 %v2692_v45, %v4291_v36  ;;  %4292 = vst [vmem:[#allocation25_spill] sm:$0xff] %v2792_v51  ;;  %2206 = vpow2.f32 %v246_v35  ;;  %v4298_v20 = vld [vmem:[#allocation10_spill] sm:$0xff] }
  0xd5   :  { %4293 = vst [vmem:[#allocation26_spill] sm:$0xff] %v2794_v12  ;;  %v449_v17 = vrot.slane %v448_v28, 1  ;;  %2208 = vpow2.f32 %v248_v3  ;;  %v4294_v23 = vrot.slane %v2683_v26, 2  ;;  %v2803_v45 = vmul.f32 %v2197_v42, %v2774_v4  ;;  %v4300_v3 = vld [vmem:[#allocation14_spill] sm:$0xff] }
  0xd6   :  { %v2796_v61 = vmul.f32 0.5, %v203_v25  ;;  %2210 = vrcp.f32 %v2197_v42  ;;  %v865_v21 = vrot.slane %v864_v9, 1  ;;  %v2203_v55 = vpop.eup %2202  ;;  %v2808_v29 = vmul.f32 %v2780_v5, %v2607_v49  ;;  %v42_v42 = vpop.permute.xlu1 %41 }
  0xd7   :  { %v871_v62 = vmax.f32 %v2683_v26, %v4294_v23  ;;  %v220_v14 = vsub.f32 %v4295_v58, %v2787_v22  ;;  %v907_v63 = vrot.slane %v906_v2, 1  ;;  %v2205_v26 = vpop.eup %2204  ;;  %v2812_v10 = vadd.f32 %v412_v54, %v411_v13 }
  0xd8   :  { %v456_v1 = vrot.slane %v455_v15, 1  ;;  %2212 = vrcp.f32 %v2794_v12  ;;  %v934_v44 = vsub.f32 %v4297_v19, %v2690_v38  ;;  %v450_v34 = vadd.f32 %v449_v17, %v448_v28 }
  0xd9   :  { %4296 = vst [vmem:[#allocation9_spill] sm:$0xff] %v2812_v10  ;;  %v221_v32 = vsub.f32 %v4298_v20, %v2796_v61  ;;  %v872_v46 = vrot.slane %v871_v62, 1  ;;  %v4299_v35 = vrot.slane %v2695_v18, 2  ;;  %2214 = vrcp.f32 %v2203_v55 }
  0xda   :  { %v2207_v25 = vpop.eup %2206  ;;  %v274_v13 = vmul.f32 %v2203_v55, %v36_v0  ;;  %v935_v36 = vsub.f32 %v4300_v3, %v2710_v11  ;;  %v866_v54 = vmax.f32 %v864_v9, %v865_v21  ;;  %2216 = vrcp.f32 %v2205_v26 }
  0xdb   :  { %v913_v47 = vmin.f32 %v2695_v18, %v4299_v35  ;;  %v2209_v23 = vpop.eup %2208  ;;  %v232_v39 = vmul.f32 2.5, %v220_v14  ;;  %v276_v38 = vmul.f32 %v2207_v25, %v42_v42  ;;  %v908_v28 = vmin.f32 %v906_v2, %v907_v63 }
  0xdc   :  { %v2211_v17 = vpop.eup %2210  ;;  %v275_v37 = vmul.f32 %v2205_v26, %v36_v0  ;;  %2218 = vrcp.f32 %v2207_v25  ;;  %v277_v59 = vmul.f32 %v2209_v23, %v42_v42  ;;  %v946_v12 = vmul.f32 2.5, %v934_v44 }
  0xdd   :  { %v233_v51 = vmul.f32 2.5, %v221_v32  ;;  %v300_v18 = vmul.f32 %v276_v38, %v2573_v7  ;;  %v362_v35 = vadd.f32 %v276_v38, %v274_v13  ;;  %v914_v53 = vrot.slane %v913_v47, 1 }
  0xde   :  { %v2825_v55 = vpop.eup %2212  ;;  %v298_v11 = vmul.f32 %v274_v13, %v2569_v43  ;;  %2220 = vrcp.f32 %v2209_v23  ;;  %v301_v9 = vmul.f32 %v277_v59, %v2575_v8  ;;  %v947_v21 = vmul.f32 2.5, %v935_v36 }
  0xdf   :  { %4301 = vst [vmem:[#allocation13_spill] sm:$0xff] %v2825_v55  ;;  %v457_v14 = vadd.f32 %v456_v1, %v455_v15  ;;  %v2831_v2 = vmul.f32 %v2777_v24, %v2774_v4  ;;  %v254_v63 = vmul.f32 1.442695, %v232_v39  ;;  %v369_v26 = vadd.f32 %v277_v59, %v275_v37  ;;  %v2215_v44 = vpop.eup %2214 }
  0xe0   :  { %v2833_v32 = vadd.f32 1e-30, %v450_v34  ;;  %v299_v25 = vmul.f32 %v275_v37, %v2571_v6  ;;  %v320_v38 = vadd.f32 %v300_v18, %v298_v11  ;;  %v964_v55 = vmul.f32 1.442695, %v946_v12  ;;  %v2217_v48 = vpop.eup %2216 }
  0xe1   :  { %v256_v13 = vmul.f32 1.442695, %v233_v51  ;;  %v363_v23 = vrot.slane %v362_v35, 4  ;;  %v873_v56 = vmax.f32 %v871_v62, %v872_v46  ;;  %v915_v30 = vmin.f32 %v913_v47, %v914_v53 }
  0xe2   :  { %4302 = vst [vmem:[#allocation10_spill] sm:$0xff] %v2833_v32  ;;  %v2219_v36 = vpop.eup %2218  ;;  %v2837_v15 = vmul.f32 %v2211_v17, %v2774_v4  ;;  %v327_v24 = vadd.f32 %v301_v9, %v299_v25  ;;  %v966_v1 = vmul.f32 1.442695, %v947_v21  ;;  %v920_v39 = vadd.f32 %v908_v28, %v866_v54  ;;  %v2850_v28 = vpop.permute.xlu2 %54 }
  0xe3   :  { %v286_v59 = vmul.f32 %v2215_v44, %v36_v0  ;;  %2222 = vpow2.f32 %v254_v63  ;;  %v288_v34 = vmul.f32 %v2219_v36, %v42_v42  ;;  %v370_v52 = vrot.slane %v369_v26, 4  ;;  %v4307_v63 = vld [vmem:[#allocation6_spill] sm:$0xff] }
  0xe4   :  { %v2221_v27 = vpop.eup %2220  ;;  %v2839_v37 = vadd.f32 1e-30, %v457_v14  ;;  %v287_v12 = vmul.f32 %v2217_v48, %v36_v0  ;;  %v321_v18 = vrot.slane %v320_v38, 4  ;;  %2224 = vpow2.f32 %v964_v55  ;;  %v4304_v55 = vld [vmem:[#allocation5_spill] sm:$0xff] }
  0xe5   :  { %2226 = vpow2.f32 %v256_v13  ;;  %v289_v51 = vmul.f32 %v2221_v27, %v42_v42  ;;  %v364_v53 = vadd.f32 %v363_v23, %v362_v35  ;;  %v921_v62 = vadd.f32 %v915_v30, %v873_v56  ;;  %v4308_v23 = vld [vmem:[#allocation15_spill] sm:$0xff] }
  0xe6   :  { %4303 = vst [vmem:[#allocation14_spill] sm:$0xff] %v2839_v37  ;;  %v2844_v46 = vmul.f32 %v2803_v45, %v2609_v50  ;;  %v328_v47 = vrot.slane %v327_v24, 4  ;;  %2228 = vpow2.f32 %v966_v1  ;;  %v2848_v54 = vmul.f32 %v2831_v2, %v2607_v49 }
  0xe7   :  { %v371_v48 = vadd.f32 %v370_v52, %v369_v26  ;;  %v458_v0 = vadd.f32 %v288_v34, %v286_v59  ;;  %v2852_v17 = vmul.f32 0.5, %v920_v39  ;;  %2230 = vrcp.f32 %v2833_v32 }
  0xe8   :  { %v2857_v56 = vmul.f32 %v2837_v15, %v2609_v50  ;;  %v322_v27 = vadd.f32 %v321_v18, %v320_v38  ;;  %v465_v30 = vadd.f32 %v289_v51, %v287_v12  ;;  %2232 = vrcp.f32 %v2839_v37  ;;  %v4306_v50 = vld [vmem:[#allocation17_spill] sm:$0xff]  ;;  %v745_v18 = vpop.permute.xlu0 %744 }
  0xe9   :  { %v2223_v42 = vpop.eup %2222  ;;  %v365_v35 = vrot.slane %v364_v53, 2  ;;  %v2860_v49 = vmul.f32 0.5, %v921_v62  ;;  %v394_v9 = vmul.f32 %v286_v59, %v2569_v43  ;;  %v329_v14 = vadd.f32 %v328_v47, %v327_v24  ;;  %v4310_v47 = vld [vmem:[#allocation16_spill] sm:$0xff] }
  0xea   :  { %v2225_v11 = vpop.eup %2224  ;;  %v2866_v21 = vmul.f32 %v2223_v42, %v2850_v28  ;;  %v395_v25 = vmul.f32 %v287_v12, %v2571_v6  ;;  %v372_v38 = vrot.slane %v371_v48, 2  ;;  %v459_v13 = vrot.slane %v458_v0, 4 }
  0xeb   :  { %v2227_v44 = vpop.eup %2226  ;;  %2234 = vrcp.f32 %v2223_v42  ;;  %v323_v43 = vrot.slane %v322_v27, 2  ;;  %v466_v59 = vrot.slane %v465_v30, 4  ;;  %v366_v24 = vadd.f32 %v365_v35, %v364_v53 }
  0xec   :  { %4305 = vst [vmem:[#allocation5_spill] sm:$0xff] %v2866_v21  ;;  %v2229_v1 = vpop.eup %2228  ;;  %v2874_v39 = vmul.f32 %v2227_v44, %v2850_v28  ;;  %v396_v62 = vmul.f32 %v288_v34, %v2573_v7  ;;  %2236 = vrcp.f32 %v2225_v11  ;;  %v2883_v4 = vmul.f32 %v2866_v21, %v4295_v58 }
  0xed   :  { %v2879_v12 = vpop.eup %2230  ;;  %2238 = vrcp.f32 %v2227_v44  ;;  %v330_v42 = vrot.slane %v329_v14, 2  ;;  %v397_v36 = vmul.f32 %v289_v51, %v2575_v8  ;;  %v373_v52 = vadd.f32 %v372_v38, %v371_v48 }
  0xee   :  { %4309 = vst [vmem:[#allocation17_spill] sm:$0xff] %v2874_v39  ;;  %v2886_v26 = vpop.eup %2232  ;;  %v460_v53 = vadd.f32 %v459_v13, %v458_v0  ;;  %v994_v35 = vmul.f32 %v2225_v11, %v745_v18  ;;  %v995_v7 = vmul.f32 %v2229_v1, %v745_v18  ;;  %v2890_v34 = vmul.f32 %v2874_v39, %v4298_v20 }
  0xef   :  { %4311 = vst [vmem:[#allocation6_spill] sm:$0xff] %v2879_v12  ;;  %v2892_v6 = vadd.f32 %v323_v43, %v322_v27  ;;  %v467_v44 = vadd.f32 %v466_v59, %v465_v30  ;;  %2240 = vrcp.f32 %v2229_v1  ;;  %v367_v10 = vrot.slane %v366_v24, 1 }
  0xf0   :  { %4312 = vst [vmem:[#allocation15_spill] sm:$0xff] %v2883_v4  ;;  %v416_v37 = vadd.f32 %v396_v62, %v394_v9  ;;  %v1018_v12 = vmul.f32 %v994_v35, %v4297_v19  ;;  %v1080_v8 = vadd.f32 %v994_v35, %v2780_v5  ;;  %v423_v48 = vadd.f32 %v397_v36, %v395_v25 }
  0xf1   :  { %4313 = vst [vmem:[#allocation16_spill] sm:$0xff] %v2886_v26  ;;  %v2235_v51 = vpop.eup %2234  ;;  %v2896_v26 = vadd.f32 %v330_v42, %v329_v14  ;;  %v1019_v0 = vmul.f32 %v995_v7, %v4300_v3  ;;  %v1087_v11 = vadd.f32 %v995_v7, %v2803_v45  ;;  %v374_v30 = vrot.slane %v373_v52, 1 }
  0xf2   :  { %4314 = vst [vmem:[#allocation27_spill] sm:$0xff] %v2890_v34  ;;  %v2237_v38 = vpop.eup %2236  ;;  %v2901_v27 = vmul.f32 %v2235_v51, %v2850_v28  ;;  %v461_v13 = vrot.slane %v460_v53, 2  ;;  %v1081_v1 = vrot.slane %v1080_v8, 4  ;;  %v468_v59 = vrot.slane %v467_v44, 2 }
  0xf3   :  { %4315 = vst [vmem:[#allocation28_spill] sm:$0xff] %v2892_v6  ;;  %v2239_v9 = vpop.eup %2238  ;;  %v1006_v5 = vmul.f32 %v2237_v38, %v745_v18  ;;  %v1088_v62 = vrot.slane %v1087_v11, 4  ;;  %v368_v14 = vadd.f32 %v367_v10, %v366_v24  ;;  %v417_v42 = vrot.slane %v416_v37, 4 }
  0xf4   :  { %v1038_v25 = vadd.f32 %v1018_v12, %v2808_v29  ;;  %v1082_v36 = vadd.f32 %v1081_v1, %v1080_v8  ;;  %v424_v45 = vrot.slane %v423_v48, 4  ;;  %v1045_v7 = vadd.f32 %v1019_v0, %v2844_v46 }
  0xf5   :  { %v2241_v35 = vpop.eup %2240  ;;  %v1089_v51 = vadd.f32 %v1088_v62, %v1087_v11  ;;  %v1176_v32 = vadd.f32 %v1006_v5, %v2831_v2  ;;  %v375_v4 = vadd.f32 %v374_v30, %v373_v52  ;;  %v462_v39 = vadd.f32 %v461_v13, %v460_v53 }
  0xf6   :  { %v1007_v43 = vmul.f32 %v2241_v35, %v745_v18  ;;  %v469_v6 = vadd.f32 %v468_v59, %v467_v44  ;;  %v1083_v38 = vrot.slane %v1082_v36, 2  ;;  %v2909_v24 = vmul.f32 %v2239_v9, %v2850_v28  ;;  %v4317_v35 = vld [vmem:[#allocation18_spill] sm:$0xff] }
  0xf7   :  { %v1090_v21 = vrot.slane %v1089_v51, 2  ;;  %v1177_v10 = vrot.slane %v1176_v32, 4  ;;  %v418_v29 = vadd.f32 %v417_v42, %v416_v37  ;;  %v1039_v12 = vrot.slane %v1038_v25, 4 }
  0xf8   :  { %v1114_v8 = vmul.f32 %v1006_v5, %v4297_v19  ;;  %v425_v46 = vadd.f32 %v424_v45, %v423_v48  ;;  %v2912_v0 = vadd.f32 1e-30, %v368_v14  ;;  %v1046_v2 = vrot.slane %v1045_v7, 4 }
  0xf9   :  { %v1115_v11 = vmul.f32 %v1007_v43, %v4300_v3  ;;  %v463_v52 = vrot.slane %v462_v39, 1  ;;  %v1084_v53 = vadd.f32 %v1083_v38, %v1082_v36  ;;  %v1178_v18 = vadd.f32 %v1177_v10, %v1176_v32 }
  0xfa   :  { %v1183_v44 = vadd.f32 %v1007_v43, %v2837_v15  ;;  %v2918_v30 = vmul.f32 %v2901_v27, %v4295_v58  ;;  %v470_v28 = vrot.slane %v469_v6, 1  ;;  %v2920_v37 = vadd.f32 1e-30, %v375_v4 }
  0xfb   :  { %v1091_v13 = vadd.f32 %v1090_v21, %v1089_v51  ;;  %v419_v19 = vrot.slane %v418_v29, 2  ;;  %v1040_v48 = vadd.f32 %v1039_v12, %v1038_v25  ;;  %v1134_v1 = vadd.f32 %v1114_v8, %v2848_v54 }
  0xfc   :  { %4316 = vst [vmem:[#allocation29_spill] sm:$0xff] %v2920_v37  ;;  %v1184_v9 = vrot.slane %v1183_v44, 4  ;;  %v426_v59 = vrot.slane %v425_v46, 2  ;;  %2242 = vrcp.f32 %v2912_v0  ;;  %v1047_v3 = vadd.f32 %v1046_v2, %v1045_v7 }
  0xfd   :  { %v1141_v32 = vadd.f32 %v1115_v11, %v2857_v56  ;;  %v464_v15 = vadd.f32 %v463_v52, %v462_v39  ;;  %v1085_v43 = vrot.slane %v1084_v53, 1  ;;  %v1179_v5 = vrot.slane %v1178_v18, 2 }
  0xfe   :  { %v1185_v58 = vadd.f32 %v1184_v9, %v1183_v44  ;;  %v2927_v4 = vmul.f32 %v2909_v24, %v4298_v20  ;;  %v471_v21 = vadd.f32 %v470_v28, %v469_v6  ;;  %2244 = vrcp.f32 %v2920_v37  ;;  %v4325_v9 = vld [vmem:[#allocation7_spill] sm:$0xff] }
  0xff   :  { %v1092_v62 = vrot.slane %v1091_v13, 1  ;;  %v2930_v54 = vadd.f32 %v419_v19, %v418_v29  ;;  %v1041_v14 = vrot.slane %v1040_v48, 2  ;;  %v1135_v42 = vrot.slane %v1134_v1, 4 }
 0x100   :  { %v1186_v25 = vrot.slane %v1185_v58, 2  ;;  %v2932_v36 = vadd.f32 %v426_v59, %v425_v46  ;;  %v1048_v56 = vrot.slane %v1047_v3, 2  ;;  %v1142_v39 = vrot.slane %v1141_v32, 4 }
 0x101   :  { %v1431_v45 = vperm.slane %v4317_v35, 0  ;;  %v2935_v7 = vadd.f32 1e-30, %v464_v15  ;;  %v1086_v51 = vadd.f32 %v1085_v43, %v1084_v53  ;;  %v1180_v20 = vadd.f32 %v1179_v5, %v1178_v18 }
 0x102   :  { %v4318_v6 = vsub.f32 %v4304_v55, %v2647_v41  ;;  %v2940_v10 = vpop.eup %2242  ;;  %v2942_v29 = vadd.f32 1e-30, %v471_v21  ;;  %v1093_v12 = vadd.f32 %v1092_v62, %v1091_v13  ;;  %v1187_v8 = vadd.f32 %v1186_v25, %v1185_v58 }
 0x103   :  { %4319 = vst [vmem:[#allocation18_spill] sm:$0xff] %v2940_v10  ;;  %1436 = vperm.xlu2 %2162, %v1431_v45   ;;  %v4320_v46 = vsub.f32 %v4307_v63, %v4306_v50  ;;  %v2947_v11 = vadd.f32 %v1041_v14, %v1040_v48  ;;  %v1136_v52 = vadd.f32 %v1135_v42, %v1134_v1  ;;  %v1181_v15 = vrot.slane %v1180_v20, 1 }
 0x104   :  { %v942_v38 = vmul.f32 2.5, %v4318_v6  ;;  %v4322_v53 = vsub.f32 %v4308_v23, %v2852_v17  ;;  %v2952_v44 = vpop.eup %2244  ;;  %v2954_v28 = vadd.f32 %v1048_v56, %v1047_v3  ;;  %v1143_v19 = vadd.f32 %v1142_v39, %v1141_v32 }
 0x105   :  { %v943_v2 = vmul.f32 2.5, %v4320_v46  ;;  %4321 = vst [vmem:[#allocation30_spill] sm:$0xff] %v2947_v11  ;;  %v218_v59 = vsub.f32 %v4325_v9, %v2787_v22  ;;  %v2958_v50 = vadd.f32 1e-30, %v1086_v51  ;;  %v4327_v48 = vsub.f32 %v4310_v47, %v2860_v49  ;;  %v4329_v22 = vld [vmem:[#allocation8_spill] sm:$0xff]  ;;  %v4330_v46 = vld [vmem:[#allocation11_spill] sm:$0xff] }
 0x106   :  { %v950_v18 = vmul.f32 2.5, %v4322_v53  ;;  %v956_v41 = vmul.f32 1.442695, %v942_v38  ;;  %4323 = vst [vmem:[#allocation31_spill] sm:$0xff] %v2952_v44  ;;  %v1188_v43 = vrot.slane %v1187_v8, 1  ;;  %v1445_v3 = vperm.slane %v4317_v35, 2  ;;  %v732_v35 = vpop.permute.xlu1 %731 }
 0x107   :  { %4324 = vst [vmem:[#allocation32_spill] sm:$0xff] %v2954_v28  ;;  %v958_v13 = vmul.f32 1.442695, %v943_v2  ;;  %v951_v1 = vmul.f32 2.5, %v4327_v48  ;;  %v2963_v5 = vadd.f32 1e-30, %v1093_v12  ;;  %v219_v21 = vsub.f32 %v4329_v22, %v2796_v61 }
 0x108   :  { %4326 = vst [vmem:[#allocation7_spill] sm:$0xff] %v2958_v50  ;;  %2246 = vpow2.f32 %v956_v41  ;;  %v1137_v32 = vrot.slane %v1136_v52, 2  ;;  %v972_v58 = vmul.f32 1.442695, %v950_v18  ;;  %v230_v42 = vmul.f32 2.5, %v218_v59  ;;  %v4331_v41 = vld [vmem:[#allocation12_spill] sm:$0xff] }
 0x109   :  { %4328 = vst [vmem:[#allocation33_spill] sm:$0xff] %v2963_v5  ;;  %2248 = vpow2.f32 %v958_v13  ;;  %v1144_v56 = vrot.slane %v1143_v19, 2  ;;  %v1182_v39 = vadd.f32 %v1181_v15, %v1180_v20  ;;  %v1189_v51 = vadd.f32 %v1188_v43, %v1187_v8 }
 0x10a   :  { %2250 = vrcp.f32 %v2935_v7  ;;  %v974_v61 = vmul.f32 1.442695, %v951_v1  ;;  %v2976_v38 = vadd.f32 %v1137_v32, %v1136_v52  ;;  %v231_v12 = vmul.f32 2.5, %v219_v21 }
 0x10b   :  { %2252 = vrcp.f32 %v2942_v29  ;;  %1450 = vperm.xlu2 %2162, %v1445_v3   ;;  %v936_v2 = vsub.f32 %v4330_v46, %v2852_v17  ;;  %v250_v18 = vmul.f32 1.442695, %v230_v42  ;;  %v937_v13 = vsub.f32 %v4331_v41, %v2860_v49  ;;  %v2996_v49 = vpop.permute.xlu2 %757 }
 0x10c   :  { %2254 = vrcp.f32 %v2958_v50  ;;  %v2984_v59 = vadd.f32 %v1144_v56, %v1143_v19  ;;  %v2986_v15 = vadd.f32 1e-30, %v1182_v39  ;;  %v2990_v1 = vadd.f32 1e-30, %v1189_v51 }
 0x10d   :  { %2256 = vrcp.f32 %v2963_v5  ;;  %v948_v21 = vmul.f32 2.5, %v936_v2  ;;  %v949_v51 = vmul.f32 2.5, %v937_v13 }
 0x10e   :  { %v2247_v6 = vpop.eup %2246  ;;  %2258 = vpow2.f32 %v972_v58  ;;  %v252_v58 = vmul.f32 1.442695, %v231_v12 }
 0x10f   :  { %v2249_v53 = vpop.eup %2248  ;;  %2260 = vrcp.f32 %v2247_v6  ;;  %v990_v20 = vmul.f32 %v2247_v6, %v732_v35  ;;  %v968_v45 = vmul.f32 1.442695, %v948_v21 }
 0x110   :  { %v2982_v8 = vpop.eup %2250  ;;  %2262 = vrcp.f32 %v2249_v53  ;;  %v991_v52 = vmul.f32 %v2249_v53, %v732_v35 }
 0x111   :  { %v2988_v48 = vpop.eup %2252  ;;  %2264 = vpow2.f32 %v974_v61  ;;  %v1014_v17 = vmul.f32 %v990_v20, %v4304_v55  ;;  %v1066_v43 = vadd.f32 %v990_v20, %v2727_v40 }
 0x112   :  { %v2994_v3 = vpop.eup %2254  ;;  %v1015_v19 = vmul.f32 %v991_v52, %v4307_v63  ;;  %v1073_v32 = vadd.f32 %v991_v52, %v2730_v60  ;;  %2266 = vpow2.f32 %v250_v18 }
 0x113   :  { %4332 = vst [vmem:[#allocation8_spill] sm:$0xff] %v2994_v3  ;;  %v3000_v42 = vpop.eup %2256  ;;  %v1067_v39 = vrot.slane %v1066_v43, 4  ;;  %2268 = vrcp.f32 %v2986_v15  ;;  %v1024_v6 = vadd.f32 %v1014_v17, %v2744_v16  ;;  %v3011_v16 = vmul.f32 1.442695, %v949_v51  ;;  %v4334_v51 = vld [vmem:[#allocation20_spill] sm:$0xff] }
 0x114   :  { %4333 = vst [vmem:[#allocation11_spill] sm:$0xff] %v3000_v42  ;;  %v2259_v61 = vpop.eup %2258  ;;  %v1074_v53 = vrot.slane %v1073_v32, 4  ;;  %2270 = vrcp.f32 %v2990_v1  ;;  %v1031_v12 = vadd.f32 %v1015_v19, %v2748_v31  ;;  %v3015_v42 = vpop.permute.xlu1 %48 }
 0x115   :  { %v2261_v20 = vpop.eup %2260  ;;  %v3008_v60 = vmul.f32 %v2259_v61, %v2996_v49  ;;  %v1068_v2 = vadd.f32 %v1067_v39, %v1066_v43  ;;  %2272 = vpow2.f32 %v252_v58  ;;  %v1025_v17 = vrot.slane %v1024_v6, 4 }
 0x116   :  { %v2263_v52 = vpop.eup %2262  ;;  %v1002_v18 = vmul.f32 %v2261_v20, %v732_v35  ;;  %v1075_v13 = vadd.f32 %v1074_v53, %v1073_v32  ;;  %2274 = vrcp.f32 %v2259_v61  ;;  %v1032_v43 = vrot.slane %v1031_v12, 4 }
 0x117   :  { %v2265_v25 = vpop.eup %2264  ;;  %v1003_v34 = vmul.f32 %v2263_v52, %v732_v35  ;;  %v1069_v40 = vrot.slane %v1068_v2, 2 }
 0x118   :  { %v1076_v56 = vrot.slane %v1075_v13, 2  ;;  %v1110_v14 = vmul.f32 %v1002_v18, %v4304_v55  ;;  %v1162_v62 = vadd.f32 %v1002_v18, %v2733_v33  ;;  %v2267_v31 = vpop.eup %2266  ;;  %v3022_v35 = vmul.f32 %v2265_v25, %v2996_v49  ;;  %v4335_v33 = vld [vmem:[#allocation21_spill] sm:$0xff] }
 0x119   :  { %v1070_v19 = vadd.f32 %v1069_v40, %v1068_v2  ;;  %v1111_v32 = vmul.f32 %v1003_v34, %v4307_v63  ;;  %v1169_v58 = vadd.f32 %v1003_v34, %v2735_v57  ;;  %v3019_v21 = vpop.eup %2268  ;;  %2276 = vrcp.f32 %v2265_v25 }
 0x11a   :  { %v1077_v39 = vadd.f32 %v1076_v56, %v1075_v13  ;;  %v1120_v61 = vadd.f32 %v1110_v14, %v4334_v51  ;;  %v1163_v55 = vrot.slane %v1162_v62, 4  ;;  %v3025_v53 = vpop.eup %2270  ;;  %v278_v40 = vmul.f32 %v2267_v31, %v3015_v42 }
 0x11b   :  { %v1127_v20 = vadd.f32 %v1111_v32, %v4335_v33  ;;  %v1170_v52 = vrot.slane %v1169_v58, 4  ;;  %v2273_v63 = vpop.eup %2272  ;;  %v1026_v2 = vadd.f32 %v1025_v17, %v1024_v6  ;;  %2278 = vrcp.f32 %v2267_v31  ;;  %v4336_v31 = vld [vmem:[#allocation5_spill] sm:$0xff] }
 0x11c   :  { %v1121_v57 = vrot.slane %v1120_v61, 4  ;;  %v1164_v34 = vadd.f32 %v1163_v55, %v1162_v62  ;;  %v2275_v18 = vpop.eup %2274  ;;  %v3031_v56 = vmul.f32 %v3008_v60, %v4308_v23  ;;  %v1033_v14 = vadd.f32 %v1032_v43, %v1031_v12 }
 0x11d   :  { %v1071_v13 = vrot.slane %v1070_v19, 1  ;;  %v1171_v51 = vadd.f32 %v1170_v52, %v1169_v58  ;;  %v3034_v25 = vmul.f32 %v2275_v18, %v2996_v49  ;;  %v3038_v32 = vmul.f32 %v3022_v35, %v4310_v47 }
 0x11e   :  { %v1078_v33 = vrot.slane %v1077_v39, 1  ;;  %v1165_v6 = vrot.slane %v1164_v34, 2  ;;  %v1128_v17 = vrot.slane %v1127_v20, 4  ;;  %2280 = vrcp.f32 %v2273_v63 }
 0x11f   :  { %v1172_v62 = vrot.slane %v1171_v51, 2  ;;  %v376_v55 = vadd.f32 %v4336_v31, %v278_v40  ;;  %v1027_v5 = vrot.slane %v1026_v2, 2  ;;  %v1122_v3 = vadd.f32 %v1121_v57, %v1120_v61  ;;  %v2277_v43 = vpop.eup %2276 }
 0x120   :  { %v1166_v50 = vadd.f32 %v1165_v6, %v1164_v34  ;;  %v279_v12 = vmul.f32 %v2273_v63, %v3015_v42  ;;  %v1034_v58 = vrot.slane %v1033_v14, 2  ;;  %v1072_v52 = vadd.f32 %v1071_v13, %v1070_v19  ;;  %v4337_v13 = vld [vmem:[#allocation17_spill] sm:$0xff] }
 0x121   :  { %v1173_v18 = vadd.f32 %v1172_v62, %v1171_v51  ;;  %2282 = vpow2.f32 %v968_v45  ;;  %v2279_v28 = vpop.eup %2278  ;;  %v3043_v11 = vmul.f32 %v2277_v43, %v2996_v49  ;;  %v1079_v44 = vadd.f32 %v1078_v33, %v1077_v39  ;;  %v4340_v62 = vld [vmem:[#allocation15_spill] sm:$0xff] }
 0x122   :  { %v1167_v37 = vrot.slane %v1166_v50, 1  ;;  %v302_v10 = vmul.f32 %v278_v40, %v4325_v9  ;;  %v3048_v31 = vmul.f32 %v3034_v25, %v4308_v23  ;;  %v1129_v61 = vadd.f32 %v1128_v17, %v1127_v20  ;;  %v4341_v43 = vld [vmem:[#allocation27_spill] sm:$0xff] }
 0x123   :  { %v290_v63 = vmul.f32 %v2279_v28, %v3015_v42  ;;  %v303_v57 = vmul.f32 %v279_v12, %v4329_v22  ;;  %v3052_v19 = vadd.f32 %v1027_v5, %v1026_v2  ;;  %v1123_v45 = vrot.slane %v1122_v3, 2 }
 0x124   :  { %v377_v34 = vrot.slane %v376_v55, 4  ;;  %v383_v49 = vadd.f32 %v4337_v13, %v279_v12  ;;  %v2281_v51 = vpop.eup %2280  ;;  %v3055_v39 = vadd.f32 %v1034_v58, %v1033_v14  ;;  %v1168_v33 = vadd.f32 %v1167_v37, %v1166_v50 }
 0x125   :  { %v1174_v40 = vrot.slane %v1173_v18, 1  ;;  %v3057_v6 = vadd.f32 1e-30, %v1072_v52  ;;  %v3061_v23 = vmul.f32 %v3043_v11, %v4310_v47  ;;  %v3063_v28 = vadd.f32 1e-30, %v1079_v44 }
 0x126   :  { %v291_v5 = vmul.f32 %v2281_v51, %v3015_v42  ;;  %v384_v20 = vrot.slane %v383_v49, 4  ;;  %v1130_v17 = vrot.slane %v1129_v61, 2  ;;  %v334_v12 = vadd.f32 %v4340_v62, %v302_v10 }
 0x127   :  { %4338 = vst [vmem:[#allocation12_spill] sm:$0xff] %v3057_v6  ;;  %v2283_v2 = vpop.eup %2282  ;;  %v341_v14 = vadd.f32 %v4341_v43, %v303_v57  ;;  %v398_v37 = vmul.f32 %v290_v63, %v4325_v9  ;;  %v3070_v58 = vadd.f32 %v1123_v45, %v1122_v3  ;;  %v378_v52 = vadd.f32 %v377_v34, %v376_v55  ;;  %v3098_v43 = vld [vmem:[%s4187_s2] sm:$0x7] }
 0x128   :  { %4339 = vst [vmem:[#allocation20_spill] sm:$0xff] %v3063_v28  ;;  %v385_v47 = vadd.f32 %v384_v20, %v383_v49  ;;  %v1175_v13 = vadd.f32 %v1174_v40, %v1173_v18  ;;  %2284 = vrcp.f32 %v3057_v6  ;;  %v3074_v42 = vadd.f32 1e-30, %v1168_v33  ;;  %v3087_v20 = vpop.permute.xlu1 %751 }
 0x129   :  { %2286 = vrcp.f32 %v3063_v28  ;;  %v399_v10 = vmul.f32 %v291_v5, %v4329_v22  ;;  %v430_v57 = vadd.f32 %v2918_v30, %v398_v37  ;;  %v472_v9 = vadd.f32 %v2901_v27, %v290_v63  ;;  %4343 = vst [vmem:[#allocation5_spill] sm:$0xff] %v3098_v43 }
 0x12a   :  { %v3080_v51 = vadd.f32 %v1130_v17, %v1129_v61  ;;  %v335_v3 = vrot.slane %v334_v12, 4  ;;  %v342_v55 = vrot.slane %v341_v14, 4  ;;  %v479_v45 = vadd.f32 %v2909_v24, %v291_v5 }
 0x12b   :  { %v379_v34 = vrot.slane %v378_v52, 2  ;;  %v386_v49 = vrot.slane %v385_v47, 2  ;;  %v473_v33 = vrot.slane %v472_v9, 4  ;;  %v3084_v40 = vadd.f32 1e-30, %v1175_v13 }
 0x12c   :  { %2288 = vrcp.f32 %v3074_v42  ;;  %v480_v22 = vrot.slane %v479_v45, 4  ;;  %v431_v30 = vrot.slane %v430_v57, 4  ;;  %v437_v27 = vadd.f32 %v2927_v4, %v399_v10 }
 0x12d   :  { %v474_v61 = vadd.f32 %v473_v33, %v472_v9  ;;  %v2393_v63 = vmov 6   ;;  %2290 = vpow2.f32 %v3011_v16  ;;  %v336_v5 = vadd.f32 %v335_v3, %v334_v12 }
 0x12e   :  { %2164 = vset.pattern.permute.xlu0 %v2393_v63  ;;  %2165 = vset.pattern.permute.xlu1 %v2393_v63  ;;  %v3091_v24 = vpop.eup %2284  ;;  %v3093_v17 = vadd.f32 %v342_v55, %v341_v14  ;;  %v481_v62 = vadd.f32 %v480_v22, %v479_v45  ;;  %2292 = vrcp.f32 %v2283_v2  ;;  %v380_v37 = vadd.f32 %v379_v34, %v378_v52 }
 0x12f   :  { %4342 = vst [vmem:[#allocation21_spill] sm:$0xff] %v3091_v24  ;;  %1881 = vperm.xlu0 %2164, %v3098_v43   ;;  %v3101_v4 = vpop.eup %2286  ;;  %v387_v13 = vadd.f32 %v386_v49, %v385_v47  ;;  %v475_v16 = vrot.slane %v474_v61, 2  ;;  %v996_v10 = vmul.f32 %v2283_v2, %v3087_v20  ;;  %2294 = vrcp.f32 %v3084_v40 }
 0x130   :  { %4344 = vst [vmem:[#allocation17_spill] sm:$0xff] %v3101_v4  ;;  %v482_v14 = vrot.slane %v481_v62, 2  ;;  %v4257_v9 = vsub.f32 1.0, %v3098_v43  ;;  %v432_v3 = vadd.f32 %v431_v30, %v430_v57  ;;  %v438_v55 = vrot.slane %v437_v27, 4 }
 0x131   :  { %v476_v45 = vadd.f32 %v475_v16, %v474_v61  ;;  %v1020_v33 = vmul.f32 %v996_v10, %v4330_v46  ;;  %v337_v63 = vrot.slane %v336_v5, 2  ;;  %v344_v52 = vrot.slane %v3093_v17, 2 }
 0x132   :  { %v3108_v22 = vpop.eup %2288  ;;  %v483_v47 = vadd.f32 %v482_v14, %v481_v62  ;;  %v1094_v2 = vadd.f32 %v3008_v60, %v996_v10  ;;  %1901 = vperm.xlu1 %2165, %v4257_v9   ;;  %v381_v49 = vrot.slane %v380_v37, 1  ;;  %v388_v44 = vrot.slane %v387_v13, 1 }
 0x133   :  { %v2291_v34 = vpop.eup %2290  ;;  %v477_v50 = vrot.slane %v476_v45, 1  ;;  %v1052_v57 = vadd.f32 %v3031_v56, %v1020_v33  ;;  %v433_v18 = vrot.slane %v432_v3, 2  ;;  %v439_v4 = vadd.f32 %v438_v55, %v437_v27 }
 0x134   :  { %v2293_v30 = vpop.eup %2292  ;;  %v484_v61 = vrot.slane %v483_v47, 1  ;;  %2296 = vrcp.f32 %v2291_v34  ;;  %v997_v16 = vmul.f32 %v2291_v34, %v3087_v20  ;;  %v1095_v12 = vrot.slane %v1094_v2, 4 }
 0x135   :  { %v478_v62 = vadd.f32 %v477_v50, %v476_v45  ;;  %v1008_v60 = vmul.f32 %v2293_v30, %v3087_v20  ;;  %v3117_v10 = vpop.eup %2294  ;;  %v382_v56 = vadd.f32 %v381_v49, %v380_v37  ;;  %v1053_v50 = vrot.slane %v1052_v57, 4 }
 0x136   :  { %v485_v14 = vadd.f32 %v484_v61, %v483_v47  ;;  %v1021_v9 = vmul.f32 %v997_v16, %v4331_v41  ;;  %v1096_v43 = vadd.f32 %v1095_v12, %v1094_v2  ;;  %v1101_v28 = vadd.f32 %v3022_v35, %v997_v16 }
 0x137   :  { %v3121_v33 = vadd.f32 1e-30, %v478_v62  ;;  %v1116_v24 = vmul.f32 %v1008_v60, %v4330_v46  ;;  %v1190_v34 = vadd.f32 %v3034_v25, %v1008_v60  ;;  %v3127_v45 = vadd.f32 %v337_v63, %v336_v5 }
 0x138   :  { %v3125_v6 = vadd.f32 1e-30, %v485_v14  ;;  %v1097_v27 = vrot.slane %v1096_v43, 2  ;;  %v1102_v55 = vrot.slane %v1101_v28, 4  ;;  %v1059_v12 = vadd.f32 %v3038_v32, %v1021_v9 }
 0x139   :  { %2298 = vrcp.f32 %v3121_v33  ;;  %v1191_v47 = vrot.slane %v1190_v34, 4  ;;  %v389_v37 = vadd.f32 %v388_v44, %v387_v13  ;;  %v434_v2 = vadd.f32 %v433_v18, %v432_v3 }
 0x13a   :  { %v2297_v35 = vpop.eup %2296  ;;  %v440_v49 = vrot.slane %v439_v4, 2  ;;  %v1103_v30 = vadd.f32 %v1102_v55, %v1101_v28  ;;  %2300 = vrcp.f32 %v3125_v6  ;;  %v1148_v25 = vadd.f32 %v3048_v31, %v1116_v24 }
 0x13b   :  { %v1009_v46 = vmul.f32 %v2297_v35, %v3087_v20  ;;  %v1192_v61 = vadd.f32 %v1191_v47, %v1190_v34  ;;  %v3134_v16 = vadd.f32 1e-30, %v382_v56  ;;  %v1054_v5 = vadd.f32 %v1053_v50, %v1052_v57 }
 0x13c   :  { %v1098_v63 = vadd.f32 %v1097_v27, %v1096_v43  ;;  %v1104_v62 = vrot.slane %v1103_v30, 2  ;;  %v1060_v60 = vrot.slane %v1059_v12, 4  ;;  %v441_v18 = vadd.f32 %v440_v49, %v439_v4 }
 0x13d   :  { %v1117_v32 = vmul.f32 %v1009_v46, %v4331_v41  ;;  %v1193_v9 = vrot.slane %v1192_v61, 2  ;;  %v1197_v44 = vadd.f32 %v3043_v11, %v1009_v46  ;;  %v3138_v28 = vadd.f32 1e-30, %v389_v37 }
 0x13e   :  { %v1105_v13 = vadd.f32 %v1104_v62, %v1103_v30  ;;  %v435_v3 = vrot.slane %v434_v2, 1  ;;  %v1149_v31 = vrot.slane %v1148_v25, 4  ;;  %v3144_v43 = vadd.f32 %v344_v52, %v3093_v17 }
 0x13f   :  { %v3140_v20 = vpop.eup %2298  ;;  %v1155_v24 = vadd.f32 %v3061_v23, %v1117_v32  ;;  %v1194_v14 = vadd.f32 %v1193_v9, %v1192_v61  ;;  %v1198_v57 = vrot.slane %v1197_v44, 4  ;;  %v1055_v56 = vrot.slane %v1054_v5, 2 }
 0x140   :  { %v1099_v41 = vrot.slane %v1098_v63, 1  ;;  %v649_v11 = vmul.f32 %v3140_v20, %v3121_v33  ;;  %v3148_v4 = vpop.eup %2300  ;;  %v1061_v34 = vadd.f32 %v1060_v60, %v1059_v12  ;;  %v1106_v50 = vrot.slane %v1105_v13, 1 }
 0x141   :  { %v1156_v27 = vrot.slane %v1155_v24, 4  ;;  %v1199_v55 = vadd.f32 %v1198_v57, %v1197_v44  ;;  %2302 = vrcp.f32 %v3134_v16  ;;  %v1195_v47 = vrot.slane %v1194_v14, 1 }
 0x142   :  { %v442_v23 = vrot.slane %v441_v18, 1  ;;  %v650_v35 = vsub.f32 1.0, %v649_v11  ;;  %2304 = vrcp.f32 %v3138_v28  ;;  %v1150_v17 = vadd.f32 %v1149_v31, %v1148_v25 }
 0x143   :  { %v1200_v52 = vrot.slane %v1199_v55, 2  ;;  %v436_v37 = vadd.f32 %v435_v3, %v434_v2  ;;  %v3152_v49 = vadd.f32 %v1055_v56, %v1054_v5  ;;  %v1100_v30 = vadd.f32 %v1099_v41, %v1098_v63 }
 0x144   :  { %v651_v46 = vmul.f32 %v3140_v20, %v650_v35  ;;  %v664_v12 = vmul.f32 %v3148_v4, %v3125_v6  ;;  %v1062_v61 = vrot.slane %v1061_v34, 2  ;;  %v1107_v62 = vadd.f32 %v1106_v50, %v1105_v13 }
 0x145   :  { %v1157_v60 = vadd.f32 %v1156_v27, %v1155_v24  ;;  %v1201_v32 = vadd.f32 %v1200_v52, %v1199_v55  ;;  %v1196_v9 = vadd.f32 %v1195_v47, %v1194_v14  ;;  %v443_v44 = vadd.f32 %v442_v23, %v441_v18 }
 0x146   :  { %vm653_vm0 = vweird.f32 %v3121_v33  ;;  %v665_v57 = vsub.f32 1.0, %v664_v12  ;;  %v1151_v25 = vrot.slane %v1150_v17, 2  ;;  %v652_v2 = vadd.f32 %v3140_v20, %v651_v46 }
 0x147   :  { %v1202_v31 = vrot.slane %v1201_v32, 1  ;;  %vm654_vm1 = vweird.f32 %v3140_v20  ;;  %v3160_v5 = vpop.eup %2302  ;;  %v3162_v63 = vadd.f32 1e-30, %v1100_v30  ;;  %v657_v3 = vand.u32 2147483647, %v3121_v33 }
 0x148   :  { %v659_v13 = vand.u32 2147483648, %v3121_v33  ;;  %v666_v24 = vmul.f32 %v3148_v4, %v665_v57  ;;  %v3167_v18 = vpop.eup %2304  ;;  %v3169_v14 = vadd.f32 %v1062_v61, %v1061_v34  ;;  %v1158_v56 = vrot.slane %v1157_v60, 2  ;;  %vm3178_vm3 = vmor %vm653_vm0, %vm654_vm1 }
 0x149   :  { %v3171_v41 = vadd.f32 1e-30, %v1107_v62  ;;  %vm669_vm2 = vweird.f32 %v3148_v4  ;;  %v3174_v11 = vadd.f32 1e-30, %v1196_v9  ;;  %vm668_vm4 = vweird.f32 %v3125_v6 }
 0x14a   :  { %v667_v27 = vadd.f32 %v3148_v4, %v666_v24  ;;  %v674_v34 = vand.u32 2147483648, %v3125_v6  ;;  %v1203_v55 = vadd.f32 %v1202_v31, %v1201_v32  ;;  %v656_v47 = vsel %vm3178_vm3, %v3140_v20, %v652_v2  ;;  %vm670_vm6 = vmor %vm668_vm4, %vm669_vm2 }
 0x14b   :  { %v672_v23 = vand.u32 2147483647, %v3125_v6  ;;  %v1307_v33 = vmul.f32 %v3108_v22, %v3074_v42  ;;  %v3191_v35 = vadd.f32 %v1151_v25, %v1150_v17  ;;  %2306 = vrcp.f32 %v3162_v63 }
 0x14c   :  { %vm658_vm5 = vcmp.eq.f32.partialorder %v657_v3, 8.507059e+37  ;;  %v660_v52 = vor.u32 1.1754944e-38, %v659_v13  ;;  %v3194_v30 = vadd.f32 %v1158_v56, %v1157_v60  ;;  %2308 = vrcp.f32 %v3171_v41 }
 0x14d   :  { %v671_v46 = vsel %vm670_vm6, %v3148_v4, %v667_v27  ;;  %v1308_v12 = vsub.f32 1.0, %v1307_v33  ;;  %2310 = vrcp.f32 %v3174_v11  ;;  %v675_v20 = vor.u32 1.1754944e-38, %v674_v34 }
 0x14e   :  { %v661_v6 = vsel %vm658_vm5, %v660_v52, %v656_v47  ;;  %v1322_v17 = vmul.f32 %v3117_v10, %v3084_v40  ;;  %v3201_v61 = vadd.f32 1e-30, %v1203_v55  ;;  %vm673_vm7 = vcmp.eq.f32.partialorder %v672_v23, 8.507059e+37  ;;  %v4352_v55 = vld [vmem:[#allocation6_spill] sm:$0xff]  ;;  %v4355_v52 = vld [vmem:[#allocation24_spill] sm:$0xff] }
 0x14f   :  { %v1309_v62 = vmul.f32 %v3108_v22, %v1308_v12  ;;  %v1315_v60 = vand.u32 2147483647, %v3074_v42  ;;  %v676_v32 = vsel %vm673_vm7, %v675_v20, %v671_v46  ;;  %vm1312_vm8 = vweird.f32 %v3108_v22  ;;  %v4357_v20 = vld [vmem:[#allocation14_spill] sm:$0xff] }
 0x150   :  { %v1317_v4 = vand.u32 2147483648, %v3074_v42  ;;  %v1323_v9 = vsub.f32 1.0, %v1322_v17  ;;  %v3207_v57 = vmul.f32 %v661_v6, %v436_v37  ;;  %v4347_v25 = vrot.slane %v3070_v58, 1  ;;  %v4358_v17 = vld [vmem:[#allocation16_spill] sm:$0xff] }
 0x151   :  { %v1310_v2 = vadd.f32 %v3108_v22, %v1309_v62  ;;  %v1330_v3 = vand.u32 2147483647, %v3084_v40  ;;  %v3214_v13 = vpop.eup %2306  ;;  %v4348_v24 = vrot.slane %v3080_v51, 1  ;;  %vm1311_vm9 = vweird.f32 %v3074_v42 }
 0x152   :  { %v1126_v31 = vadd.f32 %v4347_v25, %v3070_v58  ;;  %v1324_v37 = vmul.f32 %v3117_v10, %v1323_v9  ;;  %v1332_v50 = vand.u32 2147483648, %v3084_v40  ;;  %v3224_v27 = vpop.eup %2308  ;;  %2312 = vrcp.f32 %v3201_v61  ;;  %vm3231_vm10 = vmor %vm1311_vm9, %vm1312_vm8 }
 0x153   :  { %v3219_v56 = vadd.f32 %v4348_v24, %v3080_v51  ;;  %v3227_v58 = vmul.f32 %v676_v32, %v443_v44  ;;  %vm1316_vm11 = vcmp.eq.f32.partialorder %v1315_v60, 8.507059e+37  ;;  %v4351_v51 = vld [vmem:[#allocation10_spill] sm:$0xff]  ;;  %v3237_v47 = vpop.eup %2310  ;;  %v1314_v23 = vsel %vm3231_vm10, %v3108_v22, %v1310_v2  ;;  %v4359_v32 = vld [vmem:[#allocation9_spill] sm:$0xff] }
 0x154   :  { %v589_v42 = vmul.f32 %v4352_v55, %v4351_v51  ;;  %v1318_v33 = vor.u32 1.1754944e-38, %v1317_v4  ;;  %vm1326_vm12 = vweird.f32 %v3084_v40  ;;  %vm1327_vm13 = vweird.f32 %v3117_v10 }
 0x155   :  { %vm3244_vm14 = vcmp.eq.f32.partialorder %v1330_v3, 8.507059e+37  ;;  %v4356_v46 = vrot.slane %v4355_v52, 1  ;;  %v604_v62 = vmul.f32 %v4358_v17, %v4357_v20  ;;  %v1325_v60 = vadd.f32 %v3117_v10, %v1324_v37  ;;  %vm3279_vm0 = vmor %vm1326_vm12, %vm1327_vm13 }
 0x156   :  { %v590_v6 = vsub.f32 1.0, %v589_v42  ;;  %v1333_v22 = vor.u32 1.1754944e-38, %v1332_v50  ;;  %v4360_v4 = vrot.slane %v4359_v32, 1  ;;  %v4361_v25 = vrot.slane %v2930_v54, 1 }
 0x157   :  { %v408_v12 = vadd.f32 %v4356_v46, %v4355_v52  ;;  %v1319_v3 = vsel %vm1316_vm11, %v1318_v33, %v1314_v23  ;;  %v4362_v24 = vrot.slane %v2932_v36, 1  ;;  %v605_v52 = vsub.f32 1.0, %v604_v62 }
 0x158   :  { %v415_v9 = vadd.f32 %v4360_v4, %v4359_v32  ;;  %v3260_v2 = vadd.f32 %v4361_v25, %v2930_v54  ;;  %v591_v42 = vmul.f32 %v4352_v55, %v590_v6  ;;  %vm594_vm15 = vweird.f32 %v4352_v55  ;;  %v3273_v54 = vpop.eup %2312 }
 0x159   :  { %v3265_v34 = vadd.f32 %v4362_v24, %v2932_v36  ;;  %v597_v37 = vand.u32 2147483647, %v4351_v51  ;;  %v599_v50 = vand.u32 2147483648, %v4351_v51  ;;  %v619_v46 = vmul.f32 %v2982_v8, %v2935_v7 }
 0x15a   :  { %v592_v23 = vadd.f32 %v4352_v55, %v591_v42  ;;  %vm593_vm1 = vweird.f32 %v4351_v51  ;;  %v606_v33 = vmul.f32 %v4358_v17, %v605_v52  ;;  %vm609_vm2 = vweird.f32 %v4358_v17 }
 0x15b   :  { %v3287_v6 = vmul.f32 %v1319_v3, %v1126_v31  ;;  %v1329_v62 = vsel %vm3279_vm0, %v3117_v10, %v1325_v60  ;;  %v614_v40 = vand.u32 2147483648, %v4357_v20  ;;  %v620_v32 = vsub.f32 1.0, %v619_v46  ;;  %vm3293_vm3 = vmor %vm593_vm1, %vm594_vm15  ;;  %v3399_v3 = vpop.permute.xlu1 %701 }
 0x15c   :  { %v607_v25 = vadd.f32 %v4358_v17, %v606_v33  ;;  %vm608_vm4 = vweird.f32 %v4357_v20  ;;  %v612_v51 = vand.u32 2147483647, %v4357_v20  ;;  %v634_v31 = vmul.f32 %v2988_v48, %v2942_v29 }
 0x15d   :  { %v596_v10 = vsel %vm3293_vm3, %v4352_v55, %v592_v23  ;;  %vm598_vm5 = vcmp.eq.f32.partialorder %v597_v37, 8.507059e+37  ;;  %v600_v60 = vor.u32 1.1754944e-38, %v599_v50  ;;  %vm3305_vm6 = vmor %vm608_vm4, %vm609_vm2  ;;  %v621_v24 = vmul.f32 %v2982_v8, %v620_v32 }
 0x15e   :  { %v1334_v42 = vsel %vm3244_vm14, %v1333_v22, %v1329_v62  ;;  %v611_v20 = vsel %vm3305_vm6, %v4358_v17, %v607_v25  ;;  %vm624_vm7 = vweird.f32 %v2982_v8  ;;  %v635_v52 = vsub.f32 1.0, %v634_v31 }
 0x15f   :  { %v615_v46 = vor.u32 1.1754944e-38, %v614_v40  ;;  %v622_v55 = vadd.f32 %v2982_v8, %v621_v24  ;;  %v627_v37 = vand.u32 2147483647, %v2935_v7  ;;  %v629_v50 = vand.u32 2147483648, %v2935_v7 }
 0x160   :  { %v601_v36 = vsel %vm598_vm5, %v600_v60, %v596_v10  ;;  %vm613_vm8 = vcmp.eq.f32.partialorder %v612_v51, 8.507059e+37  ;;  %vm623_vm9 = vweird.f32 %v2935_v7  ;;  %v636_v44 = vmul.f32 %v2988_v48, %v635_v52 }
 0x161   :  { %vm688_vm10 = vcmask 1041409   ;;  %v3322_v22 = vmul.f32 %v1334_v42, %v3219_v56  ;;  %v616_v17 = vsel %vm613_vm8, %v615_v46, %v611_v20  ;;  %vm3324_vm11 = vmor %vm623_vm9, %vm624_vm7  ;;  %vm638_vm12 = vweird.f32 %v2942_v29 }
 0x162   :  { %v642_v33 = vand.u32 2147483647, %v2942_v29  ;;  %v626_v62 = vsel %vm3324_vm11, %v2982_v8, %v622_v55  ;;  %v637_v7 = vadd.f32 %v2988_v48, %v636_v44  ;;  %vm639_vm13 = vweird.f32 %v2988_v48 }
 0x163   :  { %v1337_v56 = vmul.f32 %v3019_v21, %v2986_v15  ;;  %vm690_vm14 = vcmask 1042434   ;;  %v602_v40 = vmul.f32 %v601_v36, %v408_v12  ;;  %vm628_vm15 = vcmp.eq.f32.partialorder %v627_v37, 8.507059e+37  ;;  %vm3346_vm0 = vmor %vm638_vm12, %vm639_vm13 }
 0x164   :  { %v630_v32 = vor.u32 1.1754944e-38, %v629_v50  ;;  %v644_v4 = vand.u32 2147483648, %v2942_v29  ;;  %v3338_v25 = vmul.f32 %v616_v17, %v415_v9  ;;  %v4371_v51 = vrot.slane %v2976_v38, 1 }
 0x165   :  { %v1153_v8 = vrot.slane %v3191_v35, 1  ;;  %v1338_v10 = vsub.f32 1.0, %v1337_v56  ;;  %vm3350_vm1 = vcmp.eq.f32.partialorder %v642_v33, 8.507059e+37  ;;  %v4376_v9 = vrot.slane %v2984_v59, 1 }
 0x166   :  { %v1140_v31 = vadd.f32 %v4371_v51, %v2976_v38  ;;  %v631_v60 = vsel %vm628_vm15, %v630_v32, %v626_v62  ;;  %v1352_v38 = vmul.f32 %v3025_v53, %v2990_v1  ;;  %v641_v42 = vsel %vm3346_vm0, %v2988_v48, %v637_v7  ;;  %v4387_v32 = vld [vmem:[#allocation28_spill] sm:$0xff] }
 0x167   :  { %v1147_v24 = vadd.f32 %v4376_v9, %v2984_v59  ;;  %v1339_v29 = vmul.f32 %v3019_v21, %v1338_v10  ;;  %vm1342_vm2 = vweird.f32 %v3019_v21  ;;  %v1347_v20 = vand.u32 2147483648, %v2986_v15 }
 0x168   :  { %v645_v52 = vor.u32 1.1754944e-38, %v644_v4  ;;  %v1160_v46 = vrot.slane %v3194_v30, 1  ;;  %v1345_v55 = vand.u32 2147483647, %v2986_v15  ;;  %v1353_v37 = vsub.f32 1.0, %v1352_v38 }
 0x169   :  { %v632_v59 = vmul.f32 %v631_v60, %v3260_v2  ;;  %v1154_v50 = vadd.f32 %v1153_v8, %v3191_v35  ;;  %v1340_v36 = vadd.f32 %v3019_v21, %v1339_v29  ;;  %vm1341_vm3 = vweird.f32 %v2986_v15 }
 0x16a   :  { %vm1402_vm4 = vcmask 1044484   ;;  %v646_v48 = vsel %vm3350_vm1, %v645_v52, %v641_v42  ;;  %vm1343_vm5 = vmor %vm1341_vm3, %vm1342_vm2  ;;  %v1354_v44 = vmul.f32 %v3025_v53, %v1353_v37  ;;  %vm1357_vm6 = vweird.f32 %v3025_v53 }
 0x16b   :  { %v1367_v17 = vmul.f32 %v3237_v47, %v3174_v11  ;;  %v1344_v2 = vsel %vm1343_vm5, %v3019_v21, %v1340_v36  ;;  %v1348_v23 = vor.u32 1.1754944e-38, %v1347_v20  ;;  %v1360_v35 = vand.u32 2147483647, %v2990_v1 }
 0x16c   :  { %v1362_v33 = vand.u32 2147483648, %v2990_v1  ;;  %vm1346_vm7 = vcmp.eq.f32.partialorder %v1345_v55, 8.507059e+37  ;;  %v1355_v15 = vadd.f32 %v3025_v53, %v1354_v44  ;;  %vm1356_vm8 = vweird.f32 %v2990_v1  ;;  %v4383_v44 = vld [vmem:[#allocation22_spill] sm:$0xff] }
 0x16d   :  { %v1368_v62 = vsub.f32 1.0, %v1367_v17  ;;  %v710_v7 = vsel %vm688_vm10, %v632_v59, %v602_v40  ;;  %v1349_v56 = vsel %vm1346_vm7, %v1348_v23, %v1344_v2  ;;  %vm3383_vm9 = vmor %vm1356_vm8, %vm1357_vm6  ;;  %v1375_v21 = vand.u32 2147483647, %v3174_v11  ;;  %v4385_v17 = vld [vmem:[#allocation23_spill] sm:$0xff]  ;;  %v4386_v2 = vld [vmem:[#allocation25_spill] sm:$0xff] }
 0x16e   :  { %v1377_v4 = vand.u32 2147483648, %v3174_v11  ;;  %v1359_v51 = vsel %vm3383_vm9, %v3025_v53, %v1355_v15  ;;  %vm1372_vm11 = vweird.f32 %v3237_v47  ;;  %v1382_v1 = vmul.f32 %v3273_v54, %v3201_v61 }
 0x16f   :  { %v1369_v8 = vmul.f32 %v3237_v47, %v1368_v62  ;;  %vm1404_vm12 = vcmask 1045509   ;;  %v647_v40 = vmul.f32 %v646_v48, %v3265_v34  ;;  %v711_v10 = vsel %vm690_vm14, %v3207_v57, %v710_v7  ;;  %v4381_v48 = vld [vmem:[#allocation19_spill] sm:$0xff] }
 0x170   :  { %vm1361_vm13 = vcmp.eq.f32.partialorder %v1360_v35, 8.507059e+37  ;;  %v1363_v60 = vor.u32 1.1754944e-38, %v1362_v33  ;;  %v1350_v12 = vmul.f32 %v1349_v56, %v1140_v31  ;;  %vm1371_vm15 = vweird.f32 %v3174_v11 }
 0x171   :  { %v1370_v53 = vadd.f32 %v3237_v47, %v1369_v8  ;;  %v1383_v9 = vsub.f32 1.0, %v1382_v1  ;;  %vm1373_vm0 = vmor %vm1371_vm15, %vm1372_vm11  ;;  %vm1376_vm1 = vcmp.eq.f32.partialorder %v1375_v21, 8.507059e+37  ;;  %v1378_v42 = vor.u32 1.1754944e-38, %v1377_v4  ;;  %v4391_v8 = vld [vmem:[#allocation13_spill] sm:$0xff] }
 0x172   :  { %v1364_v38 = vsel %vm1361_vm13, %v1363_v60, %v1359_v51  ;;  %vm1387_vm2 = vweird.f32 %v3273_v54  ;;  %v1390_v29 = vand.u32 2147483647, %v3201_v61  ;;  %v1392_v20 = vand.u32 2147483648, %v3201_v61  ;;  %v4390_v51 = vld [vmem:[#allocation26_spill] sm:$0xff] }
 0x173   :  { %v1374_v34 = vsel %vm1373_vm0, %v3237_v47, %v1370_v53  ;;  %v1384_v57 = vmul.f32 %v3273_v54, %v1383_v9  ;;  %v712_v31 = vsel %vm688_vm10, %v647_v40, %v3338_v25  ;;  %v3411_v11 = vmul.f32 %v711_v10, %v3399_v3  ;;  %v4392_v53 = vld [vmem:[#allocation18_spill] sm:$0xff] }
 0x174   :  { %v1161_v52 = vadd.f32 %v1160_v46, %v3194_v30  ;;  %v1379_v55 = vsel %vm1376_vm1, %v1378_v42, %v1374_v34  ;;  %v3416_v37 = vsel %vm690_vm14, %v3227_v58, %v712_v31  ;;  %v1365_v47 = vmul.f32 %v1364_v38, %v1147_v24 }
 0x175   :  { %v1385_v59 = vadd.f32 %v3273_v54, %v1384_v57  ;;  %vm1386_vm3 = vweird.f32 %v3201_v61  ;;  %v1418_v25 = vsel %vm1402_vm4, %v1350_v12, %v3287_v6  ;;  %v4382_v30 = vrot.slane %v4381_v48, 1 }
 0x176   :  { %vm3420_vm5 = vmor %vm1386_vm3, %vm1387_vm2  ;;  %v4384_v58 = vrot.slane %v4383_v44, 1  ;;  %v493_v61 = vmul.f32 %v4386_v2, %v4385_v17  ;;  %v1380_v23 = vmul.f32 %v1379_v55, %v1154_v50  ;;  %vm1391_vm6 = vcmp.eq.f32.partialorder %v1390_v29, 8.507059e+37  ;;  %v4397_v55 = vld [vmem:[#allocation29_spill] sm:$0xff] }
 0x177   :  { %v3429_v46 = vadd.f32 %v4382_v30, %v4381_v48  ;;  %v1389_v35 = vsel %vm3420_vm5, %v3273_v54, %v1385_v59  ;;  %v1393_v6 = vor.u32 1.1754944e-38, %v1392_v20  ;;  %v339_v33 = vrot.slane %v3127_v45, 1 }
 0x178   :  { %v3434_v24 = vadd.f32 %v4384_v58, %v4383_v44  ;;  %v346_v15 = vrot.slane %v3144_v43, 1  ;;  %v494_v62 = vsub.f32 1.0, %v493_v61  ;;  %v501_v7 = vand.u32 2147483647, %v4385_v17 }
 0x179   :  { %v3446_v56 = vsel %vm1402_vm4, %v1365_v47, %v3322_v22  ;;  %v4388_v50 = vrot.slane %v4387_v32, 1  ;;  %v4389_v54 = vrot.slane %v2896_v26, 1  ;;  %v508_v1 = vmul.f32 %v4391_v8, %v4390_v51  ;;  %v4398_v47 = vld [vmem:[#allocation31_spill] sm:$0xff] }
 0x17a   :  { %v1394_v40 = vsel %vm1391_vm6, %v1393_v6, %v1389_v35  ;;  %v495_v10 = vmul.f32 %v4386_v2, %v494_v62  ;;  %vm497_vm7 = vweird.f32 %v4385_v17  ;;  %vm498_vm8 = vweird.f32 %v4386_v2 }
 0x17b   :  { %v3451_v21 = vadd.f32 %v4388_v50, %v4387_v32  ;;  %v3456_v4 = vadd.f32 %v4389_v54, %v2896_v26  ;;  %v3464_v22 = vsel %vm1404_vm12, %v1380_v23, %v1418_v25  ;;  %v503_v60 = vand.u32 2147483648, %v4385_v17  ;;  %vm3480_vm11 = vmor %vm497_vm7, %vm498_vm8 }
 0x17c   :  { %v509_v12 = vsub.f32 1.0, %v508_v1  ;;  %v523_v26 = vmul.f32 %v4392_v53, %v2912_v0  ;;  %v3470_v9 = vadd.f32 %v339_v33, %v3127_v45  ;;  %v3473_v38 = vadd.f32 %v346_v15, %v3144_v43 }
 0x17d   :  { %v496_v42 = vadd.f32 %v4386_v2, %v495_v10  ;;  %vm3476_vm9 = vcmp.eq.f32.partialorder %v501_v7, 8.507059e+37  ;;  %v1395_v57 = vmul.f32 %v1394_v40, %v1161_v52  ;;  %v516_v31 = vand.u32 2147483647, %v4390_v51 }
 0x17e   :  { %v510_v20 = vmul.f32 %v4391_v8, %v509_v12  ;;  %v524_v45 = vsub.f32 1.0, %v523_v26  ;;  %vm512_vm13 = vweird.f32 %v4390_v51  ;;  %vm513_vm15 = vweird.f32 %v4391_v8 }
 0x17f   :  { %v500_v43 = vsel %vm3480_vm11, %v4386_v2, %v496_v42  ;;  %v538_v52 = vmul.f32 %v4398_v47, %v4397_v55  ;;  %v504_v59 = vor.u32 1.1754944e-38, %v503_v60  ;;  %vm528_vm0 = vweird.f32 %v4392_v53  ;;  %vm3516_vm6 = vmor %vm512_vm13, %vm513_vm15 }
 0x180   :  { %v525_v36 = vmul.f32 %v4392_v53, %v524_v45  ;;  %v533_v25 = vand.u32 2147483648, %v2912_v0  ;;  %v511_v48 = vadd.f32 %v4391_v8, %v510_v20  ;;  %v518_v30 = vand.u32 2147483648, %v4390_v51 }
 0x181   :  { %v531_v44 = vand.u32 2147483647, %v2912_v0  ;;  %v539_v58 = vsub.f32 1.0, %v538_v52  ;;  %v505_v17 = vsel %vm3476_vm9, %v504_v59, %v500_v43  ;;  %vm3501_vm1 = vcmp.eq.f32.partialorder %v516_v31, 8.507059e+37 }
 0x182   :  { %v526_v61 = vadd.f32 %v4392_v53, %v525_v36  ;;  %vm527_vm2 = vweird.f32 %v2912_v0  ;;  %vm543_vm5 = vweird.f32 %v4398_v47  ;;  %v548_v35 = vand.u32 2147483648, %v4397_v55 }
 0x183   :  { %vm529_vm3 = vmor %vm527_vm2, %vm528_vm0  ;;  %v540_v23 = vmul.f32 %v4398_v47, %v539_v58  ;;  %v553_v6 = vmul.f32 %v3160_v5, %v3134_v16  ;;  %v534_v15 = vor.u32 1.1754944e-38, %v533_v25  ;;  %vm542_vm7 = vweird.f32 %v4397_v55  ;;  %v4405_v25 = vld [vmem:[#allocation12_spill] sm:$0xff] }
 0x184   :  { %v530_v0 = vsel %vm529_vm3, %v4392_v53, %v526_v61  ;;  %v546_v62 = vand.u32 2147483647, %v4397_v55  ;;  %v515_v7 = vsel %vm3516_vm6, %v4391_v8, %v511_v48  ;;  %vm532_vm8 = vcmp.eq.f32.partialorder %v531_v44, 8.507059e+37  ;;  %vm544_vm9 = vmor %vm542_vm7, %vm543_vm5 }
 0x185   :  { %v541_v32 = vadd.f32 %v4398_v47, %v540_v23  ;;  %v554_v50 = vsub.f32 1.0, %v553_v6  ;;  %v535_v54 = vsel %vm532_vm8, %v534_v15, %v530_v0  ;;  %v549_v51 = vor.u32 1.1754944e-38, %v548_v35  ;;  %v4407_v23 = vld [vmem:[#allocation30_spill] sm:$0xff]  ;;  %v4411_v0 = vld [vmem:[#allocation20_spill] sm:$0xff]  ;;  %v4412_v15 = vld [vmem:[#allocation17_spill] sm:$0xff] }
 0x186   :  { %v561_v1 = vand.u32 2147483647, %v3134_v16  ;;  %v563_v40 = vand.u32 2147483648, %v3134_v16  ;;  %vm558_vm11 = vweird.f32 %v3160_v5  ;;  %v568_v8 = vmul.f32 %v3167_v18, %v3138_v28 }
 0x187   :  { %v545_v10 = vsel %vm544_vm9, %v4398_v47, %v541_v32  ;;  %v555_v60 = vmul.f32 %v3160_v5, %v554_v50  ;;  %v506_v12 = vmul.f32 %v505_v17, %v3429_v46  ;;  %v519_v53 = vor.u32 1.1754944e-38, %v518_v30 }
 0x188   :  { %vm547_vm13 = vcmp.eq.f32.partialorder %v546_v62, 8.507059e+37  ;;  %vm557_vm15 = vweird.f32 %v3134_v16  ;;  %v536_v26 = vmul.f32 %v535_v54, %v3451_v21  ;;  %v569_v29 = vsub.f32 1.0, %v568_v8 }
 0x189   :  { %v550_v42 = vsel %vm547_vm13, %v549_v51, %v545_v10  ;;  %v556_v34 = vadd.f32 %v3160_v5, %v555_v60  ;;  %v520_v20 = vsel %vm3501_vm1, %v519_v53, %v515_v7  ;;  %vm559_vm0 = vmor %vm557_vm15, %vm558_vm11  ;;  %vm562_vm2 = vcmp.eq.f32.partialorder %v561_v1, 8.507059e+37  ;;  %v4413_v1 = vld [vmem:[#allocation7_spill] sm:$0xff]  ;;  %v680_v53 = vpop.permute.xlu0 %679 }
 0x18a   :  { %v564_v31 = vor.u32 1.1754944e-38, %v563_v40  ;;  %v576_v45 = vand.u32 2147483647, %v3138_v28  ;;  %v570_v43 = vmul.f32 %v3167_v18, %v569_v29  ;;  %vm573_vm3 = vweird.f32 %v3167_v18  ;;  %v4414_v40 = vld [vmem:[#allocation8_spill] sm:$0xff]  ;;  %v4419_v29 = vld [vmem:[#allocation33_spill] sm:$0xff] }
 0x18b   :  { %v560_v46 = vsel %vm559_vm0, %v3160_v5, %v556_v34  ;;  %v578_v16 = vand.u32 2147483648, %v3138_v28  ;;  %v3547_v21 = vsel %vm1404_vm12, %v1395_v57, %v3446_v56  ;;  %v3551_v55 = vmul.f32 %v3464_v22, %v3399_v3 }
 0x18c   :  { %v551_v47 = vmul.f32 %v550_v42, %v3456_v4  ;;  %v565_v52 = vsel %vm562_vm2, %v564_v31, %v560_v46  ;;  %v521_v59 = vmul.f32 %v520_v20, %v3434_v24  ;;  %v571_v5 = vadd.f32 %v3167_v18, %v570_v43  ;;  %v4406_v24 = vld [vmem:[#allocation21_spill] sm:$0xff]  ;;  %v4420_v20 = vld [vmem:[#allocation11_spill] sm:$0xff] }
 0x18d   :  { %vm572_vm1 = vweird.f32 %v3138_v28  ;;  %v689_v36 = vsel %vm688_vm10, %v536_v26, %v506_v12  ;;  %vm577_vm6 = vcmp.eq.f32.partialorder %v576_v45, 8.507059e+37  ;;  %v4403_v56 = vrot.slane %v3052_v19, 1 }
 0x18e   :  { %vm574_vm5 = vmor %vm572_vm1, %vm573_vm3  ;;  %v4404_v22 = vrot.slane %v3055_v39, 1  ;;  %v1211_v48 = vmul.f32 %v4406_v24, %v4405_v25  ;;  %v566_v30 = vmul.f32 %v565_v52, %v3470_v9  ;;  %v579_v44 = vor.u32 1.1754944e-38, %v578_v16  ;;  %v4409_v9 = vld [vmem:[#allocation32_spill] sm:$0xff] }
 0x18f   :  { %v3561_v57 = vadd.f32 %v4403_v56, %v3052_v19  ;;  %v575_v28 = vsel %vm574_vm5, %v3167_v18, %v571_v5  ;;  %v1057_v58 = vrot.slane %v3152_v49, 1  ;;  %v3574_v17 = vsel %vm688_vm10, %v551_v47, %v521_v59 }
 0x190   :  { %v3566_v4 = vadd.f32 %v4404_v22, %v3055_v39  ;;  %v1064_v19 = vrot.slane %v3169_v14, 1  ;;  %v1212_v2 = vsub.f32 1.0, %v1211_v48  ;;  %v1219_v61 = vand.u32 2147483647, %v4405_v25 }
 0x191   :  { %v580_v39 = vsel %vm577_vm6, %v579_v44, %v575_v28  ;;  %v4408_v35 = vrot.slane %v4407_v23, 1  ;;  %v4410_v18 = vrot.slane %v4409_v9, 1  ;;  %v1226_v62 = vmul.f32 %v4412_v15, %v4411_v0 }
 0x192   :  { %v1213_v7 = vmul.f32 %v4406_v24, %v1212_v2  ;;  %vm1215_vm7 = vweird.f32 %v4405_v25  ;;  %vm1216_vm8 = vweird.f32 %v4406_v24  ;;  %v1221_v32 = vand.u32 2147483648, %v4405_v25 }
 0x193   :  { %v3581_v6 = vadd.f32 %v4408_v35, %v4407_v23  ;;  %v3586_v33 = vadd.f32 %v4410_v18, %v4409_v9  ;;  %v3595_v50 = vsel %vm690_vm14, %v566_v30, %v689_v36  ;;  %v3598_v54 = vadd.f32 %v1057_v58, %v3152_v49  ;;  %vm3618_vm11 = vmor %vm1215_vm7, %vm1216_vm8 }
 0x194   :  { %v1227_v51 = vsub.f32 1.0, %v1226_v62  ;;  %v1241_v10 = vmul.f32 %v4414_v40, %v4413_v1  ;;  %v3603_v60 = vmul.f32 %v580_v39, %v3473_v38  ;;  %v3606_v8 = vadd.f32 %v1064_v19, %v3169_v14 }
 0x195   :  { %v1214_v12 = vadd.f32 %v4406_v24, %v1213_v7  ;;  %vm3609_vm9 = vcmp.eq.f32.partialorder %v1219_v61, 8.507059e+37  ;;  %v1234_v49 = vand.u32 2147483647, %v4411_v0  ;;  %v1236_v42 = vand.u32 2147483648, %v4411_v0 }
 0x196   :  { %v1228_v26 = vmul.f32 %v4412_v15, %v1227_v51  ;;  %v1242_v34 = vsub.f32 1.0, %v1241_v10  ;;  %v1222_v14 = vor.u32 1.1754944e-38, %v1221_v32  ;;  %vm1230_vm13 = vweird.f32 %v4411_v0 }
 0x197   :  { %vm1231_vm15 = vweird.f32 %v4412_v15  ;;  %v1256_v31 = vmul.f32 %v4420_v20, %v4419_v29  ;;  %v1218_v45 = vsel %vm3618_vm11, %v4406_v24, %v1214_v12  ;;  %v1249_v16 = vand.u32 2147483647, %v4413_v1 }
 0x198   :  { %v1229_v46 = vadd.f32 %v4412_v15, %v1228_v26  ;;  %v1243_v43 = vmul.f32 %v4414_v40, %v1242_v34  ;;  %vm1245_vm0 = vweird.f32 %v4413_v1  ;;  %vm1246_vm2 = vweird.f32 %v4414_v40  ;;  %vm3648_vm1 = vmor %vm1230_vm13, %vm1231_vm15 }
 0x199   :  { %v1251_v47 = vand.u32 2147483648, %v4413_v1  ;;  %v1257_v52 = vsub.f32 1.0, %v1256_v31  ;;  %vm3635_vm3 = vcmp.eq.f32.partialorder %v1234_v49, 8.507059e+37  ;;  %v1237_v5 = vor.u32 1.1754944e-38, %v1236_v42  ;;  %vm3658_vm7 = vmor %vm1245_vm0, %vm1246_vm2 }
 0x19a   :  { %v1244_v36 = vadd.f32 %v4414_v40, %v1243_v43  ;;  %v1271_v56 = vmul.f32 %v3214_v13, %v3162_v63  ;;  %v1223_v22 = vsel %vm3609_vm9, %v1222_v14, %v1218_v45  ;;  %vm1260_vm5 = vweird.f32 %v4419_v29 }
 0x19b   :  { %v1258_v24 = vmul.f32 %v4420_v20, %v1257_v52  ;;  %vm1261_vm6 = vweird.f32 %v4420_v20  ;;  %v1233_v48 = vsel %vm3648_vm1, %v4412_v15, %v1229_v46  ;;  %vm1250_vm8 = vcmp.eq.f32.partialorder %v1249_v16, 8.507059e+37 }
 0x19c   :  { %v1266_v28 = vand.u32 2147483648, %v4419_v29  ;;  %v1272_v44 = vsub.f32 1.0, %v1271_v56  ;;  %v1248_v58 = vsel %vm3658_vm7, %v4414_v40, %v1244_v36  ;;  %v1252_v19 = vor.u32 1.1754944e-38, %v1251_v47  ;;  %vm3682_vm13 = vmor %vm1260_vm5, %vm1261_vm6 }
 0x19d   :  { %v1259_v2 = vadd.f32 %v4420_v20, %v1258_v24  ;;  %v1279_v61 = vand.u32 2147483647, %v3162_v63  ;;  %vm1276_vm9 = vweird.f32 %v3214_v13  ;;  %v1281_v23 = vand.u32 2147483648, %v3162_v63 }
 0x19e   :  { %v1273_v39 = vmul.f32 %v3214_v13, %v1272_v44  ;;  %v1286_v35 = vmul.f32 %v3224_v27, %v3171_v41  ;;  %v1224_v9 = vmul.f32 %v1223_v22, %v3561_v57  ;;  %v1238_v18 = vsel %vm3635_vm3, %v1237_v5, %v1233_v48 }
 0x19f   :  { %v1264_v0 = vand.u32 2147483647, %v4419_v29  ;;  %vm1275_vm11 = vweird.f32 %v3162_v63  ;;  %v1253_v15 = vsel %vm1250_vm8, %v1252_v19, %v1248_v58  ;;  %v1267_v7 = vor.u32 1.1754944e-38, %v1266_v28 }
 0x1a0   :  { %v1274_v32 = vadd.f32 %v3214_v13, %v1273_v39  ;;  %v1287_v57 = vsub.f32 1.0, %v1286_v35  ;;  %v1263_v51 = vsel %vm3682_vm13, %v4420_v20, %v1259_v2  ;;  %vm1277_vm15 = vmor %vm1275_vm11, %vm1276_vm9  ;;  %vm1280_vm0 = vcmp.eq.f32.partialorder %v1279_v61, 8.507059e+37 }
 0x1a1   :  { %v1282_v63 = vor.u32 1.1754944e-38, %v1281_v23  ;;  %v1296_v1 = vand.u32 2147483648, %v3171_v41  ;;  %vm1291_vm2 = vweird.f32 %v3224_v27  ;;  %v1294_v12 = vand.u32 2147483647, %v3171_v41 }
 0x1a2   :  { %v1278_v40 = vsel %vm1277_vm15, %v3214_v13, %v1274_v32  ;;  %v1288_v10 = vmul.f32 %v3224_v27, %v1287_v57  ;;  %v1239_v26 = vmul.f32 %v1238_v18, %v3566_v4  ;;  %v1254_v49 = vmul.f32 %v1253_v15, %v3581_v6 }
 0x1a3   :  { %vm1265_vm3 = vcmp.eq.f32.partialorder %v1264_v0, 8.507059e+37  ;;  %v1283_v42 = vsel %vm1280_vm0, %v1282_v63, %v1278_v40  ;;  %vm1290_vm1 = vweird.f32 %v3171_v41  ;;  %v1297_v13 = vor.u32 1.1754944e-38, %v1296_v1 }
 0x1a4   :  { %v1268_v34 = vsel %vm1265_vm3, %v1267_v7, %v1263_v51  ;;  %v1284_v38 = vmul.f32 %v1283_v42, %v3598_v54  ;;  %v1289_v14 = vadd.f32 %v3224_v27, %v1288_v10  ;;  %vm1292_vm5 = vmor %vm1290_vm1, %vm1291_vm2  ;;  %v1403_v29 = vsel %vm1402_vm4, %v1254_v49, %v1224_v9 }
 0x1a5   :  { %v696_v20 = vmul.f32 %v3595_v50, %v680_v53  ;;  %v693_v4 = vsel %vm690_vm14, %v3603_v60, %v3574_v17  ;;  %vm1295_vm6 = vcmp.eq.f32.partialorder %v1294_v12, 8.507059e+37  ;;  %v2394_v54 = vmov 7   ;;  %v3713_v50 = vld [vmem:[%s4187_s2] sm:$0x7]  ;;  %v1437_v12 = vpop.permute.xlu2 %1436  ;;  %s2396_s2 = smov [#allocation2]  }
 0x1a6   :  { %v1293_v6 = vsel %vm1292_vm5, %v3224_v27, %v1289_v14  ;;  %v1405_v31 = vsel %vm1404_vm12, %v1284_v38, %v1403_v29  ;;  %2166 = vset.pattern.permute.xlu2 %v2394_v54  ;;  %v717_v41 = vmul.f32 %v3416_v37, %v3399_v3  ;;  %v1269_v45 = vmul.f32 %v1268_v34, %v3586_v33  ;;  %s2124_s7 = sshll.u32 %s2396_s2, 4  ;;  %s2125_s7 = int_to_ptr.vmem [resolvable:$true] %s2124_s7 }
 0x1a7   :  { %v1298_v46 = vsel %vm1295_vm6, %v1297_v13, %v1293_v6  ;;  %v1410_v43 = vmul.f32 %v1405_v31, %v680_v53  ;;  %1963 = vperm.xlu2 %2166, %v3713_v50   ;;  %v1425_v27 = vmul.f32 %v3547_v21, %v3399_v3  ;;  %vm1428_vm7 = vcmask 1042432  }
 0x1a8   :  { %v1299_v17 = vmul.f32 %v1298_v46, %v3606_v8  ;;  %vm1452_vm8 = vcmask 1045504   ;;  %v1406_v37 = vsel %vm1402_vm4, %v1269_v45, %v1239_v26  ;;  %v697_v60 = vmul.f32 %v693_v4, %v680_v53 }
 0x1a9   :  { %v718_v33 = vadd.f32 %v3411_v11, %v696_v20  ;;  %v1426_v16 = vadd.f32 %v3551_v55, %v1410_v43 }
 0x1aa   :  { %v1407_v47 = vsel %vm1404_vm12, %v1299_v17, %v1406_v37  ;;  %v719_v8 = vadd.f32 %v717_v41, %v697_v60 }
 0x1ab   :  { %v1411_v52 = vmul.f32 %v1407_v47, %v680_v53  ;;  %v3724_v59 = vsel %vm1428_vm7, %v718_v33, %v1426_v16 }
 0x1ac   :  { %v1453_v3 = vsel %vm1452_vm8, %v3724_v59, -inf  ;;  %v1467_v21 = vsel %vm1452_vm8, %v3724_v59, inf }
 0x1ad   :  { %v1427_v5 = vadd.f32 %v1425_v27, %v1411_v52  ;;  %v1454_v36 = vrot.slane %v1453_v3, 4  ;;  %v1468_v56 = vrot.slane %v1467_v21, 4  ;;  %v3739_v14 = vpop.permute.xlu2 %1450 }
 0x1af   :  { %v3731_v11 = vsel %vm1428_vm7, %v719_v8, %v1427_v5  ;;  %v1455_v55 = vmax.f32 %v1453_v3, %v1454_v36  ;;  %v1469_v22 = vmin.f32 %v1467_v21, %v1468_v56 }
 0x1b0   :  { %v1460_v25 = vsel %vm1452_vm8, %v3731_v11, -inf  ;;  %v1474_v24 = vsel %vm1452_vm8, %v3731_v11, inf }
 0x1b1   :  { %v1456_v48 = vrot.slane %v1455_v55, 2  ;;  %v1461_v30 = vrot.slane %v1460_v25, 4  ;;  %v1470_v28 = vrot.slane %v1469_v22, 2  ;;  %v1475_v44 = vrot.slane %v1474_v24, 4 }
 0x1b3   :  { %v1457_v58 = vmax.f32 %v1455_v55, %v1456_v48  ;;  %v1462_v19 = vmax.f32 %v1460_v25, %v1461_v30  ;;  %v1471_v2 = vmin.f32 %v1469_v22, %v1470_v28  ;;  %v1476_v61 = vmin.f32 %v1474_v24, %v1475_v44 }
 0x1b5   :  { %v1458_v39 = vrot.slane %v1457_v58, 1  ;;  %v1463_v23 = vrot.slane %v1462_v19, 2  ;;  %v1472_v35 = vrot.slane %v1471_v2, 1  ;;  %v1477_v9 = vrot.slane %v1476_v61, 2 }
 0x1b7   :  { %v1459_v18 = vmax.f32 %v1457_v58, %v1458_v39  ;;  %v1464_v0 = vmax.f32 %v1462_v19, %v1463_v23  ;;  %v1473_v15 = vmin.f32 %v1471_v2, %v1472_v35  ;;  %v1478_v62 = vmin.f32 %v1476_v61, %v1477_v9 }
 0x1b9   :  { %v1465_v7 = vrot.slane %v1464_v0, 1  ;;  %v1479_v32 = vrot.slane %v1478_v62, 1  ;;  %v1481_v57 = vadd.f32 %v1473_v15, %v1459_v18 }
 0x1bb   :  { %v1466_v51 = vmax.f32 %v1464_v0, %v1465_v7  ;;  %v1480_v63 = vmin.f32 %v1478_v62, %v1479_v32  ;;  %v1483_v1 = vmul.f32 0.5, %v1481_v57 }
 0x1bd   :  { %v1482_v40 = vadd.f32 %v1480_v63, %v1466_v51  ;;  %v1485_v10 = vsub.f32 %v3724_v59, %v1483_v1 }
 0x1bf   :  { %v1484_v53 = vmul.f32 0.5, %v1482_v40  ;;  %v1487_v26 = vmul.f32 2.5, %v1485_v10 }
 0x1c1   :  { %v1486_v49 = vsub.f32 %v3731_v11, %v1484_v53  ;;  %v1489_v42 = vmul.f32 1.442695, %v1487_v26 }
 0x1c3   :  { %v1488_v34 = vmul.f32 2.5, %v1486_v49  ;;  %2314 = vpow2.f32 %v1489_v42 }
 0x1c5   :  { %v1491_v38 = vmul.f32 1.442695, %v1488_v34 }
 0x1c7   :  { %2316 = vpow2.f32 %v1491_v38 }
 0x1c9   :  { %v3741_v13 = vpop.eup %2314 }
 0x1ca   :  { %2318 = vrcp.f32 %v3741_v13  ;;  %v1495_v29 = vmul.f32 %v3741_v13, %v1437_v12  ;;  %v1499_v20 = vmul.f32 %v3741_v13, %v3739_v14 }
 0x1cc   :  { %v1555_v4 = vsel %vm1452_vm8, %v1495_v29, 0.0  ;;  %v1583_v54 = vsel %vm1452_vm8, %v1499_v20, 0.0  ;;  %v1507_v45 = vmul.f32 %v1495_v29, %v3724_v59  ;;  %v1511_v17 = vmul.f32 %v1499_v20, %v3724_v59 }
 0x1cd   :  { %v3748_v6 = vpop.eup %2316  ;;  %v1556_v31 = vrot.slane %v1555_v4, 4  ;;  %v1584_v37 = vrot.slane %v1583_v54, 4 }
 0x1ce   :  { %2320 = vrcp.f32 %v3748_v6  ;;  %v1496_v41 = vmul.f32 %v3748_v6, %v1437_v12  ;;  %v1500_v47 = vmul.f32 %v3748_v6, %v3739_v14  ;;  %v1513_v3 = vsel %vm1452_vm8, %v1507_v45, 0.0 }
 0x1cf   :  { %v1557_v46 = vadd.f32 %v1556_v31, %v1555_v4  ;;  %v1541_v55 = vsel %vm1452_vm8, %v1511_v17, 0.0  ;;  %v1585_v22 = vadd.f32 %v1584_v37, %v1583_v54  ;;  %v1514_v30 = vrot.slane %v1513_v3, 4 }
 0x1d0   :  { %v3754_v43 = vpop.eup %2318  ;;  %v1562_v27 = vsel %vm1452_vm8, %v1496_v41, 0.0  ;;  %v1508_v52 = vmul.f32 %v1496_v41, %v3731_v11  ;;  %v1512_v48 = vmul.f32 %v1500_v47, %v3731_v11  ;;  %v1542_v39 = vrot.slane %v1541_v55, 4 }
 0x1d1   :  { %v1501_v60 = vmul.f32 %v3754_v43, %v1437_v12  ;;  %v1558_v33 = vrot.slane %v1557_v46, 2  ;;  %v1563_v16 = vrot.slane %v1562_v27, 4  ;;  %v1586_v18 = vrot.slane %v1585_v22, 2 }
 0x1d2   :  { %v1520_v19 = vsel %vm1452_vm8, %v1508_v52, 0.0  ;;  %v1548_v7 = vsel %vm1452_vm8, %v1512_v48, 0.0  ;;  %v3776_v1 = vadd.f32 %v1514_v30, %v1513_v3  ;;  %v1505_v10 = vmul.f32 %v3754_v43, %v3739_v14 }
 0x1d3   :  { %v1559_v21 = vadd.f32 %v1558_v33, %v1557_v46  ;;  %v1564_v8 = vadd.f32 %v1563_v16, %v1562_v27  ;;  %v1597_v36 = vmul.f32 %v1501_v60, %v3724_v59  ;;  %v1645_v56 = vsel %vm1452_vm8, %v1501_v60, 0.0 }
 0x1d4   :  { %v3763_v5 = vpop.eup %2320  ;;  %v1646_v58 = vrot.slane %v1645_v56, 4  ;;  %v1521_v32 = vrot.slane %v1520_v19, 4  ;;  %v1549_v49 = vrot.slane %v1548_v7, 4  ;;  %v1587_v42 = vadd.f32 %v1586_v18, %v1585_v22 }
 0x1d5   :  { %v1502_v25 = vmul.f32 %v3763_v5, %v1437_v12  ;;  %v1565_v24 = vrot.slane %v1564_v8, 2  ;;  %v1560_v28 = vrot.slane %v1559_v21, 1  ;;  %v1603_v44 = vsel %vm1452_vm8, %v1597_v36, 0.0 }
 0x1d6   :  { %v1604_v23 = vrot.slane %v1603_v44, 4  ;;  %v1647_v35 = vadd.f32 %v1646_v58, %v1645_v56  ;;  %v1590_v12 = vsel %vm1452_vm8, %v1500_v47, 0.0  ;;  %v3781_v4 = vadd.f32 %v1521_v32, %v1520_v19 }
 0x1d7   :  { %v1566_v2 = vadd.f32 %v1565_v24, %v1564_v8  ;;  %v1598_v61 = vmul.f32 %v1502_v25, %v3731_v11  ;;  %v1652_v9 = vsel %vm1452_vm8, %v1502_v25, 0.0  ;;  %v1561_v57 = vadd.f32 %v1560_v28, %v1559_v21  ;;  %v1444_v24 = vpop.permute.xlu1 %1443 }
 0x1d8   :  { %v1653_v62 = vrot.slane %v1652_v9, 4  ;;  %v1648_v63 = vrot.slane %v1647_v35, 2  ;;  %v1605_v53 = vadd.f32 %v1604_v23, %v1603_v44  ;;  %v1591_v20 = vrot.slane %v1590_v12, 4 }
 0x1d9   :  { %v1567_v0 = vrot.slane %v1566_v2, 1  ;;  %v1610_v15 = vsel %vm1452_vm8, %v1598_v61, 0.0  ;;  %v3783_v31 = vadd.f32 1e-30, %v1561_v57  ;;  %v1506_v54 = vmul.f32 %v3763_v5, %v3739_v14 }
 0x1da   :  { %v1611_v51 = vrot.slane %v1610_v15, 4  ;;  %v1654_v40 = vadd.f32 %v1653_v62, %v1652_v9  ;;  %v1649_v26 = vadd.f32 %v1648_v63, %v1647_v35  ;;  %v3787_v41 = vadd.f32 %v1542_v39, %v1541_v55 }
 0x1db   :  { %v1568_v34 = vadd.f32 %v1567_v0, %v1566_v2  ;;  %v1592_v27 = vadd.f32 %v1591_v20, %v1590_v12  ;;  %v1601_v17 = vmul.f32 %v1505_v10, %v3724_v59  ;;  %v1516_v37 = vrot.slane %v3776_v1, 2 }
 0x1dc   :  { %v1612_v38 = vadd.f32 %v1611_v51, %v1610_v15  ;;  %v1655_v29 = vrot.slane %v1654_v40, 2  ;;  %v1650_v45 = vrot.slane %v1649_v26, 1  ;;  %v1606_v60 = vrot.slane %v1605_v53, 2 }
 0x1dd   :  { %v3791_v33 = vadd.f32 %v1549_v49, %v1548_v7  ;;  %v1588_v16 = vrot.slane %v1587_v42, 1  ;;  %v3793_v52 = vadd.f32 1e-30, %v1568_v34  ;;  %v1593_v3 = vrot.slane %v1592_v27, 2 }
 0x1de   :  { %v1656_v46 = vadd.f32 %v1655_v29, %v1654_v40  ;;  %v1613_v47 = vrot.slane %v1612_v38, 2  ;;  %v1673_v21 = vsel %vm1452_vm8, %v1505_v10, 0.0  ;;  %v1523_v14 = vrot.slane %v3781_v4, 2 }
 0x1df   :  { %2322 = vrcp.f32 %v3783_v31  ;;  %v1674_v8 = vrot.slane %v1673_v21, 4  ;;  %v1680_v36 = vsel %vm1452_vm8, %v1506_v54, 0.0  ;;  %v1651_v56 = vadd.f32 %v1650_v45, %v1649_v26 }
 0x1e0   :  { %v1657_v55 = vrot.slane %v1656_v46, 1  ;;  %v1631_v22 = vsel %vm1452_vm8, %v1601_v17, 0.0  ;;  %v1681_v25 = vrot.slane %v1680_v36, 4  ;;  %v1589_v48 = vadd.f32 %v1588_v16, %v1587_v42 }
 0x1e1   :  { %v1594_v30 = vadd.f32 %v1593_v3, %v1592_v27  ;;  %v1602_v28 = vmul.f32 %v1506_v54, %v3731_v11  ;;  %v1675_v44 = vadd.f32 %v1674_v8, %v1673_v21  ;;  %v3801_v58 = vadd.f32 %v1606_v60, %v1605_v53 }
 0x1e2   :  { %v3803_v19 = vadd.f32 %v1613_v47, %v1612_v38  ;;  %2324 = vrcp.f32 %v3793_v52  ;;  %v1682_v2 = vadd.f32 %v1681_v25, %v1680_v36  ;;  %v1632_v61 = vrot.slane %v1631_v22, 4 }
 0x1e3   :  { %v1676_v39 = vrot.slane %v1675_v44, 2  ;;  %v1497_v23 = vmul.f32 %v3741_v13, %v1444_v24  ;;  %v1658_v35 = vadd.f32 %v1657_v55, %v1656_v46  ;;  %v3807_v9 = vadd.f32 1e-30, %v1651_v56 }
 0x1e4   :  { %v1683_v18 = vrot.slane %v1682_v2, 2  ;;  %v2395_v0 = vmov 8   ;;  %v1498_v15 = vmul.f32 %v3748_v6, %v1444_v24  ;;  %v1595_v7 = vrot.slane %v1594_v30, 1  ;;  %v4429_v6 = vld [vmem:[#allocation5_spill] sm:$0xff] }
 0x1e5   :  { %2167 = vset.pattern.permute.xlu1 %v2395_v0  ;;  %2168 = vset.pattern.permute.xlu2 %v2395_v0  ;;  %v3810_v62 = vpop.eup %2322  ;;  %v1638_v32 = vsel %vm1452_vm8, %v1602_v28, 0.0  ;;  %v1677_v57 = vadd.f32 %v1676_v39, %v1675_v44  ;;  %v1509_v51 = vmul.f32 %v1497_v23, %v3724_v59  ;;  %v1503_v13 = vmul.f32 %v3754_v43, %v1444_v24 }
 0x1e6   :  { %2095 = vperm.xlu1 %2167, %v3713_v50   ;;  %v1504_v63 = vmul.f32 %v3763_v5, %v1444_v24  ;;  %v1510_v40 = vmul.f32 %v1498_v15, %v3731_v11  ;;  %v1569_v10 = vsel %vm1452_vm8, %v1497_v23, 0.0  ;;  %v4430_v12 = vsub.f32 1.0, %v4429_v6  ;;  %2169 = vset.pattern.permute.xlu0 %v2395_v0 }
 0x1e7   :  { %v3821_v53 = vadd.f32 1e-30, %v1589_v48  ;;  %v1527_v26 = vsel %vm1452_vm8, %v1509_v51, 0.0  ;;  %v1570_v49 = vrot.slane %v1569_v10, 4  ;;  %v1576_v42 = vsel %vm1452_vm8, %v1498_v15, 0.0 }
 0x1e8   :  { %2101 = vperm.xlu2 %2168, %v4430_v12   ;;  %v3825_v50 = vpop.eup %2324  ;;  %v3827_v43 = vadd.f32 1e-30, %v1658_v35  ;;  %2326 = vrcp.f32 %v3807_v9  ;;  %v1639_v5 = vrot.slane %v1638_v32, 4  ;;  %v1684_v34 = vadd.f32 %v1683_v18, %v1682_v2 }
 0x1e9   :  { %v1678_v38 = vrot.slane %v1677_v57, 1  ;;  %v1534_v29 = vsel %vm1452_vm8, %v1510_v40, 0.0  ;;  %v1571_v20 = vadd.f32 %v1570_v49, %v1569_v10  ;;  %v1577_v54 = vrot.slane %v1576_v42, 4 }
 0x1ea   :  { %v1596_v45 = vadd.f32 %v1595_v7, %v1594_v30  ;;  %v1528_v46 = vrot.slane %v1527_v26, 4  ;;  %v1599_v27 = vmul.f32 %v1503_v13, %v3724_v59  ;;  %v1600_v17 = vmul.f32 %v1504_v63, %v3731_v11 }
 0x1eb   :  { %v3833_v60 = vadd.f32 %v1632_v61, %v1631_v22  ;;  %2328 = vrcp.f32 %v3821_v53  ;;  %v1572_v16 = vrot.slane %v1571_v20, 2  ;;  %v1578_v47 = vadd.f32 %v1577_v54, %v1576_v42 }
 0x1ec   :  { %2330 = vrcp.f32 %v3827_v43  ;;  %v1685_v3 = vrot.slane %v1684_v34, 1  ;;  %v1535_v21 = vrot.slane %v1534_v29, 4  ;;  %v1617_v8 = vsel %vm1452_vm8, %v1599_v27, 0.0 }
 0x1ed   :  { %v1679_v36 = vadd.f32 %v1678_v38, %v1677_v57  ;;  %v1573_v56 = vadd.f32 %v1572_v16, %v1571_v20  ;;  %v1579_v55 = vrot.slane %v1578_v47, 2  ;;  %v1624_v25 = vsel %vm1452_vm8, %v1600_v17, 0.0 }
 0x1ee   :  { %v3839_v59 = vpop.eup %2326  ;;  %v3841_v11 = vadd.f32 1e-30, %v1596_v45  ;;  %v1529_v22 = vadd.f32 %v1528_v46, %v1527_v26  ;;  %v1618_v24 = vrot.slane %v1617_v8, 4  ;;  %v1659_v48 = vsel %vm1452_vm8, %v1503_v13, 0.0 }
 0x1ef   :  { %v1574_v30 = vrot.slane %v1573_v56, 1  ;;  %v1580_v28 = vadd.f32 %v1579_v55, %v1578_v47  ;;  %v1660_v44 = vrot.slane %v1659_v48, 4  ;;  %v1666_v2 = vsel %vm1452_vm8, %v1504_v63, 0.0 }
 0x1f0   :  { %v1686_v61 = vadd.f32 %v1685_v3, %v1684_v34  ;;  %v1536_v39 = vadd.f32 %v1535_v21, %v1534_v29  ;;  %v1625_v23 = vrot.slane %v1624_v25, 4  ;;  %v1667_v35 = vrot.slane %v1666_v2, 4 }
 0x1f1   :  { %v3845_v18 = vpop.eup %2328  ;;  %v3847_v0 = vadd.f32 1e-30, %v1679_v36  ;;  %v1575_v15 = vadd.f32 %v1574_v30, %v1573_v56  ;;  %v1581_v7 = vrot.slane %v1580_v28, 1  ;;  %v1661_v57 = vadd.f32 %v1660_v44, %v1659_v48 }
 0x1f2   :  { %v3849_v51 = vpop.eup %2330  ;;  %v3851_v40 = vadd.f32 %v1639_v5, %v1638_v32  ;;  %2332 = vrcp.f32 %v3841_v11  ;;  %v1619_v13 = vadd.f32 %v1618_v24, %v1617_v8  ;;  %v1668_v10 = vadd.f32 %v1667_v35, %v1666_v2 }
 0x1f3   :  { %v1530_v63 = vrot.slane %v1529_v22, 2  ;;  %v1582_v6 = vadd.f32 %v1581_v7, %v1580_v28  ;;  %v1662_v12 = vrot.slane %v1661_v57, 2  ;;  %v3854_v26 = vadd.f32 1e-30, %v1575_v15 }
 0x1f4   :  { %v3856_v49 = vadd.f32 1e-30, %v1686_v61  ;;  %v1537_v42 = vrot.slane %v1536_v39, 2  ;;  %v1626_v34 = vadd.f32 %v1625_v23, %v1624_v25  ;;  %v1669_v38 = vrot.slane %v1668_v10, 2 }
 0x1f5   :  { %2334 = vrcp.f32 %v3847_v0  ;;  %v1663_v29 = vadd.f32 %v1662_v12, %v1661_v57  ;;  %v1517_v32 = vadd.f32 %v1516_v37, %v3776_v1  ;;  %v1524_v5 = vadd.f32 %v1523_v14, %v3781_v4 }
 0x1f6   :  { %v1620_v20 = vrot.slane %v1619_v13, 2  ;;  %v1670_v54 = vadd.f32 %v1669_v38, %v1668_v10  ;;  %v3865_v45 = vadd.f32 1e-30, %v1582_v6  ;;  %v1544_v46 = vrot.slane %v3787_v41, 2 }
 0x1f7   :  { %v1664_v27 = vrot.slane %v1663_v29, 1  ;;  %2336 = vrcp.f32 %v3854_v26  ;;  %v1531_v17 = vadd.f32 %v1530_v63, %v1529_v22  ;;  %v1694_v16 = vmul.f32 %v3810_v62, %v3783_v31 }
 0x1f8   :  { %v3871_v47 = vpop.eup %2332  ;;  %v1627_v1 = vrot.slane %v1626_v34, 2  ;;  %v1671_v37 = vrot.slane %v1670_v54, 1  ;;  %v1538_v3 = vadd.f32 %v1537_v42, %v1536_v39  ;;  %v1551_v4 = vrot.slane %v3791_v33, 2 }
 0x1f9   :  { %2338 = vrcp.f32 %v3856_v49  ;;  %v1665_v14 = vadd.f32 %v1664_v27, %v1663_v29  ;;  %v1545_v21 = vadd.f32 %v1544_v46, %v3787_v41  ;;  %v1695_v8 = vsub.f32 1.0, %v1694_v16 }
 0x1fa   :  { %v1634_v36 = vrot.slane %v3833_v60, 2  ;;  %v1641_v56 = vrot.slane %v3851_v40, 2  ;;  %2340 = vrcp.f32 %v3865_v45  ;;  %v1518_v55 = vrot.slane %v1517_v32, 1 }
 0x1fb   :  { %v3879_v25 = vpop.eup %2334  ;;  %v3881_v22 = vadd.f32 %v1620_v20, %v1619_v13  ;;  %v1525_v24 = vrot.slane %v1524_v5, 1  ;;  %v1532_v48 = vrot.slane %v1531_v17, 1  ;;  %v1696_v30 = vmul.f32 %v3810_v62, %v1695_v8 }
 0x1fc   :  { %v3884_v28 = vadd.f32 %v1627_v1, %v1626_v34  ;;  %v1672_v44 = vadd.f32 %v1671_v37, %v1670_v54  ;;  %v1539_v41 = vrot.slane %v1538_v3, 1  ;;  %v3887_v2 = vadd.f32 %v1551_v4, %v3791_v33 }
 0x1fd   :  { %v2337_v61 = vpop.eup %2336  ;;  %v3889_v39 = vadd.f32 1e-30, %v1665_v14  ;;  %v1546_v23 = vrot.slane %v1545_v21, 1  ;;  %v1702_v35 = vand.u32 2147483647, %v3783_v31  ;;  %v1709_v15 = vmul.f32 %v3825_v50, %v3793_v52 }
 0x1fe   :  { %v3894_v7 = vadd.f32 %v1518_v55, %v1517_v32  ;;  %v1697_v57 = vadd.f32 %v3810_v62, %v1696_v30  ;;  %vm1699_vm4 = vweird.f32 %v3810_v62  ;;  %v1704_v13 = vand.u32 2147483648, %v3783_v31 }
 0x1ff   :  { %v3899_v10 = vpop.eup %2338  ;;  %v3901_v33 = vadd.f32 %v1525_v24, %v1524_v5  ;;  %v1533_v63 = vadd.f32 %v1532_v48, %v1531_v17  ;;  %vm1698_vm12 = vweird.f32 %v3783_v31  ;;  %v1710_v6 = vsub.f32 1.0, %v1709_v15 }
 0x200   :  { %v3904_v12 = vpop.eup %2340  ;;  %v3906_v42 = vadd.f32 1e-30, %v1672_v44  ;;  %v3908_v34 = vadd.f32 %v1539_v41, %v1538_v3  ;;  %v1553_v38 = vrot.slane %v3887_v2, 1  ;;  %v1724_v29 = vmul.f32 %v2337_v61, %v3854_v26  ;;  %vm3915_vm9 = vmor %vm1698_vm12, %vm1699_vm4 }
 0x201   :  { %2342 = vrcp.f32 %v3889_v39  ;;  %v3913_v32 = vadd.f32 %v1546_v23, %v1545_v21  ;;  %vm1703_vm11 = vcmp.eq.f32.partialorder %v1702_v35, 8.507059e+37  ;;  %v1711_v31 = vmul.f32 %v3825_v50, %v1710_v6 }
 0x202   :  { %v1701_v20 = vsel %vm3915_vm9, %v3810_v62, %v1697_v57  ;;  %v1705_v54 = vor.u32 1.1754944e-38, %v1704_v13  ;;  %v1719_v46 = vand.u32 2147483648, %v3793_v52  ;;  %v1725_v27 = vsub.f32 1.0, %v1724_v29 }
 0x203   :  { %vm1714_vm13 = vweird.f32 %v3825_v50  ;;  %v1732_v17 = vand.u32 2147483647, %v3854_v26  ;;  %v1734_v16 = vand.u32 2147483648, %v3854_v26  ;;  %v1739_v1 = vmul.f32 %v3904_v12, %v3865_v45 }
 0x204   :  { %v1712_v37 = vadd.f32 %v3825_v50, %v1711_v31  ;;  %vm1713_vm15 = vweird.f32 %v3793_v52  ;;  %v1726_v3 = vmul.f32 %v2337_v61, %v1725_v27  ;;  %vm1729_vm0 = vweird.f32 %v2337_v61 }
 0x205   :  { %v1706_v62 = vsel %vm1703_vm11, %v1705_v54, %v1701_v20  ;;  %v1717_v4 = vand.u32 2147483647, %v3793_v52  ;;  %v1740_v14 = vsub.f32 1.0, %v1739_v1  ;;  %v1754_v21 = vmul.f32 %v3845_v18, %v3821_v53  ;;  %vm3934_vm2 = vmor %vm1713_vm15, %vm1714_vm13 }
 0x206   :  { %v1720_v55 = vor.u32 1.1754944e-38, %v1719_v46  ;;  %v1727_v24 = vadd.f32 %v2337_v61, %v1726_v3  ;;  %vm1728_vm3 = vweird.f32 %v3854_v26  ;;  %vm1744_vm1 = vweird.f32 %v3904_v12 }
 0x207   :  { %v3940_v48 = vpop.eup %2342  ;;  %vm1730_vm5 = vmor %vm1728_vm3, %vm1729_vm0  ;;  %vm1733_vm6 = vcmp.eq.f32.partialorder %v1732_v17, 8.507059e+37  ;;  %v1735_v30 = vor.u32 1.1754944e-38, %v1734_v16  ;;  %v1741_v52 = vmul.f32 %v3904_v12, %v1740_v14  ;;  %v1755_v44 = vsub.f32 1.0, %v1754_v21 }
 0x208   :  { %v1716_v41 = vsel %vm3934_vm2, %v3825_v50, %v1712_v37  ;;  %v1731_v23 = vsel %vm1730_vm5, %v2337_v61, %v1727_v24  ;;  %v1749_v35 = vand.u32 2147483648, %v3865_v45  ;;  %vm1759_vm8 = vweird.f32 %v3845_v18 }
 0x209   :  { %v1742_v26 = vadd.f32 %v3904_v12, %v1741_v52  ;;  %v1756_v15 = vmul.f32 %v3845_v18, %v1755_v44  ;;  %v1764_v57 = vand.u32 2147483648, %v3821_v53  ;;  %v1769_v13 = vmul.f32 %v3871_v47, %v3841_v11 }
 0x20a   :  { %v1736_v6 = vsel %vm1733_vm6, %v1735_v30, %v1731_v23  ;;  %vm1743_vm4 = vweird.f32 %v3865_v45  ;;  %v1747_v29 = vand.u32 2147483647, %v3865_v45  ;;  %v1762_v50 = vand.u32 2147483647, %v3821_v53 }
 0x20b   :  { %vm1718_vm12 = vcmp.eq.f32.partialorder %v1717_v4, 8.507059e+37  ;;  %vm3958_vm9 = vmor %vm1743_vm4, %vm1744_vm1  ;;  %v1757_v5 = vadd.f32 %v3845_v18, %v1756_v15  ;;  %vm1758_vm11 = vweird.f32 %v3821_v53  ;;  %v1770_v31 = vsub.f32 1.0, %v1769_v13 }
 0x20c   :  { %v1707_v20 = vmul.f32 %v1706_v62, %v3894_v7  ;;  %v1721_v54 = vsel %vm1718_vm12, %v1720_v55, %v1716_v41  ;;  %v1746_v45 = vsel %vm3958_vm9, %v3904_v12, %v1742_v26  ;;  %v1750_v46 = vor.u32 1.1754944e-38, %v1749_v35  ;;  %vm1760_vm13 = vmor %vm1758_vm11, %vm1759_vm8 }
 0x20d   :  { %v1737_v27 = vmul.f32 %v1736_v6, %v1533_v63  ;;  %v1761_v17 = vsel %vm1760_vm13, %v3845_v18, %v1757_v5  ;;  %v1765_v16 = vor.u32 1.1754944e-38, %v1764_v57  ;;  %v1771_v1 = vmul.f32 %v3871_v47, %v1770_v31 }
 0x20e   :  { %v3973_v53 = vadd.f32 %v1553_v38, %v3887_v2  ;;  %vm1748_vm15 = vcmp.eq.f32.partialorder %v1747_v29, 8.507059e+37  ;;  %vm1763_vm0 = vcmp.eq.f32.partialorder %v1762_v50, 8.507059e+37  ;;  %v1777_v7 = vand.u32 2147483647, %v3841_v11 }
 0x20f   :  { %v1751_v37 = vsel %vm1748_vm15, %v1750_v46, %v1746_v45  ;;  %v1766_v3 = vsel %vm1763_vm0, %v1765_v16, %v1761_v17  ;;  %v1772_v12 = vadd.f32 %v3871_v47, %v1771_v1  ;;  %vm1774_vm2 = vweird.f32 %v3871_v47 }
 0x210   :  { %2344 = vrcp.f32 %v3906_v42  ;;  %v3980_v18 = vmul.f32 %v1721_v54, %v3901_v33  ;;  %v1779_v63 = vand.u32 2147483648, %v3841_v11  ;;  %v1608_v2 = vrot.slane %v3801_v58, 1 }
 0x211   :  { %vm1773_vm3 = vweird.f32 %v3841_v11  ;;  %v1890_v38 = vsel %vm688_vm10, %v1737_v27, %v1707_v20  ;;  %v1615_v62 = vrot.slane %v3803_v19, 1  ;;  %v1790_v4 = vmul.f32 %v3839_v59, %v3807_v9 }
 0x212   :  { %v3990_v14 = vmul.f32 %v1751_v37, %v3908_v34  ;;  %v1767_v21 = vmul.f32 %v1766_v3, %v3913_v32  ;;  %vm3993_vm1 = vmor %vm1773_vm3, %vm1774_vm2  ;;  %vm1778_vm5 = vcmp.eq.f32.partialorder %v1777_v7, 8.507059e+37  ;;  %v1622_v8 = vrot.slane %v3881_v22, 1 }
 0x213   :  { %v1776_v11 = vsel %vm3993_vm1, %v3871_v47, %v1772_v12  ;;  %v1629_v55 = vrot.slane %v3884_v28, 1  ;;  %v4005_v34 = vadd.f32 %v1634_v36, %v3833_v60  ;;  %v1791_v24 = vsub.f32 1.0, %v1790_v4 }
 0x214   :  { %v1780_v32 = vor.u32 1.1754944e-38, %v1779_v63  ;;  %v1609_v30 = vadd.f32 %v1608_v2, %v3801_v58  ;;  %v4011_v52 = vadd.f32 %v1641_v56, %v3851_v40  ;;  %v1800_v44 = vand.u32 2147483648, %v3807_v9 }
 0x215   :  { %v4015_v47 = vadd.f32 %v1615_v62, %v3803_v19  ;;  %v1792_v41 = vmul.f32 %v3839_v59, %v1791_v24  ;;  %vm1795_vm6 = vweird.f32 %v3839_v59  ;;  %v1798_v60 = vand.u32 2147483647, %v3807_v9 }
 0x216   :  { %v4020_v36 = vpop.eup %2344  ;;  %v4022_v23 = vsel %vm1778_vm5, %v1780_v32, %v1776_v11  ;;  %v4025_v58 = vsel %vm690_vm14, %v1767_v21, %v1890_v38  ;;  %v1623_v40 = vadd.f32 %v1622_v8, %v3881_v22  ;;  %v1805_v56 = vmul.f32 %v3849_v51, %v3827_v43 }
 0x217   :  { %v4031_v19 = vadd.f32 %v1629_v55, %v3884_v28  ;;  %v1636_v35 = vrot.slane %v4005_v34, 1  ;;  %v1793_v26 = vadd.f32 %v3839_v59, %v1792_v41  ;;  %vm1794_vm8 = vweird.f32 %v3807_v9 }
 0x218   :  { %v1643_v15 = vrot.slane %v4011_v52, 1  ;;  %vm1796_vm4 = vmor %vm1794_vm8, %vm1795_vm6  ;;  %v1801_v57 = vor.u32 1.1754944e-38, %v1800_v44  ;;  %v1806_v13 = vsub.f32 1.0, %v1805_v56  ;;  %v1820_v22 = vmul.f32 %v3940_v48, %v3889_v39 }
 0x219   :  { %v1797_v6 = vsel %vm1796_vm4, %v3839_v59, %v1793_v26  ;;  %vm1799_vm12 = vcmp.eq.f32.partialorder %v1798_v60, 8.507059e+37  ;;  %v1813_v28 = vand.u32 2147483647, %v3827_v43  ;;  %v1815_v29 = vand.u32 2147483648, %v3827_v43 }
 0x21a   :  { %v1802_v50 = vsel %vm1799_vm12, %v1801_v57, %v1797_v6  ;;  %v1807_v61 = vmul.f32 %v3849_v51, %v1806_v13  ;;  %v1821_v5 = vsub.f32 1.0, %v1820_v22  ;;  %v1828_v9 = vand.u32 2147483647, %v3889_v39  ;;  %v1882_v57 = vpop.permute.xlu0 %1881  ;;  %v1902_v13 = vpop.permute.xlu1 %1901 }
 0x21b   :  { %vm1809_vm9 = vweird.f32 %v3827_v43  ;;  %vm1810_vm11 = vweird.f32 %v3849_v51  ;;  %v1830_v31 = vand.u32 2147483648, %v3889_v39  ;;  %v1835_v59 = vmul.f32 %v4020_v36, %v3906_v42 }
 0x21c   :  { %v1808_v20 = vadd.f32 %v3849_v51, %v1807_v61  ;;  %v1822_v54 = vmul.f32 %v3940_v48, %v1821_v5  ;;  %vm1824_vm13 = vweird.f32 %v3889_v39  ;;  %vm1825_vm15 = vweird.f32 %v3940_v48  ;;  %vm4057_vm2 = vmor %vm1809_vm9, %vm1810_vm11 }
 0x21d   :  { %v1803_v45 = vmul.f32 %v1802_v50, %v1609_v30  ;;  %vm4053_vm0 = vcmp.eq.f32.partialorder %v1813_v28, 8.507059e+37  ;;  %v1816_v43 = vor.u32 1.1754944e-38, %v1815_v29  ;;  %v1836_v27 = vsub.f32 1.0, %v1835_v59  ;;  %vm1826_vm1 = vmor %vm1824_vm13, %vm1825_vm15 }
 0x21e   :  { %v1823_v16 = vadd.f32 %v3940_v48, %v1822_v54  ;;  %vm1829_vm3 = vcmp.eq.f32.partialorder %v1828_v9, 8.507059e+37  ;;  %v1845_v1 = vand.u32 2147483648, %v3906_v42  ;;  %v1850_v39 = vmul.f32 %v3879_v25, %v3847_v0 }
 0x21f   :  { %v1831_v7 = vor.u32 1.1754944e-38, %v1830_v31  ;;  %v1837_v37 = vmul.f32 %v4020_v36, %v1836_v27  ;;  %vm1840_vm5 = vweird.f32 %v4020_v36  ;;  %v1843_v3 = vand.u32 2147483647, %v3906_v42 }
 0x220   :  { %v1812_v12 = vsel %vm4057_vm2, %v3849_v51, %v1808_v20  ;;  %v1827_v63 = vsel %vm1826_vm1, %v3940_v48, %v1823_v16  ;;  %vm1839_vm6 = vweird.f32 %v3906_v42  ;;  %v1851_v2 = vsub.f32 1.0, %v1850_v39 }
 0x221   :  { %v1832_v38 = vsel %vm1829_vm3, %v1831_v7, %v1827_v63  ;;  %v1838_v62 = vadd.f32 %v4020_v36, %v1837_v37  ;;  %v1858_v4 = vand.u32 2147483647, %v3847_v0  ;;  %v1860_v21 = vand.u32 2147483648, %v3847_v0  ;;  %vm1841_vm8 = vmor %vm1839_vm6, %vm1840_vm5 }
 0x222   :  { %v1846_v33 = vor.u32 1.1754944e-38, %v1845_v1  ;;  %v1852_v8 = vmul.f32 %v3879_v25, %v1851_v2  ;;  %vm1855_vm4 = vweird.f32 %v3879_v25  ;;  %v1865_v51 = vmul.f32 %v3899_v10, %v3856_v49 }
 0x223   :  { %v1833_v48 = vmul.f32 %v1832_v38, %v1623_v40  ;;  %v1842_v42 = vsel %vm1841_vm8, %v4020_v36, %v1838_v62  ;;  %vm1844_vm12 = vcmp.eq.f32.partialorder %v1843_v3, 8.507059e+37  ;;  %vm1854_vm9 = vweird.f32 %v3847_v0 }
 0x224   :  { %v1817_v11 = vsel %vm4053_vm0, %v1816_v43, %v1812_v12  ;;  %v1847_v55 = vsel %vm1844_vm12, %v1846_v33, %v1842_v42  ;;  %v1853_v24 = vadd.f32 %v3879_v25, %v1852_v8  ;;  %v1866_v32 = vsub.f32 1.0, %v1865_v51  ;;  %vm1856_vm11 = vmor %vm1854_vm9, %vm1855_vm4 }
 0x225   :  { %v1637_v30 = vadd.f32 %v1636_v35, %v4005_v34  ;;  %vm1859_vm13 = vcmp.eq.f32.partialorder %v1858_v4, 8.507059e+37  ;;  %v1861_v44 = vor.u32 1.1754944e-38, %v1860_v21  ;;  %v1875_v41 = vand.u32 2147483648, %v3856_v49 }
 0x226   :  { %v1857_v60 = vsel %vm1856_vm11, %v3879_v25, %v1853_v24  ;;  %v1867_v36 = vmul.f32 %v3899_v10, %v1866_v32  ;;  %vm1870_vm15 = vweird.f32 %v3899_v10  ;;  %v1873_v0 = vand.u32 2147483647, %v3856_v49 }
 0x227   :  { %v1818_v40 = vmul.f32 %v1817_v11, %v4015_v47  ;;  %v1848_v56 = vmul.f32 %v1847_v55, %v4031_v19  ;;  %v1862_v26 = vsel %vm1859_vm13, %v1861_v44, %v1857_v60  ;;  %v1910_v34 = vsel %vm688_vm10, %v1833_v48, %v1803_v45 }
 0x228   :  { %v1782_v35 = vmul.f32 %v4022_v23, %v3973_v53  ;;  %v1863_v22 = vmul.f32 %v1862_v26, %v1637_v30  ;;  %v1868_v25 = vadd.f32 %v3899_v10, %v1867_v36  ;;  %vm1869_vm0 = vweird.f32 %v3856_v49 }
 0x229   :  { %v1892_v6 = vsel %vm688_vm10, %v3990_v14, %v3980_v18  ;;  %vm1871_vm2 = vmor %vm1869_vm0, %vm1870_vm15  ;;  %v1876_v47 = vor.u32 1.1754944e-38, %v1875_v41  ;;  %v1644_v19 = vadd.f32 %v1643_v15, %v4011_v52  ;;  %vm1874_vm3 = vcmp.eq.f32.partialorder %v1873_v0, 8.507059e+37  ;;  %v1964_v0 = vpop.permute.xlu2 %1963 }
 0x22a   :  { %v1872_v28 = vsel %vm1871_vm2, %v3899_v10, %v1868_v25  ;;  %v1911_v53 = vsel %vm690_vm14, %v1863_v22, %v1910_v34  ;;  %v1896_v23 = vmul.f32 %v4025_v58, %v1882_v57  ;;  %v1912_v49 = vsel %vm688_vm10, %v1848_v56, %v1818_v40 }
 0x22b   :  { %v1877_v29 = vsel %vm1874_vm3, %v1876_v47, %v1872_v28  ;;  %v1916_v50 = vmul.f32 %v1911_v53, %v1902_v13  ;;  %v1893_v61 = vsel %vm690_vm14, %v1782_v35, %v1892_v6 }
 0x22c   :  { %v1878_v18 = vmul.f32 %v1877_v29, %v1644_v19  ;;  %v1897_v9 = vmul.f32 %v1893_v61, %v1882_v57 }
 0x22d   :  { %v4109_v14 = vadd.f32 %v1916_v50, %v1896_v23 }
 0x22e   :  { %v1913_v5 = vsel %vm690_vm14, %v1878_v18, %v1912_v49 }
 0x22f   :  { %v1917_v52 = vmul.f32 %v1913_v5, %v1902_v13  ;;  %v1920_v10 = vsel %vm1428_vm7, %v4109_v14, -inf  ;;  %v1934_v15 = vsel %vm1428_vm7, %v4109_v14, inf }
 0x230   :  { %v1921_v58 = vrot.slane %v1920_v10, 4  ;;  %v1935_v31 = vrot.slane %v1934_v15, 4 }
 0x231   :  { %v4116_v59 = vadd.f32 %v1917_v52, %v1897_v9 }
 0x232   :  { %v1922_v20 = vmax.f32 %v1920_v10, %v1921_v58  ;;  %v1936_v54 = vmin.f32 %v1934_v15, %v1935_v31 }
 0x233   :  { %v1927_v45 = vsel %vm1428_vm7, %v4116_v59, -inf  ;;  %v1941_v46 = vsel %vm1428_vm7, %v4116_v59, inf }
 0x234   :  { %v1923_v43 = vrot.slane %v1922_v20, 2  ;;  %v1928_v27 = vrot.slane %v1927_v45, 4  ;;  %v1937_v17 = vrot.slane %v1936_v54, 2  ;;  %v1942_v16 = vrot.slane %v1941_v46, 4 }
 0x236   :  { %v1924_v1 = vmax.f32 %v1922_v20, %v1923_v43  ;;  %v1929_v39 = vmax.f32 %v1927_v45, %v1928_v27  ;;  %v1938_v7 = vmin.f32 %v1936_v54, %v1937_v17  ;;  %v1943_v37 = vmin.f32 %v1941_v46, %v1942_v16 }
 0x238   :  { %v1930_v3 = vrot.slane %v1929_v39, 2  ;;  %v1944_v12 = vrot.slane %v1943_v37, 2  ;;  %v1925_v63 = vrot.slane %v1924_v1, 1  ;;  %v1939_v2 = vrot.slane %v1938_v7, 1 }
 0x23a   :  { %v1931_v38 = vmax.f32 %v1929_v39, %v1930_v3  ;;  %v1945_v62 = vmin.f32 %v1943_v37, %v1944_v12  ;;  %v1926_v4 = vmax.f32 %v1924_v1, %v1925_v63  ;;  %v1940_v21 = vmin.f32 %v1938_v7, %v1939_v2 }
 0x23c   :  { %v1932_v33 = vrot.slane %v1931_v38, 1  ;;  %v1946_v8 = vrot.slane %v1945_v62, 1  ;;  %v1948_v51 = vadd.f32 %v1940_v21, %v1926_v4 }
 0x23e   :  { %v1933_v48 = vmax.f32 %v1931_v38, %v1932_v33  ;;  %v1947_v42 = vmin.f32 %v1945_v62, %v1946_v8  ;;  %v1950_v11 = vmul.f32 0.5, %v1948_v51 }
 0x240   :  { %v1949_v55 = vadd.f32 %v1947_v42, %v1933_v48  ;;  %v1952_v24 = vsub.f32 %v4109_v14, %v1950_v11 }
 0x242   :  { %v1951_v32 = vmul.f32 0.5, %v1949_v55  ;;  %v1954_v30 = vmul.f32 2.5, %v1952_v24 }
 0x244   :  { %v1953_v44 = vsub.f32 %v4116_v59, %v1951_v32  ;;  %v1956_v41 = vmul.f32 1.442695, %v1954_v30 }
 0x246   :  { %v1955_v60 = vmul.f32 2.5, %v1953_v44  ;;  %2346 = vpow2.f32 %v1956_v41 }
 0x248   :  { %v1958_v36 = vmul.f32 1.442695, %v1955_v60 }
 0x24a   :  { %2348 = vpow2.f32 %v1958_v36 }
 0x24c   :  { %v2347_v40 = vpop.eup %2346 }
 0x24d   :  { %2350 = vrcp.f32 %v2347_v40  ;;  %v1966_v56 = vmul.f32 %v2347_v40, %v1964_v0 }
 0x24f   :  { %v1986_v26 = vsel %vm1428_vm7, %v1966_v56, 0.0  ;;  %v1970_v13 = vmul.f32 %v1966_v56, %v4109_v14 }
 0x250   :  { %v2349_v34 = vpop.eup %2348  ;;  %v1987_v35 = vrot.slane %v1986_v26, 4 }
 0x251   :  { %2352 = vrcp.f32 %v2349_v34  ;;  %v1967_v57 = vmul.f32 %v2349_v34, %v1964_v0  ;;  %v1972_v50 = vsel %vm1428_vm7, %v1970_v13, 0.0 }
 0x252   :  { %v1988_v22 = vadd.f32 %v1987_v35, %v1986_v26  ;;  %v1973_v15 = vrot.slane %v1972_v50, 4 }
 0x253   :  { %v2351_v25 = vpop.eup %2350  ;;  %v1993_v6 = vsel %vm1428_vm7, %v1967_v57, 0.0  ;;  %v1971_v53 = vmul.f32 %v1967_v57, %v4116_v59 }
 0x254   :  { %v1968_v47 = vmul.f32 %v2351_v25, %v1964_v0  ;;  %v1989_v19 = vrot.slane %v1988_v22, 2  ;;  %v1994_v28 = vrot.slane %v1993_v6, 4  ;;  %v1974_v3 = vadd.f32 %v1973_v15, %v1972_v50 }
 0x255   :  { %v1979_v58 = vsel %vm1428_vm7, %v1971_v53, 0.0 }
 0x256   :  { %v1990_v23 = vadd.f32 %v1989_v19, %v1988_v22  ;;  %v1995_v29 = vadd.f32 %v1994_v28, %v1993_v6  ;;  %v2016_v49 = vsel %vm1428_vm7, %v1968_v47, 0.0  ;;  %v2000_v54 = vmul.f32 %v1968_v47, %v4109_v14 }
 0x257   :  { %v2353_v61 = vpop.eup %2352  ;;  %v2017_v18 = vrot.slane %v2016_v49, 4  ;;  %v1980_v1 = vrot.slane %v1979_v58, 4  ;;  %v1975_v33 = vrot.slane %v1974_v3, 2 }
 0x258   :  { %v1969_v5 = vmul.f32 %v2353_v61, %v1964_v0  ;;  %v1991_v9 = vrot.slane %v1990_v23, 1  ;;  %v1996_v52 = vrot.slane %v1995_v29, 2  ;;  %v2002_v12 = vsel %vm1428_vm7, %v2000_v54, 0.0 }
 0x259   :  { %v2018_v10 = vadd.f32 %v2017_v18, %v2016_v49  ;;  %v1981_v38 = vadd.f32 %v1980_v1, %v1979_v58  ;;  %v4143_v30 = vadd.f32 %v1975_v33, %v1974_v3 }
 0x25a   :  { %v1992_v31 = vadd.f32 %v1991_v9, %v1990_v23  ;;  %v1997_v20 = vadd.f32 %v1996_v52, %v1995_v29  ;;  %v2023_v45 = vsel %vm1428_vm7, %v1969_v5, 0.0  ;;  %v2001_v17 = vmul.f32 %v1969_v5, %v4116_v59 }
 0x25b   :  { %v2019_v46 = vrot.slane %v2018_v10, 2  ;;  %v2024_v43 = vrot.slane %v2023_v45, 4  ;;  %v2003_v59 = vrot.slane %v2002_v12, 4  ;;  %v1982_v11 = vrot.slane %v1981_v38, 2 }
 0x25c   :  { %v1998_v27 = vrot.slane %v1997_v20, 1  ;;  %v4134_v16 = vadd.f32 1e-30, %v1992_v31  ;;  %v2009_v62 = vsel %vm1428_vm7, %v2001_v17, 0.0  ;;  %v1977_v26 = vrot.slane %v4143_v30, 1 }
 0x25d   :  { %v2020_v39 = vadd.f32 %v2019_v46, %v2018_v10  ;;  %v2025_v7 = vadd.f32 %v2024_v43, %v2023_v45  ;;  %v2010_v48 = vrot.slane %v2009_v62, 4  ;;  %v2004_v32 = vadd.f32 %v2003_v59, %v2002_v12 }
 0x25e   :  { %v1999_v37 = vadd.f32 %v1998_v27, %v1997_v20  ;;  %2354 = vrcp.f32 %v4134_v16  ;;  %v1983_v36 = vadd.f32 %v1982_v11, %v1981_v38  ;;  %vm2037_vm10 = vweird.f32 %v4134_v16 }
 0x25f   :  { %v2021_v63 = vrot.slane %v2020_v39, 1  ;;  %v2026_v14 = vrot.slane %v2025_v7, 2  ;;  %v2011_v41 = vadd.f32 %v2010_v48, %v2009_v62  ;;  %v2005_v56 = vrot.slane %v2004_v32, 2  ;;  %v2096_v48 = vpop.permute.xlu1 %2095 }
 0x260   :  { %v2031_v2 = vadd.f32 1e-30, %v1999_v37  ;;  %v2041_v35 = vand.u32 2147483647, %v4134_v16  ;;  %v1984_v22 = vrot.slane %v1983_v36, 1  ;;  %v2043_v6 = vand.u32 2147483648, %v4134_v16 }
 0x261   :  { %v2022_v4 = vadd.f32 %v2021_v63, %v2020_v39  ;;  %v2027_v21 = vadd.f32 %v2026_v14, %v2025_v7  ;;  %v2012_v13 = vrot.slane %v2011_v41, 2  ;;  %v2006_v23 = vadd.f32 %v2005_v56, %v2004_v32 }
 0x262   :  { %2356 = vrcp.f32 %v2031_v2  ;;  %v2056_v28 = vand.u32 2147483647, %v2031_v2  ;;  %v2058_v53 = vand.u32 2147483648, %v2031_v2  ;;  %vm2052_vm14 = vweird.f32 %v2031_v2 }
 0x263   :  { %v2028_v8 = vrot.slane %v2027_v21, 1  ;;  %v2062_v51 = vadd.f32 1e-30, %v2022_v4  ;;  %v2013_v18 = vadd.f32 %v2012_v13, %v2011_v41  ;;  %v2007_v20 = vrot.slane %v2006_v23, 1 }
 0x264   :  { %v4139_v42 = vpop.eup %2354  ;;  %vm4160_vm8 = vcmp.eq.f32.partialorder %v2056_v28, 8.507059e+37  ;;  %v2059_v31 = vor.u32 1.1754944e-38, %v2058_v53  ;;  %vm2042_vm15 = vcmp.eq.f32.partialorder %v2041_v35, 8.507059e+37  ;;  %v2044_v3 = vor.u32 1.1754944e-38, %v2043_v6 }
 0x265   :  { %v2029_v55 = vadd.f32 %v2028_v8, %v2027_v21  ;;  %2358 = vrcp.f32 %v2062_v51  ;;  %v2033_v24 = vmul.f32 %v4139_v42, %v4134_v16  ;;  %v2073_v49 = vand.u32 2147483647, %v2062_v51 }
 0x266   :  { %vm2038_vm1 = vweird.f32 %v4139_v42  ;;  %v2075_v5 = vand.u32 2147483648, %v2062_v51  ;;  %vm2069_vm4 = vweird.f32 %v2062_v51  ;;  %v2014_v27 = vrot.slane %v2013_v18, 1 }
 0x267   :  { %v4145_v44 = vadd.f32 1e-30, %v2029_v55  ;;  %v2034_v0 = vsub.f32 1.0, %v2033_v24  ;;  %vm4166_vm12 = vmor %vm2037_vm10, %vm2038_vm1  ;;  %vm2074_vm9 = vcmp.eq.f32.partialorder %v2073_v49, 8.507059e+37  ;;  %v1985_v14 = vadd.f32 %v1984_v22, %v1983_v36 }
 0x268   :  { %v2357_v60 = vpop.eup %2356  ;;  %v2076_v17 = vor.u32 1.1754944e-38, %v2075_v5  ;;  %v1978_v62 = vadd.f32 %v1977_v26, %v4143_v30  ;;  %v2015_v21 = vadd.f32 %v2014_v27, %v2013_v18  ;;  %vm2111_vm10 = vcmask 1040384  }
 0x269   :  { %2360 = vrcp.f32 %v4145_v44  ;;  %v2048_v40 = vmul.f32 %v2357_v60, %v2031_v2  ;;  %v2035_v25 = vmul.f32 %v4139_v42, %v2034_v0  ;;  %vm2053_vm7 = vweird.f32 %v2357_v60 }
 0x26a   :  { %vm4156_vm6 = vmor %vm2052_vm14, %vm2053_vm7  ;;  %v2088_v1 = vand.u32 2147483647, %v4145_v44  ;;  %v2090_v39 = vand.u32 2147483648, %v4145_v44  ;;  %v2008_v2 = vadd.f32 %v2007_v20, %v2006_v23  ;;  %vm2084_vm0 = vweird.f32 %v4145_v44 }
 0x26b   :  { %v2359_v34 = vpop.eup %2358  ;;  %v2049_v57 = vsub.f32 1.0, %v2048_v40  ;;  %v2036_v9 = vadd.f32 %v4139_v42, %v2035_v25  ;;  %v4449_v40 = vlaneseq }
 0x26c   :  { %v2065_v47 = vmul.f32 %v2359_v34, %v2062_v51  ;;  %vm2070_vm5 = vweird.f32 %v2359_v34  ;;  %v2091_v59 = vor.u32 1.1754944e-38, %v2090_v39  ;;  %vm2089_vm3 = vcmp.eq.f32.partialorder %v2088_v1, 8.507059e+37 }
 0x26d   :  { %v2050_v19 = vmul.f32 %v2357_v60, %v2049_v57  ;;  %vm2071_vm11 = vmor %vm2069_vm4, %vm2070_vm5  ;;  %v2040_v16 = vsel %vm4166_vm12, %v4139_v42, %v2036_v9  ;;  %v2102_v42 = vpop.permute.xlu2 %2101  ;;  %vm2116_vm14 = vcmp.lt.s32.totalorder %v4449_v40, 256 }
 0x26e   :  { %v2066_v29 = vsub.f32 1.0, %v2065_v47  ;;  %v2045_v4 = vsel %vm2042_vm15, %v2044_v3, %v2040_v16 }
 0x26f   :  { %v2361_v50 = vpop.eup %2360  ;;  %v2051_v61 = vadd.f32 %v2357_v60, %v2050_v19  ;;  %v2046_v55 = vmul.f32 %v2045_v4, %v1978_v62 }
 0x270   :  { %v2067_v52 = vmul.f32 %v2359_v34, %v2066_v29  ;;  %v2080_v10 = vmul.f32 %v2361_v50, %v4145_v44  ;;  %vm2085_vm13 = vweird.f32 %v2361_v50 }
 0x271   :  { %v2055_v45 = vsel %vm4156_vm6, %v2357_v60, %v2051_v61  ;;  %vm2086_vm2 = vmor %vm2084_vm0, %vm2085_vm13  ;;  %v2098_v36 = vmul.f32 %v2096_v48, %v2046_v55 }
 0x272   :  { %v2068_v46 = vadd.f32 %v2359_v34, %v2067_v52  ;;  %v2081_v43 = vsub.f32 1.0, %v2080_v10  ;;  %v2060_v12 = vsel %vm4160_vm8, %v2059_v31, %v2055_v45 }
 0x273   :  { %v2061_v33 = vmul.f32 %v2060_v12, %v1985_v14 }
 0x274   :  { %v2072_v7 = vsel %vm2071_vm11, %v2359_v34, %v2068_v46  ;;  %v2082_v37 = vmul.f32 %v2361_v50, %v2081_v43 }
 0x275   :  { %v2077_v63 = vsel %vm2074_vm9, %v2076_v17, %v2072_v7  ;;  %v2099_v32 = vmul.f32 %v2096_v48, %v2061_v33 }
 0x276   :  { %v2083_v38 = vadd.f32 %v2361_v50, %v2082_v37  ;;  %v2078_v8 = vmul.f32 %v2077_v63, %v2008_v2 }
 0x278   :  { %v2087_v51 = vsel %vm2086_vm2, %v2361_v50, %v2083_v38  ;;  %v2104_v41 = vmul.f32 %v2102_v42, %v2078_v8 }
 0x279   :  { %v2092_v11 = vsel %vm2089_vm3, %v2091_v59, %v2087_v51 }
 0x27a   :  { %v2093_v24 = vmul.f32 %v2092_v11, %v2015_v21  ;;  %v2106_v30 = vadd.f32 %v2104_v41, %v2098_v36 }
 0x27c   :  { %v2105_v60 = vmul.f32 %v2102_v42, %v2093_v24 }
 0x27e   :  { %v2107_v44 = vadd.f32 %v2105_v60, %v2099_v32 }
 0x280   :  { %v2110_v0 = vrot.slane %v2107_v44, 7 }
 0x282   :  { %v2112_v56 = vsel %vm2111_vm10, %v2106_v30, %v2110_v0 }
 0x283   :  { %2118 = vst.msk [vmem:[#allocation2] sm:$0x3] %vm2116_vm14, %v2112_v56 }
 0x284   :  { %2129 = dma.vmem_to_hbm [thread:$0]  %s2125_s7, 32, %s2127_s10, [#allocation3]  }
 0x285   :  { %2388 = dma.done.wait [#allocation3], 32  }
 0x286   :  { %2389 = vsyncadd [#allocation3], 4294967264 }
 0x287   :  { %2134 = vsyncpa [#allocation3], 1 }

</bundles_post_ra>
